<compile_context>
chip_gen: v6e
topology: v6e:2x2x1
jax: 0.10.0
libtpu: 0.0.40
codegen_flags: <defaults>
</compile_context>

<pallas_src>
import functools

import jax
import jax.numpy as jnp
from jax import lax
from jax.experimental import pallas as pl
from jax.experimental.pallas import tpu as pltpu

_STRIDE = 2   # the module's strides==2 branch
_PAD = 16     # hard-coded padding=16 in nn.LazyConv2d(..., padding=16)


# --------------------------------------------------------------------------- kernel

def _identity_s2_kernel(x_ref, w_ref, b_ref, o_ref, *, ho, wo, i0, hi, wi):
    """Fused 1x1-conv / stride-2 / pad-16 on NCHW input, single invocation.

    x_ref: (N, Cin, H, W)    VMEM  -- full input block (grid == ())
    w_ref: (Cout, Cin)       VMEM  -- conv weights
    b_ref: (Cout, 1)         VMEM  -- conv bias
    o_ref: (N, Cout, Ho*Wo)  VMEM  -- lane-dense flattened output
    """
    n_b, cin, h, w = x_ref.shape
    s = ho * wo
    f32 = jnp.float32

    # ---- 0/1 selection masks, built once from 2-D iota (no div/mod/strided ops) --
    # flat output index L = oh*wo + ow ;  ow = L & (wo-1), oh = L >> log2(wo)
    pow2 = (wo & (wo - 1)) == 0
    shift = wo.bit_length() - 1

    c_iw = lax.broadcasted_iota(jnp.int32, (w, s), 0)        # input column
    c_ll = lax.broadcasted_iota(jnp.int32, (w, s), 1)        # flat output position
    c_ow = jnp.bitwise_and(c_ll, wo - 1) if pow2 else c_ll % wo
    # col_sel[iw, L] == 1 iff output column of L is interior and samples input col iw
    col_sel = jnp.where(
        (c_ow >= i0) & (c_ow < i0 + wi) & (c_iw == _STRIDE * (c_ow - i0)),
        1.0, 0.0).astype(f32)

    r_ih = lax.broadcasted_iota(jnp.int32, (h, s), 0)        # input row
    r_ll = lax.broadcasted_iota(jnp.int32, (h, s), 1)        # flat output position
    r_oh = jnp.right_shift(r_ll, shift) if pow2 else r_ll // wo
    # row_sel[ih, L] == 1 iff output row of L is interior and samples input row ih
    row_sel = jnp.where(
        (r_oh >= i0) & (r_oh < i0 + hi) & (r_ih == _STRIDE * (r_oh - i0)),
        1.0, 0.0).astype(f32)

    xv = x_ref[...].astype(f32)        # tiny (tens of KiB): load the whole input once
    w_mat = w_ref[...].astype(f32)     # (Cout, Cin)
    b_col = b_ref[...].astype(f32)     # (Cout, 1)

    for n in range(n_b):               # static unroll -- grid stays (), no step overhead
        mixed = b_col                  # bias fills every output pixel (incl. the border)
        for ci in range(cin):          # static unroll over input channels
            img = xv[n, ci]                                             # (H, W)
            # place interior columns of every input row at their flat positions
            cols = jnp.dot(img, col_sel, preferred_element_type=f32)    # (H, Ho*Wo)
            # per flat position, pick the sampled input row (zero outside interior)
            samp = jnp.sum(cols * row_sel, axis=0, keepdims=True)       # (1, Ho*Wo)
            # channel mix on the VPU: all Cout rows at once (hoisted weight splat)
            mixed = mixed + w_mat[:, ci:ci + 1] * samp                  # (Cout, Ho*Wo)
        # one unmasked, lane-dense (Cout, Ho*Wo) store per image (no per-channel slices)
        o_ref[n] = mixed.astype(o_ref.dtype)


# --------------------------------------------------------------------------- wrapper

def _conv1x1_stride2_pad16_impl(x, weight, bias):
    """strides==2 branch: LazyConv2d(Cout, kernel_size=1, stride=2, padding=16)."""
    if weight.ndim == 4:               # torch conv weight layout (Cout, Cin, 1, 1)
        weight = weight.reshape(weight.shape[0], weight.shape[1])
    n, cin, h, w = x.shape
    cout = weight.shape[0]

    # conv output extent for kernel_size=1
    ho = (h + 2 * _PAD - 1) // _STRIDE + 1
    wo = (w + 2 * _PAD - 1) // _STRIDE + 1
    # interior geometry: output pixels whose 1x1 sample lands inside the image;
    # pad % stride == 0  =>  those samples are exactly x[:, :, ::stride, ::stride].
    assert _PAD % _STRIDE == 0, "interior algebra assumes pad divisible by stride"
    i0 = _PAD // _STRIDE
    hi = (h - 1) // _STRIDE + 1
    wi = (w - 1) // _STRIDE + 1

    kernel = functools.partial(_identity_s2_kernel, ho=ho, wo=wo, i0=i0, hi=hi, wi=wi)

    bytes_io = (x.size + n * cout * ho * wo) * x.dtype.itemsize + (weight.size + cout) * 4
    flops = 2 * n * cin * h * w * (ho * wo) + 2 * n * cout * cin * ho * wo

    out_flat = pl.pallas_call(
        kernel,
        out_shape=jax.ShapeDtypeStruct((n, cout, ho * wo), x.dtype),
        in_specs=[
            pl.BlockSpec(memory_space=pltpu.MemorySpace.VMEM),   # x (full block)
            pl.BlockSpec(memory_space=pltpu.MemorySpace.VMEM),   # weight
            pl.BlockSpec(memory_space=pltpu.MemorySpace.VMEM),   # bias
        ],
        out_specs=pl.BlockSpec(memory_space=pltpu.MemorySpace.VMEM),
        cost_estimate=pl.CostEstimate(flops=flops, transcendentals=0,
                                      bytes_accessed=bytes_io),
    )(x, weight.astype(jnp.float32), bias.astype(jnp.float32).reshape(cout, 1))

    # metadata-only unflatten of the lane-dense kernel output
    return out_flat.reshape(n, cout, ho, wo)


_conv1x1_stride2_pad16 = jax.jit(_conv1x1_stride2_pad16_impl)


def identity_op(x, num_channels, strides, weight=None, bias=None):
    """Pallas equivalent of ops.Identity(num_channels, strides).forward(x)."""
    if strides == 2:
        return _conv1x1_stride2_pad16(x, weight, bias)
    # strides == 1: the module is literally `lambda x: x`; skip any HBM copy.
    # (Note: the returned array aliases the input, which is fine in JAX.)
    return x


# --------------------------------------------------------------------------- main

if __name__ == "__main__":
    key = jax.random.PRNGKey(0)
    k_x, k_w, k_b = jax.random.split(key, 3)

    # CIFAR-format NCHW input (module spec: [batch, channels, 32, 32])
    x = jax.random.normal(k_x, (2, 4, 32, 32), dtype=jnp.float32)

    # ----- strides == 1 branch: identity (no kernel, no HBM traffic) -----
    y1 = identity_op(x, num_channels=4, strides=1)
    y1 = jax.block_until_ready(y1)
    assert y1.shape == x.shape
    assert jnp.array_equal(y1, x)

    # ----- strides == 2 branch: LazyConv2d(8, kernel_size=1, stride=2, padding=16) -----
    num_channels = 8
    cin = x.shape[1]
    weight = jax.random.normal(k_w, (num_channels, cin), dtype=jnp.float32) * 0.1
    bias = jax.random.normal(k_b, (num_channels,), dtype=jnp.float32) * 0.1

    y2 = identity_op(x, num_channels=num_channels, strides=2, weight=weight, bias=bias)
    y2 = jax.block_until_ready(y2)
    assert y2.shape == (2, num_channels, 32, 32), y2.shape

    # reference check: literal pad / stride-2 / 1x1-conv math in plain JAX
    x_pad = jnp.pad(x, ((0, 0), (0, 0), (16, 16), (16, 16)))[:, :, ::2, ::2]
    ref = jnp.einsum("oc,nchw->nohw", weight, x_pad) + bias[None, :, None, None]
    assert jnp.allclose(y2, ref, atol=1e-4, rtol=1e-4), float(jnp.max(jnp.abs(y2 - ref)))

    print("KERNEL_OK")
</pallas_src>

<mosaic_0001>
module attributes {stable_mosaic.version = 11 : i64} {
  func.func @_identity_s2_kernel(%arg0: memref<2x4x32x32xf32, #tpu.memory_space<vmem>>, %arg1: memref<8x4xf32, #tpu.memory_space<vmem>>, %arg2: memref<8x1xf32, #tpu.memory_space<vmem>>, %arg3: memref<2x8x1024xf32, #tpu.memory_space<vmem>>) attributes {dimension_semantics = [], scalar_prefetch = 0 : i64, scratch_operands = 0 : i64, tpu.core_type = #tpu.core_type<tc>} {
    %0 = tpu.iota {dimensions = array<i32: 0>} : vector<32x1024xi32>
    %1 = tpu.iota {dimensions = array<i32: 1>} : vector<32x1024xi32>
    %c31_i32 = arith.constant 31 : i32
    %2 = vector.broadcast %c31_i32 : i32 to vector<32x1024xi32>
    %3 = arith.andi %1, %2 : vector<32x1024xi32>
    %c8_i32 = arith.constant 8 : i32
    %4 = vector.broadcast %c8_i32 : i32 to vector<32x1024xi32>
    %5 = arith.cmpi sge, %3, %4 : vector<32x1024xi32>
    %c24_i32 = arith.constant 24 : i32
    %6 = vector.broadcast %c24_i32 : i32 to vector<32x1024xi32>
    %7 = arith.cmpi slt, %3, %6 : vector<32x1024xi32>
    %8 = arith.andi %5, %7 : vector<32x1024xi1>
    %c8_i32_0 = arith.constant 8 : i32
    %9 = vector.broadcast %c8_i32_0 : i32 to vector<32x1024xi32>
    %10 = arith.subi %3, %9 : vector<32x1024xi32>
    %c2_i32 = arith.constant 2 : i32
    %11 = vector.broadcast %c2_i32 : i32 to vector<32x1024xi32>
    %12 = arith.muli %11, %10 : vector<32x1024xi32>
    %13 = arith.cmpi eq, %0, %12 : vector<32x1024xi32>
    %14 = arith.andi %8, %13 : vector<32x1024xi1>
    %cst = arith.constant 1.000000e+00 : f32
    %cst_1 = arith.constant 0.000000e+00 : f32
    %15 = vector.broadcast %cst : f32 to vector<32x1024xf32>
    %16 = vector.broadcast %cst_1 : f32 to vector<32x1024xf32>
    %17 = arith.select %14, %15, %16 : vector<32x1024xi1>, vector<32x1024xf32>
    %18 = tpu.iota {dimensions = array<i32: 0>} : vector<32x1024xi32>
    %19 = tpu.iota {dimensions = array<i32: 1>} : vector<32x1024xi32>
    %c5_i32 = arith.constant 5 : i32
    %20 = vector.broadcast %c5_i32 : i32 to vector<32x1024xi32>
    %21 = arith.shrsi %19, %20 : vector<32x1024xi32>
    %c8_i32_2 = arith.constant 8 : i32
    %22 = vector.broadcast %c8_i32_2 : i32 to vector<32x1024xi32>
    %23 = arith.cmpi sge, %21, %22 : vector<32x1024xi32>
    %c24_i32_3 = arith.constant 24 : i32
    %24 = vector.broadcast %c24_i32_3 : i32 to vector<32x1024xi32>
    %25 = arith.cmpi slt, %21, %24 : vector<32x1024xi32>
    %26 = arith.andi %23, %25 : vector<32x1024xi1>
    %c8_i32_4 = arith.constant 8 : i32
    %27 = vector.broadcast %c8_i32_4 : i32 to vector<32x1024xi32>
    %28 = arith.subi %21, %27 : vector<32x1024xi32>
    %c2_i32_5 = arith.constant 2 : i32
    %29 = vector.broadcast %c2_i32_5 : i32 to vector<32x1024xi32>
    %30 = arith.muli %29, %28 : vector<32x1024xi32>
    %31 = arith.cmpi eq, %18, %30 : vector<32x1024xi32>
    %32 = arith.andi %26, %31 : vector<32x1024xi1>
    %cst_6 = arith.constant 1.000000e+00 : f32
    %cst_7 = arith.constant 0.000000e+00 : f32
    %33 = vector.broadcast %cst_6 : f32 to vector<32x1024xf32>
    %34 = vector.broadcast %cst_7 : f32 to vector<32x1024xf32>
    %35 = arith.select %32, %33, %34 : vector<32x1024xi1>, vector<32x1024xf32>
    %c0 = arith.constant 0 : index
    %c0_8 = arith.constant 0 : index
    %c0_9 = arith.constant 0 : index
    %c0_10 = arith.constant 0 : index
    %36 = vector.load %arg0[%c0, %c0_8, %c0_9, %c0_10] : memref<2x4x32x32xf32, #tpu.memory_space<vmem>>, vector<2x4x32x32xf32>
    %c0_11 = arith.constant 0 : index
    %c0_12 = arith.constant 0 : index
    %37 = vector.load %arg1[%c0_11, %c0_12] : memref<8x4xf32, #tpu.memory_space<vmem>>, vector<8x4xf32>
    %c0_13 = arith.constant 0 : index
    %c0_14 = arith.constant 0 : index
    %38 = vector.load %arg2[%c0_13, %c0_14] : memref<8x1xf32, #tpu.memory_space<vmem>>, vector<8x1xf32>
    %39 = vector.extract_strided_slice %36 {offsets = [0, 0, 0, 0], sizes = [1, 1, 32, 32], strides = [1, 1, 1, 1]} : vector<2x4x32x32xf32> to vector<1x1x32x32xf32>
    %40 = vector.shape_cast %39 : vector<1x1x32x32xf32> to vector<32x32xf32>
    %cst_15 = arith.constant dense<0.000000e+00> : vector<32x1024xf32>
    %41 = tpu.matmul %40, %17, %cst_15 {dimension_numbers = #tpu.dot_dimension_numbers<[1], [0], [0], [1], [0, 0, 1, 1], [], []>} : vector<32x32xf32>, vector<32x1024xf32>, vector<32x1024xf32> -> vector<32x1024xf32>
    %42 = arith.mulf %41, %35 : vector<32x1024xf32>
    %cst_16 = arith.constant dense<0.000000e+00> : vector<1024xf32>
    %43 = vector.multi_reduction <add>, %42, %cst_16 [0] : vector<32x1024xf32> to vector<1024xf32>
    %44 = vector.shape_cast %43 : vector<1024xf32> to vector<1x1024xf32>
    %45 = vector.extract_strided_slice %37 {offsets = [0, 0], sizes = [8, 1], strides = [1, 1]} : vector<8x4xf32> to vector<8x1xf32>
    %46 = vector.broadcast %45 : vector<8x1xf32> to vector<8x1024xf32>
    %47 = vector.broadcast %44 : vector<1x1024xf32> to vector<8x1024xf32>
    %48 = arith.mulf %46, %47 : vector<8x1024xf32>
    %49 = vector.broadcast %38 : vector<8x1xf32> to vector<8x1024xf32>
    %50 = arith.addf %49, %48 : vector<8x1024xf32>
    %51 = vector.extract_strided_slice %36 {offsets = [0, 1, 0, 0], sizes = [1, 1, 32, 32], strides = [1, 1, 1, 1]} : vector<2x4x32x32xf32> to vector<1x1x32x32xf32>
    %52 = vector.shape_cast %51 : vector<1x1x32x32xf32> to vector<32x32xf32>
    %cst_17 = arith.constant dense<0.000000e+00> : vector<32x1024xf32>
    %53 = tpu.matmul %52, %17, %cst_17 {dimension_numbers = #tpu.dot_dimension_numbers<[1], [0], [0], [1], [0, 0, 1, 1], [], []>} : vector<32x32xf32>, vector<32x1024xf32>, vector<32x1024xf32> -> vector<32x1024xf32>
    %54 = arith.mulf %53, %35 : vector<32x1024xf32>
    %cst_18 = arith.constant dense<0.000000e+00> : vector<1024xf32>
    %55 = vector.multi_reduction <add>, %54, %cst_18 [0] : vector<32x1024xf32> to vector<1024xf32>
    %56 = vector.shape_cast %55 : vector<1024xf32> to vector<1x1024xf32>
    %57 = vector.extract_strided_slice %37 {offsets = [0, 1], sizes = [8, 1], strides = [1, 1]} : vector<8x4xf32> to vector<8x1xf32>
    %58 = vector.broadcast %57 : vector<8x1xf32> to vector<8x1024xf32>
    %59 = vector.broadcast %56 : vector<1x1024xf32> to vector<8x1024xf32>
    %60 = arith.mulf %58, %59 : vector<8x1024xf32>
    %61 = arith.addf %50, %60 : vector<8x1024xf32>
    %62 = vector.extract_strided_slice %36 {offsets = [0, 2, 0, 0], sizes = [1, 1, 32, 32], strides = [1, 1, 1, 1]} : vector<2x4x32x32xf32> to vector<1x1x32x32xf32>
    %63 = vector.shape_cast %62 : vector<1x1x32x32xf32> to vector<32x32xf32>
    %cst_19 = arith.constant dense<0.000000e+00> : vector<32x1024xf32>
    %64 = tpu.matmul %63, %17, %cst_19 {dimension_numbers = #tpu.dot_dimension_numbers<[1], [0], [0], [1], [0, 0, 1, 1], [], []>} : vector<32x32xf32>, vector<32x1024xf32>, vector<32x1024xf32> -> vector<32x1024xf32>
    %65 = arith.mulf %64, %35 : vector<32x1024xf32>
    %cst_20 = arith.constant dense<0.000000e+00> : vector<1024xf32>
    %66 = vector.multi_reduction <add>, %65, %cst_20 [0] : vector<32x1024xf32> to vector<1024xf32>
    %67 = vector.shape_cast %66 : vector<1024xf32> to vector<1x1024xf32>
    %68 = vector.extract_strided_slice %37 {offsets = [0, 2], sizes = [8, 1], strides = [1, 1]} : vector<8x4xf32> to vector<8x1xf32>
    %69 = vector.broadcast %68 : vector<8x1xf32> to vector<8x1024xf32>
    %70 = vector.broadcast %67 : vector<1x1024xf32> to vector<8x1024xf32>
    %71 = arith.mulf %69, %70 : vector<8x1024xf32>
    %72 = arith.addf %61, %71 : vector<8x1024xf32>
    %73 = vector.extract_strided_slice %36 {offsets = [0, 3, 0, 0], sizes = [1, 1, 32, 32], strides = [1, 1, 1, 1]} : vector<2x4x32x32xf32> to vector<1x1x32x32xf32>
    %74 = vector.shape_cast %73 : vector<1x1x32x32xf32> to vector<32x32xf32>
    %cst_21 = arith.constant dense<0.000000e+00> : vector<32x1024xf32>
    %75 = tpu.matmul %74, %17, %cst_21 {dimension_numbers = #tpu.dot_dimension_numbers<[1], [0], [0], [1], [0, 0, 1, 1], [], []>} : vector<32x32xf32>, vector<32x1024xf32>, vector<32x1024xf32> -> vector<32x1024xf32>
    %76 = arith.mulf %75, %35 : vector<32x1024xf32>
    %cst_22 = arith.constant dense<0.000000e+00> : vector<1024xf32>
    %77 = vector.multi_reduction <add>, %76, %cst_22 [0] : vector<32x1024xf32> to vector<1024xf32>
    %78 = vector.shape_cast %77 : vector<1024xf32> to vector<1x1024xf32>
    %79 = vector.extract_strided_slice %37 {offsets = [0, 3], sizes = [8, 1], strides = [1, 1]} : vector<8x4xf32> to vector<8x1xf32>
    %80 = vector.broadcast %79 : vector<8x1xf32> to vector<8x1024xf32>
    %81 = vector.broadcast %78 : vector<1x1024xf32> to vector<8x1024xf32>
    %82 = arith.mulf %80, %81 : vector<8x1024xf32>
    %83 = arith.addf %72, %82 : vector<8x1024xf32>
    %c0_23 = arith.constant 0 : index
    %c0_24 = arith.constant 0 : index
    %c0_25 = arith.constant 0 : index
    %84 = vector.load %arg3[%c0_23, %c0_24, %c0_25] : memref<2x8x1024xf32, #tpu.memory_space<vmem>>, vector<1x8x1024xf32>
    %85 = vector.shape_cast %84 : vector<1x8x1024xf32> to vector<8x1024xf32>
    %86 = vector.shape_cast %83 : vector<8x1024xf32> to vector<1x8x1024xf32>
    tpu.vector_store %arg3[%c0_23, %c0_24, %c0_25], %86 {strides = array<i32>} : memref<2x8x1024xf32, #tpu.memory_space<vmem>>, vector<1x8x1024xf32>,
    %87 = vector.extract_strided_slice %36 {offsets = [1, 0, 0, 0], sizes = [1, 1, 32, 32], strides = [1, 1, 1, 1]} : vector<2x4x32x32xf32> to vector<1x1x32x32xf32>
    %88 = vector.shape_cast %87 : vector<1x1x32x32xf32> to vector<32x32xf32>
    %cst_26 = arith.constant dense<0.000000e+00> : vector<32x1024xf32>
    %89 = tpu.matmul %88, %17, %cst_26 {dimension_numbers = #tpu.dot_dimension_numbers<[1], [0], [0], [1], [0, 0, 1, 1], [], []>} : vector<32x32xf32>, vector<32x1024xf32>, vector<32x1024xf32> -> vector<32x1024xf32>
    %90 = arith.mulf %89, %35 : vector<32x1024xf32>
    %cst_27 = arith.constant dense<0.000000e+00> : vector<1024xf32>
    %91 = vector.multi_reduction <add>, %90, %cst_27 [0] : vector<32x1024xf32> to vector<1024xf32>
    %92 = vector.shape_cast %91 : vector<1024xf32> to vector<1x1024xf32>
    %93 = vector.extract_strided_slice %37 {offsets = [0, 0], sizes = [8, 1], strides = [1, 1]} : vector<8x4xf32> to vector<8x1xf32>
    %94 = vector.broadcast %93 : vector<8x1xf32> to vector<8x1024xf32>
    %95 = vector.broadcast %92 : vector<1x1024xf32> to vector<8x1024xf32>
    %96 = arith.mulf %94, %95 : vector<8x1024xf32>
    %97 = vector.broadcast %38 : vector<8x1xf32> to vector<8x1024xf32>
    %98 = arith.addf %97, %96 : vector<8x1024xf32>
    %99 = vector.extract_strided_slice %36 {offsets = [1, 1, 0, 0], sizes = [1, 1, 32, 32], strides = [1, 1, 1, 1]} : vector<2x4x32x32xf32> to vector<1x1x32x32xf32>
    %100 = vector.shape_cast %99 : vector<1x1x32x32xf32> to vector<32x32xf32>
    %cst_28 = arith.constant dense<0.000000e+00> : vector<32x1024xf32>
    %101 = tpu.matmul %100, %17, %cst_28 {dimension_numbers = #tpu.dot_dimension_numbers<[1], [0], [0], [1], [0, 0, 1, 1], [], []>} : vector<32x32xf32>, vector<32x1024xf32>, vector<32x1024xf32> -> vector<32x1024xf32>
    %102 = arith.mulf %101, %35 : vector<32x1024xf32>
    %cst_29 = arith.constant dense<0.000000e+00> : vector<1024xf32>
    %103 = vector.multi_reduction <add>, %102, %cst_29 [0] : vector<32x1024xf32> to vector<1024xf32>
    %104 = vector.shape_cast %103 : vector<1024xf32> to vector<1x1024xf32>
    %105 = vector.extract_strided_slice %37 {offsets = [0, 1], sizes = [8, 1], strides = [1, 1]} : vector<8x4xf32> to vector<8x1xf32>
    %106 = vector.broadcast %105 : vector<8x1xf32> to vector<8x1024xf32>
    %107 = vector.broadcast %104 : vector<1x1024xf32> to vector<8x1024xf32>
    %108 = arith.mulf %106, %107 : vector<8x1024xf32>
    %109 = arith.addf %98, %108 : vector<8x1024xf32>
    %110 = vector.extract_strided_slice %36 {offsets = [1, 2, 0, 0], sizes = [1, 1, 32, 32], strides = [1, 1, 1, 1]} : vector<2x4x32x32xf32> to vector<1x1x32x32xf32>
    %111 = vector.shape_cast %110 : vector<1x1x32x32xf32> to vector<32x32xf32>
    %cst_30 = arith.constant dense<0.000000e+00> : vector<32x1024xf32>
    %112 = tpu.matmul %111, %17, %cst_30 {dimension_numbers = #tpu.dot_dimension_numbers<[1], [0], [0], [1], [0, 0, 1, 1], [], []>} : vector<32x32xf32>, vector<32x1024xf32>, vector<32x1024xf32> -> vector<32x1024xf32>
    %113 = arith.mulf %112, %35 : vector<32x1024xf32>
    %cst_31 = arith.constant dense<0.000000e+00> : vector<1024xf32>
    %114 = vector.multi_reduction <add>, %113, %cst_31 [0] : vector<32x1024xf32> to vector<1024xf32>
    %115 = vector.shape_cast %114 : vector<1024xf32> to vector<1x1024xf32>
    %116 = vector.extract_strided_slice %37 {offsets = [0, 2], sizes = [8, 1], strides = [1, 1]} : vector<8x4xf32> to vector<8x1xf32>
    %117 = vector.broadcast %116 : vector<8x1xf32> to vector<8x1024xf32>
    %118 = vector.broadcast %115 : vector<1x1024xf32> to vector<8x1024xf32>
    %119 = arith.mulf %117, %118 : vector<8x1024xf32>
    %120 = arith.addf %109, %119 : vector<8x1024xf32>
    %121 = vector.extract_strided_slice %36 {offsets = [1, 3, 0, 0], sizes = [1, 1, 32, 32], strides = [1, 1, 1, 1]} : vector<2x4x32x32xf32> to vector<1x1x32x32xf32>
    %122 = vector.shape_cast %121 : vector<1x1x32x32xf32> to vector<32x32xf32>
    %cst_32 = arith.constant dense<0.000000e+00> : vector<32x1024xf32>
    %123 = tpu.matmul %122, %17, %cst_32 {dimension_numbers = #tpu.dot_dimension_numbers<[1], [0], [0], [1], [0, 0, 1, 1], [], []>} : vector<32x32xf32>, vector<32x1024xf32>, vector<32x1024xf32> -> vector<32x1024xf32>
    %124 = arith.mulf %123, %35 : vector<32x1024xf32>
    %cst_33 = arith.constant dense<0.000000e+00> : vector<1024xf32>
    %125 = vector.multi_reduction <add>, %124, %cst_33 [0] : vector<32x1024xf32> to vector<1024xf32>
    %126 = vector.shape_cast %125 : vector<1024xf32> to vector<1x1024xf32>
    %127 = vector.extract_strided_slice %37 {offsets = [0, 3], sizes = [8, 1], strides = [1, 1]} : vector<8x4xf32> to vector<8x1xf32>
    %128 = vector.broadcast %127 : vector<8x1xf32> to vector<8x1024xf32>
    %129 = vector.broadcast %126 : vector<1x1024xf32> to vector<8x1024xf32>
    %130 = arith.mulf %128, %129 : vector<8x1024xf32>
    %131 = arith.addf %120, %130 : vector<8x1024xf32>
    %c1 = arith.constant 1 : index
    %c0_34 = arith.constant 0 : index
    %c0_35 = arith.constant 0 : index
    %132 = vector.load %arg3[%c1, %c0_34, %c0_35] : memref<2x8x1024xf32, #tpu.memory_space<vmem>>, vector<1x8x1024xf32>
    %133 = vector.shape_cast %132 : vector<1x8x1024xf32> to vector<8x1024xf32>
    %134 = vector.shape_cast %131 : vector<8x1024xf32> to vector<1x8x1024xf32>
    tpu.vector_store %arg3[%c1, %c0_34, %c0_35], %134 {strides = array<i32>} : memref<2x8x1024xf32, #tpu.memory_space<vmem>>, vector<1x8x1024xf32>,
    return
  }
}

</mosaic_0001>

<bundles_post_ra>
// kernel: _conv1x1_stride2_pad16_impl.1
= control target key start
LH: loop header
LB: loop body
LE: loop exit
PB: predicated region body
PF: predicated region fallthrough
CT: control target
= control target key end

     0   :  { %8 = vsyncpa [#allocation3], 0  ;;  %s4757_s12 = smov [#allocation2]   ;;  %s7427_s0 = inlined_call_operand.hbm [shape: f32[2,4,32,32], index: 0, kind: input, shape index: {}]   ;;  %s7428_s1 = inlined_call_operand.vmem [shape: f32[8,4], index: 1, kind: input, shape index: {}]   ;;  %s7429_s2 = inlined_call_operand.vmem [shape: f32[8,1], index: 2, kind: input, shape index: {}]   ;;  %s7430_s3 = inlined_call_operand.vmem [shape: f32[2,8,1024], index: 3, kind: output, shape index: {}]  }
   0x1   :  { %s14_s13 = sshll.u32 %s4757_s12, 4  ;;  %s15_s13 = int_to_ptr.vmem [resolvable:$true] %s14_s13 }
   0x2   :  { %s4743_s14 = scalar_lea.vmem %s15_s13, 4096  ;;  %p4748_p1 = scmp.lt.s32.totalorder %s15_s13, %s15_s13 }
   0x3   :  { %p4744_p0 = scmp.ne.s32.totalorder %s15_s13, %s4743_s14  ;;  %p4749_p2 = scmp.lt.s32.totalorder %s4743_s14, %s4743_s14 }
   0x5   :  { %p4750_p3 = por %p4749_p2, %p4748_p1 }
   0x7   :  { %p4751_p4 = pnand %p4750_p3, %p4744_p0 }
   0x9   :  { %4754 = shalt.err (!%p4751_p4)
}
   0xa   :  { %s4758_s15 = smov 128   ;;  %s4759_s16 = smov 8  }
   0xb   :  { %20 = dma.hbm_to_vmem [thread:$0]  %s7427_s0, 4096, %s15_s13, [#allocation3], %s4758_s15, %s4758_s15, %s4759_s16  }
   0xc   :  { %4755 = dma.done.wait [#allocation3], 4096  }
   0xd   :  { %4756 = vsyncadd [#allocation3], 4294963200  ;;  %v28_v0 = vlaneseq  ;;  %v7531_v1 = vmov 0.0   ;;  %v4761_v3 = vmov 0   ;;  %v7626_v26 = vmov 0  ;;  %v4870_v31 = vld [vmem:[%s7428_s1] sm:$0xff] }
   0xe   :  { %441 = vmatprep.mubr.f32.mxu0 %v7531_v1  ;;  %530 = vmatprep.mubr.f32.mxu1 %v7531_v1  ;;  %v7628_v29 = vmov 0  ;;  %v7521_v32 = vmov 1.0   ;;  %v7630_v33 = vmov 0  ;;  %v7632_v35 = vmov 0  ;;  %v363_v41 = vld [vmem:[%s7429_s2] sm:$0xff] }
   0xf   :  { %v4791_v2 = vand.u32 127, %v28_v0  ;;  %4730 = vset.pattern.permute.xlu0 %v4761_v3  ;;  %v4793_v4 = vshrl.u32 %v28_v0, 7  ;;  %v7634_v36 = vmov 0  ;;  %v7636_v40 = vmov 0  ;;  %v5031_v58 = vld [vmem:[#allocation2] sm:$0xff]  ;;  %v5079_v3 = vld [vmem:[#allocation2 + $0x8] sm:$0xff] }
  0x10   :  { %839 = vperm.xlu0 %4730, %v4870_v31   ;;  %v7639_v42 = vmov 0  ;;  %v7642_v45 = vmov 0  ;;  %v7645_v46 = vmov 0  ;;  %v7648_v49 = vmov 0  ;;  %v342_v62 = vld [vmem:[#allocation2 + $0x60] sm:$0xff] }
  0x11   :  { %v4796_v5 = vadd.s32 128, %v4791_v2  ;;  %v4799_v6 = vadd.s32 384, %v4791_v2  ;;  %v42_v7 = vand.u32 31, %v4791_v2  ;;  %v4803_v8 = vadd.s32 256, %v4791_v2 }
  0x12   :  { %v4808_v11 = vadd.s32 24, %v4793_v4  ;;  %v4812_v14 = vadd.s32 16, %v4793_v4  ;;  %v4831_v23 = vadd.s32 640, %v4791_v2  ;;  %v4852_v28 = vadd.s32 896, %v4791_v2 }
  0x13   :  { %v43_v9 = vand.u32 31, %v4796_v5  ;;  %v45_v10 = vand.u32 31, %v4799_v6  ;;  %vm50_vm0 = vcmp.ge.s32.totalorder %v42_v7, 8  ;;  %vm58_vm1 = vcmp.lt.s32.totalorder %v42_v7, 24 }
  0x14   :  { %v4313_v12 = vadd.s32 4294967288, %v42_v7  ;;  %v44_v13 = vand.u32 31, %v4803_v8  ;;  %vm4814_vm5 = vmand %vm50_vm0, %vm58_vm1  ;;  %v4865_v30 = vadd.s32 8, %v4793_v4  ;;  %v47_v34 = vand.u32 31, %v4831_v23  ;;  %852 = vperm.xlu0 %4730, %v363_v41   ;;  %v345_v7 = vld [vmem:[#allocation2 + $0x78] sm:$0xff] }
  0x15   :  { %vm51_vm2 = vcmp.ge.s32.totalorder %v43_v9, 8  ;;  %vm59_vm3 = vcmp.lt.s32.totalorder %v43_v9, 24  ;;  %v4314_v15 = vadd.s32 4294967288, %v43_v9  ;;  %vm53_vm4 = vcmp.ge.s32.totalorder %v45_v10, 8 }
  0x16   :  { %vm4818_vm6 = vmand %vm51_vm2, %vm59_vm3  ;;  %vm61_vm7 = vcmp.lt.s32.totalorder %v45_v10, 24  ;;  %v4316_v18 = vadd.s32 4294967288, %v45_v10  ;;  %v4822_v19 = vmul.u32 2, %v4313_v12  ;;  %vm52_vm8 = vcmp.ge.s32.totalorder %v44_v13, 8  ;;  %v346_v10 = vld [vmem:[#allocation2 + $0x80] sm:$0xff] }
  0x17   :  { %v4824_v20 = vmul.u32 2, %v4314_v15  ;;  %vm4826_vm9 = vmand %vm53_vm4, %vm61_vm7  ;;  %vm60_vm10 = vcmp.lt.s32.totalorder %v44_v13, 24  ;;  %v4315_v22 = vadd.s32 4294967288, %v44_v13  ;;  %v4912_v37 = vand.u32 31, %v4852_v28  ;;  %v5119_v13 = vld [vmem:[#allocation2 + $0x10] sm:$0xff] }
  0x18   :  { %v4833_v24 = vmul.u32 2, %v4316_v18  ;;  %vm114_vm11 = vcmp.eq.s32.totalorder %v4808_v11, %v4822_v19  ;;  %vm4837_vm12 = vmand %vm52_vm8, %vm60_vm10  ;;  %vm106_vm8 = vcmp.eq.s32.totalorder %v4812_v14, %v4822_v19  ;;  %v4915_v38 = vadd.s32 512, %v4791_v2  ;;  %v348_v15 = vld [vmem:[#allocation2 + $0x90] sm:$0xff] }
  0x19   :  { %vm115_vm13 = vcmp.eq.s32.totalorder %v4808_v11, %v4824_v20  ;;  %vm4845_vm14 = vmand %vm4814_vm5, %vm114_vm11  ;;  %v4849_v27 = vmul.u32 2, %v4315_v22  ;;  %vm107_vm1 = vcmp.eq.s32.totalorder %v4812_v14, %v4824_v20  ;;  %v4918_v39 = vadd.s32 768, %v4791_v2 }
  0x1a   :  { %v7627_v26 = vsel %vm4845_vm14, 4294967295, %v7626_v26  ;;  %vm4856_vm15 = vmand %vm4818_vm6, %vm115_vm13  ;;  %vm117_vm0 = vcmp.eq.s32.totalorder %v4808_v11, %v4833_v24  ;;  %vm109_vm4 = vcmp.eq.s32.totalorder %v4812_v14, %v4833_v24  ;;  %v4318_v43 = vadd.s32 4294967288, %v47_v34 }
  0x1b   :  { %v7629_v29 = vsel %vm4856_vm15, 4294967295, %v7628_v29  ;;  %4329 = vmatprep.subr.msk.mxu0 %vm4856_vm15, %v7521_v32  ;;  %vm4877_vm2 = vmand %vm4826_vm9, %vm117_vm0  ;;  %vm116_vm3 = vcmp.eq.s32.totalorder %v4808_v11, %v4849_v27  ;;  %vm108_vm11 = vcmp.eq.s32.totalorder %v4812_v14, %v4849_v27  ;;  %vm99_vm0 = vcmp.eq.s32.totalorder %v4865_v30, %v4824_v20 }
  0x1c   :  { %v7631_v33 = vsel %vm4877_vm2, 4294967295, %v7630_v33  ;;  %4341 = vmatprep.subr.msk.mxu1 %vm4877_vm2, %v7521_v32  ;;  %4330 = vmatpush1.msk.msra.mxu0 %vm4845_vm14, %v7521_v32  ;;  %vm4894_vm7 = vmand %vm4837_vm12, %vm116_vm3  ;;  %vm101_vm3 = vcmp.eq.s32.totalorder %v4865_v30, %v4833_v24  ;;  %v46_v44 = vand.u32 31, %v4915_v38  ;;  %v4320_v47 = vadd.s32 4294967288, %v4912_v37 }
  0x1d   :  { %v7633_v35 = vsel %vm4894_vm7, 4294967295, %v7632_v35  ;;  %4342 = vmatpush1.msk.msra.mxu1 %vm4894_vm7, %v7521_v32  ;;  %vm4905_vm10 = vmand %vm4818_vm6, %vm107_vm1  ;;  %v48_v48 = vand.u32 31, %v4918_v39  ;;  %v7651_v50 = vmov 0  ;;  %v4996_v51 = vmul.u32 2, %v4318_v43 }
  0x1e   :  { %v7635_v36 = vsel %vm4905_vm10, 4294967295, %v7634_v36  ;;  %4331 = vmatprep.subr.msk.mxu0 %vm4905_vm10, %v7521_v32  ;;  %vm4926_vm13 = vmand %vm4826_vm9, %vm109_vm4  ;;  %v4317_v52 = vadd.s32 4294967288, %v46_v44  ;;  %v7654_v53 = vmov 0  ;;  %v7657_v54 = vmov 0 }
  0x1f   :  { %v7637_v40 = vsel %vm4926_vm13, 4294967295, %v7636_v40  ;;  %4343 = vmatprep.subr.msk.mxu1 %vm4926_vm13, %v7521_v32  ;;  %vm4940_vm1 = vmand %vm4814_vm5, %vm106_vm8  ;;  %vm98_vm8 = vcmp.eq.s32.totalorder %v4865_v30, %v4822_v19  ;;  %v5020_v55 = vmul.u32 2, %v4320_v47  ;;  %v4319_v56 = vadd.s32 4294967288, %v48_v48  ;;  %v334_v47 = vld [vmem:[#allocation2 + $0x20] sm:$0xff] }
  0x20   :  { %7638 = vst [vmem:[#allocation5_spill] sm:$0xff] %v7637_v40  ;;  %v7640_v42 = vsel %vm4940_vm1, 4294967295, %v7639_v42  ;;  %4332 = vmatpush1.msk.msra.mxu0 %vm4940_vm1, %v7521_v32  ;;  %vm4955_vm4 = vmand %vm4837_vm12, %vm108_vm11  ;;  %vm100_vm1 = vcmp.eq.s32.totalorder %v4865_v30, %v4849_v27  ;;  %v7660_v57 = vmov 0  ;;  %v7663_v59 = vmov 0 }
  0x21   :  { %7641 = vst [vmem:[#allocation6_spill] sm:$0xff] %v7640_v42  ;;  %v7643_v45 = vsel %vm4955_vm4, 4294967295, %v7642_v45  ;;  %4344 = vmatpush1.msk.msra.mxu1 %vm4955_vm4, %v7521_v32  ;;  %vm4966_vm13 = vmand %vm4818_vm6, %vm99_vm0  ;;  %vm91_vm0 = vcmp.eq.s32.totalorder %v4793_v4, %v4824_v20  ;;  %v5044_v60 = vmul.u32 2, %v4317_v52  ;;  %v7666_v61 = vmov 0  ;;  %v333_v20 = vld [vmem:[#allocation2 + $0x18] sm:$0xff] }
  0x22   :  { %7644 = vst [vmem:[#allocation7_spill] sm:$0xff] %v7643_v45  ;;  %v7646_v46 = vsel %vm4966_vm13, 4294967295, %v7645_v46  ;;  %4333 = vmatprep.subr.msk.mxu0 %vm4966_vm13, %v7521_v32  ;;  %vm4979_vm11 = vmand %vm4826_vm9, %vm101_vm3  ;;  %vm93_vm13 = vcmp.eq.s32.totalorder %v4793_v4, %v4833_v24  ;;  %v5068_v63 = vmul.u32 2, %v4319_v56  ;;  %v7671_v0 = vmov 0  ;;  %v337_v52 = vld [vmem:[#allocation2 + $0x38] sm:$0xff]  ;;  %v339_v56 = vld [vmem:[#allocation2 + $0x48] sm:$0xff] }
  0x23   :  { %7647 = vst [vmem:[#allocation8_spill] sm:$0xff] %v7646_v46  ;;  %v7649_v49 = vsel %vm4979_vm11, 4294967295, %v7648_v49  ;;  %4345 = vmatprep.subr.msk.mxu1 %vm4979_vm11, %v7521_v32  ;;  %vm4990_vm4 = vmand %vm4814_vm5, %vm98_vm8  ;;  %vm90_vm8 = vcmp.eq.s32.totalorder %v4793_v4, %v4822_v19  ;;  %v7675_v9 = vmov 0  ;;  %v7680_v12 = vmov 0 }
  0x24   :  { %7650 = vst [vmem:[#allocation9_spill] sm:$0xff] %v7649_v49  ;;  %v7652_v50 = vsel %vm4990_vm4, 4294967295, %v7651_v50  ;;  %4334 = vmatpush1.msk.msra.mxu0 %vm4990_vm4, %v7521_v32  ;;  %vm5003_vm3 = vmand %vm4837_vm12, %vm100_vm1  ;;  %vm92_vm4 = vcmp.eq.s32.totalorder %v4793_v4, %v4849_v27  ;;  %v7685_v16 = vmov 0  ;;  %v4763_v17 = vmov 1  }
  0x25   :  { %7653 = vst [vmem:[#allocation10_spill] sm:$0xff] %v7652_v50  ;;  %v7655_v53 = vsel %vm5003_vm3, 4294967295, %v7654_v53  ;;  %4346 = vmatpush1.msk.msra.mxu1 %vm5003_vm3, %v7521_v32  ;;  %vm5014_vm11 = vmand %vm4818_vm6, %vm91_vm0  ;;  %vm7453_vm6 = vcmask 261120   ;;  %vm55_vm0 = vcmp.ge.s32.totalorder %v47_v34, 8  ;;  %vm63_vm3 = vcmp.lt.s32.totalorder %v47_v34, 24  ;;  %4731 = vset.pattern.permute.xlu1 %v4763_v17  ;;  %v349_v17 = vld [vmem:[#allocation2 + $0x98] sm:$0xff] }
  0x26   :  { %7656 = vst [vmem:[#allocation11_spill] sm:$0xff] %v7655_v53  ;;  %v7658_v54 = vsel %vm5014_vm11, 4294967295, %v7657_v54  ;;  %4335 = vmatprep.subr.msk.mxu0 %vm5014_vm11, %v7521_v32  ;;  %vm5027_vm1 = vmand %vm4826_vm9, %vm93_vm13  ;;  %vm119_vm9 = vcmp.eq.s32.totalorder %v4808_v11, %v4996_v51  ;;  %vm64_vm11 = vcmp.lt.s32.totalorder %v48_v48, 24  ;;  %v7687_v18 = vmov 0  ;;  %1336 = vperm.xlu1 %4731, %v4870_v31  }
  0x27   :  { %7659 = vst [vmem:[#allocation12_spill] sm:$0xff] %v7658_v54  ;;  %v7661_v57 = vsel %vm5027_vm1, 4294967295, %v7660_v57  ;;  %4347 = vmatprep.subr.msk.mxu1 %vm5027_vm1, %v7521_v32  ;;  %vm5038_vm10 = vmand %vm4814_vm5, %vm90_vm8  ;;  %vm57_vm5 = vcmp.ge.s32.totalorder %v4912_v37, 8  ;;  %vm65_vm8 = vcmp.lt.s32.totalorder %v4912_v37, 24  ;;  %v7690_v19 = vmov 0 }
  0x28   :  { %7662 = vst [vmem:[#allocation13_spill] sm:$0xff] %v7661_v57  ;;  %v7664_v59 = vsel %vm5038_vm10, 4294967295, %v7663_v59  ;;  %4336 = vmatpush1.msk.msra.mxu0 %vm5038_vm10, %v7521_v32  ;;  %vm5051_vm13 = vmand %vm4837_vm12, %vm92_vm4  ;;  %vm121_vm12 = vcmp.eq.s32.totalorder %v4808_v11, %v5020_v55  ;;  %vm62_vm10 = vcmp.lt.s32.totalorder %v46_v44, 24  ;;  %v7693_v21 = vmov 0 }
  0x29   :  { %7665 = vst [vmem:[#allocation14_spill] sm:$0xff] %v7664_v59  ;;  %v7667_v61 = vsel %vm5051_vm13, 4294967295, %v7666_v61  ;;  %4348 = vmatpush1.msk.msra.mxu1 %vm5051_vm13, %v7521_v32  ;;  %4337 = vmatmul.mubr.msk.f32.vlgmr.msra.gmra.mxu0 %vm7453_vm6, %v5031_v58  ;;  %vm5062_vm1 = vmand %vm55_vm0, %vm63_vm3  ;;  %vm54_vm13 = vcmp.ge.s32.totalorder %v46_v44, 8  ;;  %vm118_vm0 = vcmp.eq.s32.totalorder %v4808_v11, %v5044_v60  ;;  %v7695_v22 = vmov 0 }
  0x2a   :  { %7668 = vst [vmem:[#allocation15_spill] sm:$0xff] %v7667_v61  ;;  %4349 = vmatmul.mubr.msk.f32.vlgmr.msra.gmra.mxu1 %vm7453_vm6, %v5031_v58  ;;  %vm5074_vm4 = vmand %vm5062_vm1, %vm119_vm9  ;;  %447 = vmatprep.mubr.f32.mxu0 %v7531_v1  ;;  %vm56_vm6 = vcmp.ge.s32.totalorder %v48_v48, 8  ;;  %v7697_v24 = vmov 0  ;;  %v7700_v25 = vmov 0  ;;  %v7703_v27 = vmov 0  ;;  %v335_v48 = vld [vmem:[#allocation2 + $0x28] sm:$0xff] }
  0x2b   :  { %v7672_v0 = vsel %vm5074_vm4, 4294967295, %v7671_v0  ;;  %4353 = vmatprep.subr.msk.mxu0 %vm5074_vm4, %v7521_v32  ;;  %vm5084_vm3 = vmand %vm57_vm5, %vm65_vm8  ;;  %536 = vmatprep.mubr.f32.mxu1 %v7531_v1  ;;  %vm120_vm8 = vcmp.eq.s32.totalorder %v4808_v11, %v5068_v63  ;;  %vm7679_vm4 = vcmask 261120   ;;  %v7705_v34 = vmov 0 }
  0x2c   :  { %vm5093_vm9 = vmand %vm5084_vm3, %vm121_vm12  ;;  %v7708_v37 = vmov 0  ;;  %v7711_v41 = vmov 0  ;;  %v7714_v43 = vmov 0  ;;  %v7717_v44 = vmov 0 }
  0x2d   :  { %v7676_v9 = vsel %vm5093_vm9, 4294967295, %v7675_v9  ;;  %4365 = vmatprep.subr.msk.mxu1 %vm5093_vm9, %v7521_v32  ;;  %vm5100_vm5 = vmand %vm54_vm13, %vm62_vm10  ;;  %4338 = vmatmul.mubr.msk.f32.gmra.mxu0 %vm7679_vm4, %v5079_v3  ;;  %vm111_vm10 = vcmp.eq.s32.totalorder %v4812_v14, %v4996_v51 }
  0x2e   :  { %vm5110_vm12 = vmand %vm5100_vm5, %vm118_vm0  ;;  %453 = vmatprep.mubr.f32.mxu0 %v7531_v1  ;;  %vm110_vm0 = vcmp.eq.s32.totalorder %v4812_v14, %v5044_v60 }
  0x2f   :  { %v7681_v12 = vsel %vm5110_vm12, 4294967295, %v7680_v12  ;;  %vm7682_vm7 = vmmov %vm7679_vm4  ;;  %4354 = vmatpush1.msk.msra.mxu0 %vm5110_vm12, %v7521_v32  ;;  %vm113_vm4 = vcmp.eq.s32.totalorder %v4812_v14, %v5020_v55 }
  0x30   :  { %4350 = vmatmul.mubr.msk.f32.gmra.mxu1 %vm7682_vm7, %v5079_v3  ;;  %vm5124_vm13 = vmand %vm56_vm6, %vm64_vm11  ;;  %vm112_vm6 = vcmp.eq.s32.totalorder %v4812_v14, %v5068_v63 }
  0x31   :  { %542 = vmatprep.mubr.f32.mxu1 %v7531_v1  ;;  %vm5133_vm7 = vmand %vm5124_vm13, %vm120_vm8  ;;  %vm7689_vm8 = vcmask 261120  }
  0x32   :  { %v7686_v16 = vsel %vm5133_vm7, 4294967295, %v7685_v16  ;;  %4366 = vmatpush1.msk.msra.mxu1 %vm5133_vm7, %v7521_v32  ;;  %vm5144_vm11 = vmand %vm5062_vm1, %vm111_vm10  ;;  %4339 = vmatmul.mubr.msk.f32.gmra.mxu0 %vm7689_vm8, %v5119_v13  ;;  %vm103_vm7 = vcmp.eq.s32.totalorder %v4865_v30, %v4996_v51 }
  0x33   :  { %v7688_v18 = vsel %vm5144_vm11, 4294967295, %v7687_v18  ;;  %4355 = vmatprep.subr.msk.mxu0 %vm5144_vm11, %v7521_v32  ;;  %vm5157_vm12 = vmand %vm5084_vm3, %vm113_vm4  ;;  %vm105_vm4 = vcmp.eq.s32.totalorder %v4865_v30, %v5020_v55  ;;  %459 = vmatprep.mubr.f32.mxu0 %v7531_v1 }
  0x34   :  { %v7691_v19 = vsel %vm5157_vm12, 4294967295, %v7690_v19  ;;  %vm7692_vm10 = vmmov %vm7689_vm8  ;;  %4367 = vmatprep.subr.msk.mxu1 %vm5157_vm12, %v7521_v32 }
  0x35   :  { %4351 = vmatmul.mubr.msk.f32.gmra.mxu1 %vm7692_vm10, %v5119_v13  ;;  %vm5170_vm8 = vmand %vm5100_vm5, %vm110_vm0  ;;  %vm102_vm0 = vcmp.eq.s32.totalorder %v4865_v30, %v5044_v60 }
  0x36   :  { %v7694_v21 = vsel %vm5170_vm8, 4294967295, %v7693_v21  ;;  %4356 = vmatpush1.msk.msra.mxu0 %vm5170_vm8, %v7521_v32  ;;  %vm5182_vm10 = vmand %vm5124_vm13, %vm112_vm6  ;;  %548 = vmatprep.mubr.f32.mxu1 %v7531_v1  ;;  %vm104_vm6 = vcmp.eq.s32.totalorder %v4865_v30, %v5068_v63  ;;  %vm7699_vm8 = vcmask 261120  }
  0x37   :  { %v7696_v22 = vsel %vm5182_vm10, 4294967295, %v7695_v22  ;;  %4368 = vmatpush1.msk.msra.mxu1 %vm5182_vm10, %v7521_v32  ;;  %vm5194_vm12 = vmand %vm5062_vm1, %vm103_vm7  ;;  %4340 = vmatmul.mubr.msk.f32.gmra.mxu0 %vm7699_vm8, %v333_v20  ;;  %vm95_vm7 = vcmp.eq.s32.totalorder %v4793_v4, %v4996_v51  ;;  %v336_v51 = vld [vmem:[#allocation2 + $0x30] sm:$0xff] }
  0x38   :  { %v7698_v24 = vsel %vm5194_vm12, 4294967295, %v7697_v24  ;;  %4357 = vmatprep.subr.msk.mxu0 %vm5194_vm12, %v7521_v32  ;;  %vm5206_vm11 = vmand %vm5084_vm3, %vm105_vm4  ;;  %vm97_vm4 = vcmp.eq.s32.totalorder %v4793_v4, %v5020_v55  ;;  %619 = vmatprep.mubr.f32.mxu0 %v7531_v1  ;;  %v338_v55 = vld [vmem:[#allocation2 + $0x40] sm:$0xff] }
  0x39   :  { %v7701_v25 = vsel %vm5206_vm11, 4294967295, %v7700_v25  ;;  %vm7702_vm10 = vmmov %vm7699_vm8  ;;  %4369 = vmatprep.subr.msk.mxu1 %vm5206_vm11, %v7521_v32 }
  0x3a   :  { %4352 = vmatmul.mubr.msk.f32.gmra.mxu1 %vm7702_vm10, %v333_v20  ;;  %vm5218_vm8 = vmand %vm5100_vm5, %vm102_vm0  ;;  %vm94_vm0 = vcmp.eq.s32.totalorder %v4793_v4, %v5044_v60  ;;  %v341_v60 = vld [vmem:[#allocation2 + $0x58] sm:$0xff] }
  0x3b   :  { %v7704_v27 = vsel %vm5218_vm8, 4294967295, %v7703_v27  ;;  %4358 = vmatpush1.msk.msra.mxu0 %vm5218_vm8, %v7521_v32  ;;  %vm5230_vm10 = vmand %vm5124_vm13, %vm104_vm6  ;;  %708 = vmatprep.mubr.f32.mxu1 %v7531_v1  ;;  %vm96_vm6 = vcmp.eq.s32.totalorder %v4793_v4, %v5068_v63  ;;  %v343_v63 = vld [vmem:[#allocation2 + $0x68] sm:$0xff] }
  0x3c   :  { %v7706_v34 = vsel %vm5230_vm10, 4294967295, %v7705_v34  ;;  %4370 = vmatpush1.msk.msra.mxu1 %vm5230_vm10, %v7521_v32  ;;  %vm5242_vm11 = vmand %vm5062_vm1, %vm95_vm7  ;;  %vm7720_vm7 = vcmask 261120  }
  0x3d   :  { %7707 = vst [vmem:[#allocation16_spill] sm:$0xff] %v7706_v34  ;;  %v7709_v37 = vsel %vm5242_vm11, 4294967295, %v7708_v37  ;;  %4359 = vmatprep.subr.msk.mxu0 %vm5242_vm11, %v7521_v32  ;;  %vm5254_vm8 = vmand %vm5084_vm3, %vm97_vm4 }
  0x3e   :  { %7710 = vst [vmem:[#allocation17_spill] sm:$0xff] %v7709_v37  ;;  %v7712_v41 = vsel %vm5254_vm8, 4294967295, %v7711_v41  ;;  %4371 = vmatprep.subr.msk.mxu1 %vm5254_vm8, %v7521_v32  ;;  %vm5263_vm1 = vmand %vm5100_vm5, %vm94_vm0 }
  0x3f   :  { %7713 = vst [vmem:[#allocation18_spill] sm:$0xff] %v7712_v41  ;;  %v7715_v43 = vsel %vm5263_vm1, 4294967295, %v7714_v43  ;;  %4360 = vmatpush1.msk.msra.mxu0 %vm5263_vm1, %v7521_v32  ;;  %vm5272_vm3 = vmand %vm5124_vm13, %vm96_vm6  ;;  %vm7722_vm13 = vnez %v7633_v35  ;;  %vm7725_vm6 = vnez %v7635_v36 }
  0x40   :  { %7716 = vst [vmem:[#allocation19_spill] sm:$0xff] %v7715_v43  ;;  %v7718_v44 = vsel %vm5272_vm3, 4294967295, %v7717_v44  ;;  %4372 = vmatpush1.msk.msra.mxu1 %vm5272_vm3, %v7521_v32  ;;  %4361 = vmatmul.mubr.msk.f32.vlgmr.msra.gmra.mxu0 %vm7720_vm7, %v5031_v58  ;;  %vm7721_vm5 = vmmov %vm7720_vm7  ;;  %vm7726_vm7 = vnez %v7637_v40 }
  0x41   :  { %7719 = vst [vmem:[#allocation20_spill] sm:$0xff] %v7718_v44  ;;  %4373 = vmatmul.mubr.msk.f32.vlgmr.msra.gmra.mxu1 %vm7721_vm5, %v5031_v58  ;;  %4377 = vmatprep.subr.msk.mxu0 %vm4856_vm15, %v7521_v32  ;;  %vm7723_vm4 = vmmov %vm7721_vm5  ;;  %vm7727_vm5 = vnez %v7640_v42  ;;  %v340_v58 = vld [vmem:[#allocation2 + $0x50] sm:$0xff] }
  0x42   :  { %4389 = vmatprep.subr.msk.mxu1 %vm4877_vm2, %v7521_v32  ;;  %4378 = vmatpush1.msk.msra.mxu0 %vm4845_vm14, %v7521_v32  ;;  %vm7724_vm0 = vmmov %vm7723_vm4 }
  0x43   :  { %4390 = vmatpush1.msk.msra.mxu1 %vm7722_vm13, %v7521_v32  ;;  %625 = vmatprep.mubr.f32.mxu0 %v7531_v1  ;;  %vm7728_vm13 = vnez %v7643_v45 }
  0x44   :  { %714 = vmatprep.mubr.f32.mxu1 %v7531_v1  ;;  %4362 = vmatmul.mubr.msk.f32.gmra.mxu0 %vm7723_vm4, %v5079_v3  ;;  %vm7729_vm4 = vmmov %vm7724_vm0 }
  0x45   :  { %4374 = vmatmul.mubr.msk.f32.gmra.mxu1 %vm7724_vm0, %v5079_v3  ;;  %4379 = vmatprep.subr.msk.mxu0 %vm7725_vm6, %v7521_v32  ;;  %vm7733_vm6 = vnez %v7655_v53  ;;  %v344_v3 = vld [vmem:[#allocation2 + $0x70] sm:$0xff] }
  0x46   :  { %4391 = vmatprep.subr.msk.mxu1 %vm7726_vm7, %v7521_v32  ;;  %4380 = vmatpush1.msk.msra.mxu0 %vm7727_vm5, %v7521_v32  ;;  %vm7730_vm7 = vnez %v7646_v46  ;;  %vm7731_vm5 = vnez %v7649_v49 }
  0x47   :  { %4392 = vmatpush1.msk.msra.mxu1 %vm7728_vm13, %v7521_v32  ;;  %631 = vmatprep.mubr.f32.mxu0 %v7531_v1  ;;  %vm7732_vm13 = vnez %v7652_v50 }
  0x48   :  { %720 = vmatprep.mubr.f32.mxu1 %v7531_v1  ;;  %4363 = vmatmul.mubr.msk.f32.gmra.mxu0 %vm7729_vm4, %v5119_v13  ;;  %vm7734_vm4 = vmmov %vm7724_vm0 }
  0x49   :  { %4375 = vmatmul.mubr.msk.f32.gmra.mxu1 %vm7724_vm0, %v5119_v13  ;;  %4381 = vmatprep.subr.msk.mxu0 %vm7730_vm7, %v7521_v32  ;;  %vm7735_vm7 = vnez %v7658_v54  ;;  %v347_v13 = vld [vmem:[#allocation2 + $0x88] sm:$0xff] }
  0x4a   :  { %4393 = vmatprep.subr.msk.mxu1 %vm7731_vm5, %v7521_v32  ;;  %4382 = vmatpush1.msk.msra.mxu0 %vm7732_vm13, %v7521_v32  ;;  %vm7736_vm13 = vnez %v7661_v57  ;;  %vm7738_vm5 = vnez %v7667_v61 }
  0x4b   :  { %4394 = vmatpush1.msk.msra.mxu1 %vm7733_vm6, %v7521_v32  ;;  %637 = vmatprep.mubr.f32.mxu0 %v7531_v1  ;;  %vm7737_vm6 = vnez %v7664_v59 }
  0x4c   :  { %726 = vmatprep.mubr.f32.mxu1 %v7531_v1  ;;  %4364 = vmatmul.mubr.msk.f32.gmra.mxu0 %vm7734_vm4, %v333_v20  ;;  %vm7739_vm4 = vmmov %vm7724_vm0 }
  0x4d   :  { %4376 = vmatmul.mubr.msk.f32.gmra.mxu1 %vm7724_vm0, %v333_v20  ;;  %4383 = vmatprep.subr.msk.mxu0 %vm7735_vm7, %v7521_v32  ;;  %vm7740_vm7 = vnez %v7672_v0  ;;  %v5856_v20 = vld [vmem:[#allocation2 + $0xa0] sm:$0xff] }
  0x4e   :  { %4395 = vmatprep.subr.msk.mxu1 %vm7736_vm13, %v7521_v32  ;;  %4384 = vmatpush1.msk.msra.mxu0 %vm7737_vm6, %v7521_v32  ;;  %vm7742_vm6 = vnez %v7686_v16 }
  0x4f   :  { %4396 = vmatpush1.msk.msra.mxu1 %vm7738_vm5, %v7521_v32  ;;  %939 = vmatprep.mubr.f32.mxu0 %v7531_v1  ;;  %vm7741_vm5 = vnez %v7681_v12 }
  0x50   :  { %1028 = vmatprep.mubr.f32.mxu1 %v7531_v1  ;;  %4385 = vmatmul.mubr.msk.f32.vlgmr.msra.gmra.mxu0 %vm7739_vm4, %v334_v47  ;;  %vm7743_vm4 = vmmov %vm7724_vm0 }
  0x51   :  { %4397 = vmatmul.mubr.msk.f32.vlgmr.msra.gmra.mxu1 %vm7724_vm0, %v334_v47  ;;  %4401 = vmatprep.subr.msk.mxu0 %vm7740_vm7, %v7521_v32  ;;  %vm7744_vm7 = vnez %v7688_v18 }
  0x52   :  { %4413 = vmatprep.subr.msk.mxu1 %vm5093_vm9, %v7521_v32  ;;  %4402 = vmatpush1.msk.msra.mxu0 %vm7741_vm5, %v7521_v32  ;;  %vm7745_vm5 = vnez %v7691_v19  ;;  %vm7747_vm9 = vnez %v7696_v22 }
  0x53   :  { %4414 = vmatpush1.msk.msra.mxu1 %vm7742_vm6, %v7521_v32  ;;  %945 = vmatprep.mubr.f32.mxu0 %v7531_v1  ;;  %vm7746_vm6 = vnez %v7694_v21 }
  0x54   :  { %1034 = vmatprep.mubr.f32.mxu1 %v7531_v1  ;;  %4386 = vmatmul.mubr.msk.f32.gmra.mxu0 %vm7743_vm4, %v335_v48  ;;  %vm7748_vm4 = vmmov %vm7724_vm0 }
  0x55   :  { %4398 = vmatmul.mubr.msk.f32.gmra.mxu1 %vm7724_vm0, %v335_v48  ;;  %4403 = vmatprep.subr.msk.mxu0 %vm7744_vm7, %v7521_v32 }
  0x56   :  { %4415 = vmatprep.subr.msk.mxu1 %vm7745_vm5, %v7521_v32  ;;  %4404 = vmatpush1.msk.msra.mxu0 %vm7746_vm6, %v7521_v32  ;;  %vm7749_vm6 = vnez %v7701_v25 }
  0x57   :  { %4416 = vmatpush1.msk.msra.mxu1 %vm7747_vm9, %v7521_v32  ;;  %951 = vmatprep.mubr.f32.mxu0 %v7531_v1  ;;  %vm7750_vm9 = vnez %v7704_v27 }
  0x58   :  { %1040 = vmatprep.mubr.f32.mxu1 %v7531_v1  ;;  %4387 = vmatmul.mubr.msk.f32.gmra.mxu0 %vm7748_vm4, %v336_v51  ;;  %vm7751_vm4 = vmmov %vm7724_vm0 }
  0x59   :  { %4399 = vmatmul.mubr.msk.f32.gmra.mxu1 %vm7724_vm0, %v336_v51  ;;  %4405 = vmatprep.subr.msk.mxu0 %vm5194_vm12, %v7521_v32 }
  0x5a   :  { %4417 = vmatprep.subr.msk.mxu1 %vm7749_vm6, %v7521_v32  ;;  %4406 = vmatpush1.msk.msra.mxu0 %vm7750_vm9, %v7521_v32 }
  0x5b   :  { %4418 = vmatpush1.msk.msra.mxu1 %vm5230_vm10, %v7521_v32  ;;  %957 = vmatprep.mubr.f32.mxu0 %v7531_v1 }
  0x5c   :  { %1046 = vmatprep.mubr.f32.mxu1 %v7531_v1  ;;  %4388 = vmatmul.mubr.msk.f32.gmra.mxu0 %vm7751_vm4, %v337_v52  ;;  %vm7752_vm4 = vmmov %vm7724_vm0 }
  0x5d   :  { %4400 = vmatmul.mubr.msk.f32.gmra.mxu1 %vm7724_vm0, %v337_v52  ;;  %4407 = vmatprep.subr.msk.mxu0 %vm5242_vm11, %v7521_v32 }
  0x5e   :  { %4419 = vmatprep.subr.msk.mxu1 %vm5254_vm8, %v7521_v32  ;;  %4408 = vmatpush1.msk.msra.mxu0 %vm5263_vm1, %v7521_v32 }
  0x5f   :  { %4420 = vmatpush1.msk.msra.mxu1 %vm5272_vm3, %v7521_v32  ;;  %1117 = vmatprep.mubr.f32.mxu0 %v7531_v1  ;;  %vm7753_vm3 = vnez %v7633_v35 }
  0x60   :  { %1206 = vmatprep.mubr.f32.mxu1 %v7531_v1  ;;  %4409 = vmatmul.mubr.msk.f32.vlgmr.msra.gmra.mxu0 %vm7752_vm4, %v334_v47  ;;  %vm7754_vm4 = vmmov %vm7724_vm0 }
  0x61   :  { %4421 = vmatmul.mubr.msk.f32.vlgmr.msra.gmra.mxu1 %vm7724_vm0, %v334_v47  ;;  %4425 = vmatprep.subr.msk.mxu0 %vm4856_vm15, %v7521_v32  ;;  %vm7755_vm15 = vnez %v7635_v36  ;;  %v4764_v47 = vmov 2  }
  0x62   :  { %4437 = vmatprep.subr.msk.mxu1 %vm4877_vm2, %v7521_v32  ;;  %4426 = vmatpush1.msk.msra.mxu0 %vm4845_vm14, %v7521_v32  ;;  %vm7756_vm2 = vnez %v7637_v40  ;;  %vm7757_vm14 = vnez %v7640_v42 }
  0x63   :  { %4438 = vmatpush1.msk.msra.mxu1 %vm7753_vm3, %v7521_v32  ;;  %1123 = vmatprep.mubr.f32.mxu0 %v7531_v1  ;;  %vm7758_vm3 = vnez %v7643_v45 }
  0x64   :  { %1212 = vmatprep.mubr.f32.mxu1 %v7531_v1  ;;  %4410 = vmatmul.mubr.msk.f32.gmra.mxu0 %vm7754_vm4, %v335_v48  ;;  %vm7759_vm4 = vmmov %vm7724_vm0 }
  0x65   :  { %4422 = vmatmul.mubr.msk.f32.gmra.mxu1 %vm7724_vm0, %v335_v48  ;;  %4427 = vmatprep.subr.msk.mxu0 %vm7755_vm15, %v7521_v32  ;;  %vm7760_vm15 = vnez %v7646_v46  ;;  %v186_v48 = vshra.s32 %v4791_v2, 5  ;;  %v188_v2 = vshra.s32 %v4803_v8, 5  ;;  %v5895_v8 = vld [vmem:[#allocation2 + $0xb0] sm:$0xff] }
  0x66   :  { %4439 = vmatprep.subr.msk.mxu1 %vm7756_vm2, %v7521_v32  ;;  %4428 = vmatpush1.msk.msra.mxu0 %vm7757_vm14, %v7521_v32  ;;  %vm7761_vm2 = vnez %v7649_v49  ;;  %vm7762_vm14 = vnez %v7652_v50 }
  0x67   :  { %4440 = vmatpush1.msk.msra.mxu1 %vm7758_vm3, %v7521_v32  ;;  %1129 = vmatprep.mubr.f32.mxu0 %v7531_v1  ;;  %vm7763_vm3 = vnez %v7655_v53 }
  0x68   :  { %1218 = vmatprep.mubr.f32.mxu1 %v7531_v1  ;;  %4411 = vmatmul.mubr.msk.f32.gmra.mxu0 %vm7759_vm4, %v336_v51  ;;  %vm7764_vm4 = vmmov %vm7724_vm0 }
  0x69   :  { %4423 = vmatmul.mubr.msk.f32.gmra.mxu1 %vm7724_vm0, %v336_v51  ;;  %4429 = vmatprep.subr.msk.mxu0 %vm7760_vm15, %v7521_v32  ;;  %vm7765_vm15 = vnez %v7658_v54  ;;  %v5874_v51 = vld [vmem:[#allocation2 + $0xa8] sm:$0xff] }
  0x6a   :  { %4441 = vmatprep.subr.msk.mxu1 %vm7761_vm2, %v7521_v32  ;;  %4430 = vmatpush1.msk.msra.mxu0 %vm7762_vm14, %v7521_v32  ;;  %vm7767_vm14 = vnez %v7667_v61 }
  0x6b   :  { %4442 = vmatpush1.msk.msra.mxu1 %vm7763_vm3, %v7521_v32  ;;  %1135 = vmatprep.mubr.f32.mxu0 %v7531_v1  ;;  %vm7766_vm3 = vnez %v7664_v59 }
  0x6c   :  { %1224 = vmatprep.mubr.f32.mxu1 %v7531_v1  ;;  %4412 = vmatmul.mubr.msk.f32.gmra.mxu0 %vm7764_vm4, %v337_v52  ;;  %vm7768_vm4 = vmmov %vm7724_vm0 }
  0x6d   :  { %4424 = vmatmul.mubr.msk.f32.gmra.mxu1 %vm7724_vm0, %v337_v52  ;;  %4431 = vmatprep.subr.msk.mxu0 %vm7765_vm15, %v7521_v32  ;;  %vm7769_vm15 = vnez %v7672_v0  ;;  %v4321_v52 = vadd.s32 4294967288, %v186_v48 }
  0x6e   :  { %4443 = vmatprep.subr.msk.mxu1 %vm7736_vm13, %v7521_v32  ;;  %4432 = vmatpush1.msk.msra.mxu0 %vm7766_vm3, %v7521_v32  ;;  %vm7770_vm3 = vnez %v7676_v9  ;;  %vm7772_vm13 = vnez %v7686_v16 }
  0x6f   :  { %4444 = vmatpush1.msk.msra.mxu1 %vm7767_vm14, %v7521_v32  ;;  %1431 = vmatprep.mubr.f32.mxu0 %v7531_v1  ;;  %vm7771_vm14 = vnez %v7681_v12 }
  0x70   :  { %1520 = vmatprep.mubr.f32.mxu1 %v7531_v1  ;;  %4433 = vmatmul.mubr.msk.f32.vlgmr.msra.gmra.mxu0 %vm7768_vm4, %v338_v55  ;;  %vm7773_vm4 = vmmov %vm7724_vm0 }
  0x71   :  { %4445 = vmatmul.mubr.msk.f32.vlgmr.msra.gmra.mxu1 %vm7724_vm0, %v338_v55  ;;  %4449 = vmatprep.subr.msk.mxu0 %vm7769_vm15, %v7521_v32 }
  0x72   :  { %4461 = vmatprep.subr.msk.mxu1 %vm7770_vm3, %v7521_v32  ;;  %4450 = vmatpush1.msk.msra.mxu0 %vm7771_vm14, %v7521_v32  ;;  %vm7775_vm14 = vnez %v7696_v22 }
  0x73   :  { %4462 = vmatpush1.msk.msra.mxu1 %vm7772_vm13, %v7521_v32  ;;  %1437 = vmatprep.mubr.f32.mxu0 %v7531_v1  ;;  %vm7774_vm13 = vnez %v7694_v21 }
  0x74   :  { %1526 = vmatprep.mubr.f32.mxu1 %v7531_v1  ;;  %4434 = vmatmul.mubr.msk.f32.gmra.mxu0 %vm7773_vm4, %v339_v56  ;;  %vm7776_vm4 = vmmov %vm7724_vm0 }
  0x75   :  { %4446 = vmatmul.mubr.msk.f32.gmra.mxu1 %vm7724_vm0, %v339_v56  ;;  %4451 = vmatprep.subr.msk.mxu0 %vm7744_vm7, %v7521_v32 }
  0x76   :  { %4463 = vmatprep.subr.msk.mxu1 %vm7745_vm5, %v7521_v32  ;;  %4452 = vmatpush1.msk.msra.mxu0 %vm7774_vm13, %v7521_v32 }
  0x77   :  { %4464 = vmatpush1.msk.msra.mxu1 %vm7775_vm14, %v7521_v32  ;;  %1443 = vmatprep.mubr.f32.mxu0 %v7531_v1 }
  0x78   :  { %1532 = vmatprep.mubr.f32.mxu1 %v7531_v1  ;;  %4435 = vmatmul.mubr.msk.f32.gmra.mxu0 %vm7776_vm4, %v340_v58  ;;  %vm7777_vm4 = vmmov %vm7724_vm0 }
  0x79   :  { %4447 = vmatmul.mubr.msk.f32.gmra.mxu1 %vm7724_vm0, %v340_v58  ;;  %4453 = vmatprep.subr.msk.mxu0 %vm5194_vm12, %v7521_v32 }
  0x7a   :  { %4465 = vmatprep.subr.msk.mxu1 %vm7749_vm6, %v7521_v32  ;;  %4454 = vmatpush1.msk.msra.mxu0 %vm7750_vm9, %v7521_v32 }
  0x7b   :  { %4466 = vmatpush1.msk.msra.mxu1 %vm5230_vm10, %v7521_v32  ;;  %1449 = vmatprep.mubr.f32.mxu0 %v7531_v1  ;;  %vm7778_vm10 = vnez %v7718_v44 }
  0x7c   :  { %1538 = vmatprep.mubr.f32.mxu1 %v7531_v1  ;;  %4436 = vmatmul.mubr.msk.f32.gmra.mxu0 %vm7777_vm4, %v341_v60  ;;  %vm7779_vm4 = vmmov %vm7724_vm0 }
  0x7d   :  { %4448 = vmatmul.mubr.msk.f32.gmra.mxu1 %vm7724_vm0, %v341_v60  ;;  %4455 = vmatprep.subr.msk.mxu0 %vm5242_vm11, %v7521_v32  ;;  %vm7780_vm11 = vnez %v7629_v29 }
  0x7e   :  { %4467 = vmatprep.subr.msk.mxu1 %vm5254_vm8, %v7521_v32  ;;  %4456 = vmatpush1.msk.msra.mxu0 %vm5263_vm1, %v7521_v32  ;;  %vm7781_vm8 = vnez %v7631_v33  ;;  %vm7782_vm1 = vnez %v7627_v26 }
  0x7f   :  { %4468 = vmatpush1.msk.msra.mxu1 %vm7778_vm10, %v7521_v32  ;;  %1609 = vmatprep.mubr.f32.mxu0 %v7531_v1  ;;  %vm7783_vm10 = vnez %v7633_v35 }
  0x80   :  { %1698 = vmatprep.mubr.f32.mxu1 %v7531_v1  ;;  %4457 = vmatmul.mubr.msk.f32.vlgmr.msra.gmra.mxu0 %vm7779_vm4, %v338_v55  ;;  %vm7784_vm4 = vmmov %vm7724_vm0 }
  0x81   :  { %4469 = vmatmul.mubr.msk.f32.vlgmr.msra.gmra.mxu1 %vm7724_vm0, %v338_v55  ;;  %4473 = vmatprep.subr.msk.mxu0 %vm7780_vm11, %v7521_v32  ;;  %vm7785_vm11 = vnez %v7635_v36  ;;  %v187_v55 = vshra.s32 %v4796_v5, 5  ;;  %v4323_v5 = vadd.s32 4294967288, %v188_v2 }
  0x82   :  { %4485 = vmatprep.subr.msk.mxu1 %vm7781_vm8, %v7521_v32  ;;  %4474 = vmatpush1.msk.msra.mxu0 %vm7782_vm1, %v7521_v32  ;;  %vm7786_vm8 = vnez %v7637_v40  ;;  %vm7787_vm1 = vnez %v7640_v42 }
  0x83   :  { %4486 = vmatpush1.msk.msra.mxu1 %vm7783_vm10, %v7521_v32  ;;  %1615 = vmatprep.mubr.f32.mxu0 %v7531_v1  ;;  %vm7788_vm10 = vnez %v7643_v45 }
  0x84   :  { %1704 = vmatprep.mubr.f32.mxu1 %v7531_v1  ;;  %4458 = vmatmul.mubr.msk.f32.gmra.mxu0 %vm7784_vm4, %v339_v56  ;;  %vm7789_vm4 = vmmov %vm7724_vm0 }
  0x85   :  { %4470 = vmatmul.mubr.msk.f32.gmra.mxu1 %vm7724_vm0, %v339_v56  ;;  %4475 = vmatprep.subr.msk.mxu0 %vm7785_vm11, %v7521_v32  ;;  %vm7790_vm11 = vnez %v7646_v46  ;;  %v4322_v56 = vadd.s32 4294967288, %v187_v55 }
  0x86   :  { %4487 = vmatprep.subr.msk.mxu1 %vm7786_vm8, %v7521_v32  ;;  %4476 = vmatpush1.msk.msra.mxu0 %vm7787_vm1, %v7521_v32  ;;  %vm7791_vm1 = vnez %v7652_v50 }
  0x87   :  { %4488 = vmatpush1.msk.msra.mxu1 %vm7788_vm10, %v7521_v32  ;;  %1621 = vmatprep.mubr.f32.mxu0 %v7531_v1  ;;  %vm7792_vm10 = vnez %v7655_v53 }
  0x88   :  { %1710 = vmatprep.mubr.f32.mxu1 %v7531_v1  ;;  %4459 = vmatmul.mubr.msk.f32.gmra.mxu0 %vm7789_vm4, %v340_v58  ;;  %vm7793_vm4 = vmmov %vm7724_vm0 }
  0x89   :  { %4471 = vmatmul.mubr.msk.f32.gmra.mxu1 %vm7724_vm0, %v340_v58  ;;  %4477 = vmatprep.subr.msk.mxu0 %vm7790_vm11, %v7521_v32  ;;  %vm7794_vm11 = vnez %v7658_v54 }
  0x8a   :  { %4489 = vmatprep.subr.msk.mxu1 %vm7761_vm2, %v7521_v32  ;;  %4478 = vmatpush1.msk.msra.mxu0 %vm7791_vm1, %v7521_v32  ;;  %vm7795_vm1 = vnez %v7661_v57  ;;  %vm7797_vm2 = vnez %v7667_v61 }
  0x8b   :  { %4490 = vmatpush1.msk.msra.mxu1 %vm7792_vm10, %v7521_v32  ;;  %1627 = vmatprep.mubr.f32.mxu0 %v7531_v1  ;;  %vm7796_vm10 = vnez %v7664_v59 }
  0x8c   :  { %1716 = vmatprep.mubr.f32.mxu1 %v7531_v1  ;;  %4460 = vmatmul.mubr.msk.f32.gmra.mxu0 %vm7793_vm4, %v341_v60  ;;  %vm7798_vm4 = vmmov %vm7724_vm0 }
  0x8d   :  { %4472 = vmatmul.mubr.msk.f32.gmra.mxu1 %vm7724_vm0, %v341_v60  ;;  %4479 = vmatprep.subr.msk.mxu0 %vm7794_vm11, %v7521_v32  ;;  %v5917_v60 = vld [vmem:[#allocation2 + $0xb8] sm:$0xff] }
  0x8e   :  { %4491 = vmatprep.subr.msk.mxu1 %vm7795_vm1, %v7521_v32  ;;  %4480 = vmatpush1.msk.msra.mxu0 %vm7796_vm10, %v7521_v32  ;;  %vm7800_vm10 = vnez %v7686_v16 }
  0x8f   :  { %4492 = vmatpush1.msk.msra.mxu1 %vm7797_vm2, %v7521_v32  ;;  %1923 = vmatprep.mubr.f32.mxu0 %v7531_v1  ;;  %vm7799_vm2 = vnez %v7681_v12 }
  0x90   :  { %2012 = vmatprep.mubr.f32.mxu1 %v7531_v1  ;;  %4481 = vmatmul.mubr.msk.f32.vlgmr.msra.gmra.mxu0 %vm7798_vm4, %v342_v62  ;;  %vm7801_vm4 = vmmov %vm7724_vm0 }
  0x91   :  { %4493 = vmatmul.mubr.msk.f32.vlgmr.msra.gmra.mxu1 %vm7724_vm0, %v342_v62  ;;  %4497 = vmatprep.subr.msk.mxu0 %vm7769_vm15, %v7521_v32 }
  0x92   :  { %4509 = vmatprep.subr.msk.mxu1 %vm7770_vm3, %v7521_v32  ;;  %4498 = vmatpush1.msk.msra.mxu0 %vm7799_vm2, %v7521_v32 }
  0x93   :  { %4510 = vmatpush1.msk.msra.mxu1 %vm7800_vm10, %v7521_v32  ;;  %1929 = vmatprep.mubr.f32.mxu0 %v7531_v1 }
  0x94   :  { %2018 = vmatprep.mubr.f32.mxu1 %v7531_v1  ;;  %4482 = vmatmul.mubr.msk.f32.gmra.mxu0 %vm7801_vm4, %v343_v63  ;;  %vm7802_vm4 = vmmov %vm7724_vm0 }
  0x95   :  { %4494 = vmatmul.mubr.msk.f32.gmra.mxu1 %vm7724_vm0, %v343_v63  ;;  %4499 = vmatprep.subr.msk.mxu0 %vm7744_vm7, %v7521_v32 }
  0x96   :  { %4511 = vmatprep.subr.msk.mxu1 %vm7745_vm5, %v7521_v32  ;;  %4500 = vmatpush1.msk.msra.mxu0 %vm7774_vm13, %v7521_v32 }
  0x97   :  { %4512 = vmatpush1.msk.msra.mxu1 %vm7775_vm14, %v7521_v32  ;;  %1935 = vmatprep.mubr.f32.mxu0 %v7531_v1  ;;  %vm7803_vm14 = vnez %v7706_v34 }
  0x98   :  { %2024 = vmatprep.mubr.f32.mxu1 %v7531_v1  ;;  %4483 = vmatmul.mubr.msk.f32.gmra.mxu0 %vm7802_vm4, %v344_v3  ;;  %vm7804_vm4 = vmmov %vm7724_vm0 }
  0x99   :  { %4495 = vmatmul.mubr.msk.f32.gmra.mxu1 %vm7724_vm0, %v344_v3  ;;  %4501 = vmatprep.subr.msk.mxu0 %vm5194_vm12, %v7521_v32  ;;  %vm7805_vm12 = vnez %v7709_v37 }
  0x9a   :  { %4513 = vmatprep.subr.msk.mxu1 %vm7749_vm6, %v7521_v32  ;;  %4502 = vmatpush1.msk.msra.mxu0 %vm7750_vm9, %v7521_v32  ;;  %vm7806_vm6 = vnez %v7712_v41  ;;  %vm7807_vm9 = vnez %v7715_v43 }
  0x9b   :  { %4514 = vmatpush1.msk.msra.mxu1 %vm7803_vm14, %v7521_v32  ;;  %1941 = vmatprep.mubr.f32.mxu0 %v7531_v1  ;;  %vm7808_vm14 = vnez %v7718_v44 }
  0x9c   :  { %2030 = vmatprep.mubr.f32.mxu1 %v7531_v1  ;;  %4484 = vmatmul.mubr.msk.f32.gmra.mxu0 %vm7804_vm4, %v345_v7  ;;  %vm7809_vm4 = vmmov %vm7724_vm0 }
  0x9d   :  { %4496 = vmatmul.mubr.msk.f32.gmra.mxu1 %vm7724_vm0, %v345_v7  ;;  %4503 = vmatprep.subr.msk.mxu0 %vm7805_vm12, %v7521_v32  ;;  %vm7810_vm12 = vnez %v7629_v29 }
  0x9e   :  { %4515 = vmatprep.subr.msk.mxu1 %vm7806_vm6, %v7521_v32  ;;  %4504 = vmatpush1.msk.msra.mxu0 %vm7807_vm9, %v7521_v32  ;;  %vm7811_vm6 = vnez %v7631_v33  ;;  %vm7812_vm9 = vnez %v7627_v26 }
  0x9f   :  { %4516 = vmatpush1.msk.msra.mxu1 %vm7808_vm14, %v7521_v32  ;;  %2101 = vmatprep.mubr.f32.mxu0 %v7531_v1  ;;  %vm7813_vm14 = vnez %v7633_v35 }
  0xa0   :  { %2190 = vmatprep.mubr.f32.mxu1 %v7531_v1  ;;  %4505 = vmatmul.mubr.msk.f32.vlgmr.msra.gmra.mxu0 %vm7809_vm4, %v342_v62  ;;  %vm7814_vm4 = vmmov %vm7724_vm0 }
  0xa1   :  { %4517 = vmatmul.mubr.msk.f32.vlgmr.msra.gmra.mxu1 %vm7724_vm0, %v342_v62  ;;  %4521 = vmatprep.subr.msk.mxu0 %vm7810_vm12, %v7521_v32  ;;  %vm7815_vm12 = vnez %v7635_v36  ;;  %v5925_v62 = vmul.u32 2, %v4323_v5 }
  0xa2   :  { %4533 = vmatprep.subr.msk.mxu1 %vm7811_vm6, %v7521_v32  ;;  %4522 = vmatpush1.msk.msra.mxu0 %vm7812_vm9, %v7521_v32  ;;  %vm7816_vm9 = vnez %v7640_v42 }
  0xa3   :  { %4534 = vmatpush1.msk.msra.mxu1 %vm7813_vm14, %v7521_v32  ;;  %2107 = vmatprep.mubr.f32.mxu0 %v7531_v1  ;;  %vm7817_vm14 = vnez %v7643_v45 }
  0xa4   :  { %2196 = vmatprep.mubr.f32.mxu1 %v7531_v1  ;;  %4506 = vmatmul.mubr.msk.f32.gmra.mxu0 %vm7814_vm4, %v343_v63  ;;  %vm7818_vm4 = vmmov %vm7724_vm0 }
  0xa5   :  { %4518 = vmatmul.mubr.msk.f32.gmra.mxu1 %vm7724_vm0, %v343_v63  ;;  %4523 = vmatprep.subr.msk.mxu0 %vm7815_vm12, %v7521_v32  ;;  %vm7819_vm12 = vnez %v7646_v46 }
  0xa6   :  { %4535 = vmatprep.subr.msk.mxu1 %vm7786_vm8, %v7521_v32  ;;  %4524 = vmatpush1.msk.msra.mxu0 %vm7816_vm9, %v7521_v32  ;;  %vm7820_vm8 = vnez %v7649_v49  ;;  %vm7821_vm9 = vnez %v7652_v50 }
  0xa7   :  { %4536 = vmatpush1.msk.msra.mxu1 %vm7817_vm14, %v7521_v32  ;;  %2113 = vmatprep.mubr.f32.mxu0 %v7531_v1  ;;  %vm7822_vm14 = vnez %v7655_v53 }
  0xa8   :  { %2202 = vmatprep.mubr.f32.mxu1 %v7531_v1  ;;  %4507 = vmatmul.mubr.msk.f32.gmra.mxu0 %vm7818_vm4, %v344_v3  ;;  %vm7823_vm4 = vmmov %vm7724_vm0 }
  0xa9   :  { %4519 = vmatmul.mubr.msk.f32.gmra.mxu1 %vm7724_vm0, %v344_v3  ;;  %4525 = vmatprep.subr.msk.mxu0 %vm7819_vm12, %v7521_v32  ;;  %v5937_v3 = vmul.u32 2, %v4322_v56 }
  0xaa   :  { %4537 = vmatprep.subr.msk.mxu1 %vm7820_vm8, %v7521_v32  ;;  %4526 = vmatpush1.msk.msra.mxu0 %vm7821_vm9, %v7521_v32  ;;  %vm7825_vm9 = vnez %v7667_v61 }
  0xab   :  { %4538 = vmatpush1.msk.msra.mxu1 %vm7822_vm14, %v7521_v32  ;;  %2119 = vmatprep.mubr.f32.mxu0 %v7531_v1  ;;  %vm7824_vm14 = vnez %v7664_v59 }
  0xac   :  { %2208 = vmatprep.mubr.f32.mxu1 %v7531_v1  ;;  %4508 = vmatmul.mubr.msk.f32.gmra.mxu0 %vm7823_vm4, %v345_v7  ;;  %vm7826_vm4 = vmmov %vm7724_vm0 }
  0xad   :  { %4520 = vmatmul.mubr.msk.f32.gmra.mxu1 %vm7724_vm0, %v345_v7  ;;  %4527 = vmatprep.subr.msk.mxu0 %vm7794_vm11, %v7521_v32 }
  0xae   :  { %4539 = vmatprep.subr.msk.mxu1 %vm7795_vm1, %v7521_v32  ;;  %4528 = vmatpush1.msk.msra.mxu0 %vm7824_vm14, %v7521_v32 }
  0xaf   :  { %4540 = vmatpush1.msk.msra.mxu1 %vm7825_vm9, %v7521_v32  ;;  %2423 = vmatprep.mubr.f32.mxu0 %v7531_v1 }
  0xb0   :  { %2512 = vmatprep.mubr.f32.mxu1 %v7531_v1  ;;  %4529 = vmatmul.mubr.msk.f32.vlgmr.msra.gmra.mxu0 %vm7826_vm4, %v346_v10  ;;  %vm7827_vm4 = vmmov %vm7724_vm0 }
  0xb1   :  { %4541 = vmatmul.mubr.msk.f32.vlgmr.msra.gmra.mxu1 %vm7724_vm0, %v346_v10  ;;  %4545 = vmatprep.subr.msk.mxu0 %vm7769_vm15, %v7521_v32 }
  0xb2   :  { %4557 = vmatprep.subr.msk.mxu1 %vm7770_vm3, %v7521_v32  ;;  %4546 = vmatpush1.msk.msra.mxu0 %vm7799_vm2, %v7521_v32 }
  0xb3   :  { %4558 = vmatpush1.msk.msra.mxu1 %vm7800_vm10, %v7521_v32  ;;  %2429 = vmatprep.mubr.f32.mxu0 %v7531_v1  ;;  %vm7828_vm10 = vnez %v7696_v22 }
  0xb4   :  { %2518 = vmatprep.mubr.f32.mxu1 %v7531_v1  ;;  %4530 = vmatmul.mubr.msk.f32.gmra.mxu0 %vm7827_vm4, %v347_v13  ;;  %vm7829_vm4 = vmmov %vm7724_vm0 }
  0xb5   :  { %4542 = vmatmul.mubr.msk.f32.gmra.mxu1 %vm7724_vm0, %v347_v13  ;;  %4547 = vmatprep.subr.msk.mxu0 %vm7744_vm7, %v7521_v32  ;;  %vm7830_vm7 = vnez %v7698_v24 }
  0xb6   :  { %4559 = vmatprep.subr.msk.mxu1 %vm7745_vm5, %v7521_v32  ;;  %4548 = vmatpush1.msk.msra.mxu0 %vm7774_vm13, %v7521_v32  ;;  %vm7831_vm13 = vnez %v7701_v25  ;;  %vm7833_vm5 = vnez %v7706_v34 }
  0xb7   :  { %4560 = vmatpush1.msk.msra.mxu1 %vm7828_vm10, %v7521_v32  ;;  %2435 = vmatprep.mubr.f32.mxu0 %v7531_v1  ;;  %vm7832_vm10 = vnez %v7704_v27 }
  0xb8   :  { %2524 = vmatprep.mubr.f32.mxu1 %v7531_v1  ;;  %4531 = vmatmul.mubr.msk.f32.gmra.mxu0 %vm7829_vm4, %v348_v15  ;;  %vm7834_vm4 = vmmov %vm7724_vm0 }
  0xb9   :  { %4543 = vmatmul.mubr.msk.f32.gmra.mxu1 %vm7724_vm0, %v348_v15  ;;  %4549 = vmatprep.subr.msk.mxu0 %vm7830_vm7, %v7521_v32  ;;  %vm7835_vm7 = vnez %v7709_v37 }
  0xba   :  { %4561 = vmatprep.subr.msk.mxu1 %vm7831_vm13, %v7521_v32  ;;  %4550 = vmatpush1.msk.msra.mxu0 %vm7832_vm10, %v7521_v32  ;;  %vm7836_vm13 = vnez %v7712_v41  ;;  %vm7837_vm10 = vnez %v7715_v43 }
  0xbb   :  { %4562 = vmatpush1.msk.msra.mxu1 %vm7833_vm5, %v7521_v32  ;;  %2441 = vmatprep.mubr.f32.mxu0 %v7531_v1  ;;  %vm7838_vm5 = vnez %v7718_v44 }
  0xbc   :  { %2530 = vmatprep.mubr.f32.mxu1 %v7531_v1  ;;  %4532 = vmatmul.mubr.msk.f32.gmra.mxu0 %vm7834_vm4, %v349_v17  ;;  %vm7839_vm4 = vmmov %vm7724_vm0 }
  0xbd   :  { %4544 = vmatmul.mubr.msk.f32.gmra.mxu1 %vm7724_vm0, %v349_v17  ;;  %4551 = vmatprep.subr.msk.mxu0 %vm7835_vm7, %v7521_v32  ;;  %vm7840_vm7 = vnez %v7629_v29 }
  0xbe   :  { %4563 = vmatprep.subr.msk.mxu1 %vm7836_vm13, %v7521_v32  ;;  %4552 = vmatpush1.msk.msra.mxu0 %vm7837_vm10, %v7521_v32  ;;  %vm7841_vm10 = vnez %v7627_v26 }
  0xbf   :  { %4564 = vmatpush1.msk.msra.mxu1 %vm7838_vm5, %v7521_v32  ;;  %2601 = vmatprep.mubr.f32.mxu0 %v7531_v1  ;;  %vm7842_vm5 = vnez %v7633_v35 }
  0xc0   :  { %2690 = vmatprep.mubr.f32.mxu1 %v7531_v1  ;;  %4553 = vmatmul.mubr.msk.f32.vlgmr.msra.gmra.mxu0 %vm7839_vm4, %v346_v10  ;;  %vm7843_vm4 = vmmov %vm7724_vm0 }
  0xc1   :  { %4565 = vmatmul.mubr.msk.f32.vlgmr.msra.gmra.mxu1 %vm7724_vm0, %v346_v10  ;;  %4569 = vmatprep.subr.msk.mxu0 %vm7840_vm7, %v7521_v32  ;;  %vm7844_vm7 = vnez %v7635_v36  ;;  %v7871_v10 = vmov 0 }
  0xc2   :  { %4581 = vmatprep.subr.msk.mxu1 %vm7811_vm6, %v7521_v32  ;;  %4570 = vmatpush1.msk.msra.mxu0 %vm7841_vm10, %v7521_v32  ;;  %vm7845_vm6 = vnez %v7637_v40  ;;  %vm7846_vm10 = vnez %v7640_v42  ;;  %v7931_v40 = vmov 1.0  }
  0xc3   :  { %4582 = vmatpush1.msk.msra.mxu1 %vm7842_vm5, %v7521_v32  ;;  %2607 = vmatprep.mubr.f32.mxu0 %v7531_v1  ;;  %vm7847_vm5 = vnez %v7643_v45 }
  0xc4   :  { %2696 = vmatprep.mubr.f32.mxu1 %v7531_v1  ;;  %4554 = vmatmul.mubr.msk.f32.gmra.mxu0 %vm7843_vm4, %v347_v13  ;;  %vm7848_vm4 = vmmov %vm7724_vm0 }
  0xc5   :  { %4566 = vmatmul.mubr.msk.f32.gmra.mxu1 %vm7724_vm0, %v347_v13  ;;  %4571 = vmatprep.subr.msk.mxu0 %vm7844_vm7, %v7521_v32  ;;  %v7946_v13 = vmov 0.0  }
  0xc6   :  { %4583 = vmatprep.subr.msk.mxu1 %vm7845_vm6, %v7521_v32  ;;  %4572 = vmatpush1.msk.msra.mxu0 %vm7846_vm10, %v7521_v32  ;;  %vm7849_vm10 = vnez %v7652_v50 }
  0xc7   :  { %4584 = vmatpush1.msk.msra.mxu1 %vm7847_vm5, %v7521_v32  ;;  %2613 = vmatprep.mubr.f32.mxu0 %v7531_v1  ;;  %vm7850_vm5 = vnez %v7655_v53 }
  0xc8   :  { %2702 = vmatprep.mubr.f32.mxu1 %v7531_v1  ;;  %4555 = vmatmul.mubr.msk.f32.gmra.mxu0 %vm7848_vm4, %v348_v15  ;;  %vm7851_vm4 = vmmov %vm7724_vm0 }
  0xc9   :  { %4567 = vmatmul.mubr.msk.f32.gmra.mxu1 %vm7724_vm0, %v348_v15  ;;  %4573 = vmatprep.subr.msk.mxu0 %vm7819_vm12, %v7521_v32 }
  0xca   :  { %4585 = vmatprep.subr.msk.mxu1 %vm7820_vm8, %v7521_v32  ;;  %4574 = vmatpush1.msk.msra.mxu0 %vm7849_vm10, %v7521_v32 }
  0xcb   :  { %4586 = vmatpush1.msk.msra.mxu1 %vm7850_vm5, %v7521_v32  ;;  %2619 = vmatprep.mubr.f32.mxu0 %v7531_v1 }
  0xcc   :  { %2708 = vmatprep.mubr.f32.mxu1 %v7531_v1  ;;  %4556 = vmatmul.mubr.msk.f32.gmra.mxu0 %vm7851_vm4, %v349_v17  ;;  %vm7852_vm4 = vmmov %vm7724_vm0 }
  0xcd   :  { %4568 = vmatmul.mubr.msk.f32.gmra.mxu1 %vm7724_vm0, %v349_v17  ;;  %4575 = vmatprep.subr.msk.mxu0 %vm7794_vm11, %v7521_v32  ;;  %vm195_vm11 = vcmp.ge.s32.totalorder %v187_v55, 8  ;;  %v6360_v17 = vld [vmem:[#allocation2 + $0xd0] sm:$0xff] }
  0xce   :  { %4587 = vmatprep.subr.msk.mxu1 %vm7795_vm1, %v7521_v32  ;;  %4576 = vmatpush1.msk.msra.mxu0 %vm7824_vm14, %v7521_v32  ;;  %vm7862_vm14 = vnez %v7704_v27  ;;  %vm204_vm1 = vcmp.lt.s32.totalorder %v188_v2, 24 }
  0xcf   :  { %4588 = vmatpush1.msk.msra.mxu1 %vm7825_vm9, %v7521_v32  ;;  %2911 = vmatprep.mubr.f32.mxu0 %v7531_v1  ;;  %vm7860_vm9 = vnez %v7698_v24 }
  0xd0   :  { %3000 = vmatprep.mubr.f32.mxu1 %v7531_v1  ;;  %4732 = vset.pattern.permute.xlu1 %v4764_v47 }
  0xd1   :  { %4577 = vmatmul.mubr.msk.f32.vlgmr.msra.gmra.mxu0 %vm7852_vm4, %v5856_v20  ;;  %4589 = vmatmul.mubr.msk.f32.vlgmr.msra.gmra.mxu1 %vm7724_vm0, %v5856_v20  ;;  %vm7853_vm4 = vnez %v7686_v16 }
  0xd2   :  { %4593 = vmatprep.subr.msk.mxu0 %vm7769_vm15, %v7521_v32  ;;  %4605 = vmatprep.subr.msk.mxu1 %vm7770_vm3, %v7521_v32  ;;  %vm7855_vm3 = vnez %v7688_v18  ;;  %vm7857_vm15 = vnez %v7694_v21 }
  0xd3   :  { %1828 = vperm.xlu1 %4732, %v4870_v31   ;;  %4594 = vmatpush1.msk.msra.mxu0 %vm7799_vm2, %v7521_v32  ;;  %v189_v31 = vshra.s32 %v4799_v6, 5  ;;  %vm7854_vm2 = vmmov %vm7724_vm0  ;;  %v5907_v6 = vmul.u32 2, %v4321_v52  ;;  %v4765_v52 = vmov 3  }
  0xd4   :  { %4606 = vmatpush1.msk.msra.mxu1 %vm7853_vm4, %v7521_v32  ;;  %2917 = vmatprep.mubr.f32.mxu0 %v7531_v1  ;;  %vm7856_vm4 = vnez %v7691_v19 }
  0xd5   :  { %3006 = vmatprep.mubr.f32.mxu1 %v7531_v1  ;;  %4578 = vmatmul.mubr.msk.f32.gmra.mxu0 %vm7724_vm0, %v5874_v51  ;;  %vm7858_vm0 = vnez %v7696_v22  ;;  %v4324_v58 = vadd.s32 4294967288, %v189_v31  ;;  %vm7870_vm5 = vcmp.eq.s32.totalorder %v4793_v4, %v5907_v6 }
  0xd6   :  { %4590 = vmatmul.mubr.msk.f32.gmra.mxu1 %vm7854_vm2, %v5874_v51  ;;  %4595 = vmatprep.subr.msk.mxu0 %vm7855_vm3, %v7521_v32  ;;  %vm202_vm3 = vcmp.lt.s32.totalorder %v186_v48, 24 }
  0xd7   :  { %4607 = vmatprep.subr.msk.mxu1 %vm7856_vm4, %v7521_v32  ;;  %4596 = vmatpush1.msk.msra.mxu0 %vm7857_vm15, %v7521_v32  ;;  %vm194_vm4 = vcmp.ge.s32.totalorder %v186_v48, 8  ;;  %vm7859_vm15 = vmmov %vm7854_vm2  ;;  %v5942_v7 = vmul.u32 2, %v4324_v58  ;;  %v7891_v48 = vmov 0 }
  0xd8   :  { %4608 = vmatpush1.msk.msra.mxu1 %vm7858_vm0, %v7521_v32  ;;  %2923 = vmatprep.mubr.f32.mxu0 %v7531_v1  ;;  %vm7861_vm0 = vnez %v7701_v25 }
  0xd9   :  { %3012 = vmatprep.mubr.f32.mxu1 %v7531_v1  ;;  %4579 = vmatmul.mubr.msk.f32.gmra.mxu0 %vm7854_vm2, %v5895_v8  ;;  %vm7863_vm2 = vnez %v7706_v34 }
  0xda   :  { %4591 = vmatmul.mubr.msk.f32.gmra.mxu1 %vm7859_vm15, %v5895_v8  ;;  %4597 = vmatprep.subr.msk.mxu0 %vm7860_vm9, %v7521_v32  ;;  %vm5931_vm15 = vmand %vm194_vm4, %vm202_vm3  ;;  %vm7868_vm4 = vnez %v7709_v37  ;;  %vm205_vm9 = vcmp.lt.s32.totalorder %v189_v31, 24 }
  0xdb   :  { %4609 = vmatprep.subr.msk.mxu1 %vm7861_vm0, %v7521_v32  ;;  %4598 = vmatpush1.msk.msra.mxu0 %vm7862_vm14, %v7521_v32  ;;  %vm7866_vm14 = vcmask 261120   ;;  %vm197_vm0 = vcmp.ge.s32.totalorder %v189_v31, 8 }
  0xdc   :  { %4610 = vmatpush1.msk.msra.mxu1 %vm7863_vm2, %v7521_v32  ;;  %2929 = vmatprep.mubr.f32.mxu0 %v7531_v1  ;;  %vm203_vm2 = vcmp.lt.s32.totalorder %v187_v55, 24  ;;  %vm7867_vm3 = vmmov %vm7866_vm14  ;;  %v6057_v55 = vshra.s32 %v4918_v39, 5  ;;  %v7903_v39 = vmov 0 }
  0xdd   :  { %3018 = vmatprep.mubr.f32.mxu1 %v7531_v1  ;;  %4580 = vmatmul.mubr.msk.f32.gmra.mxu0 %vm7866_vm14, %v5917_v60  ;;  %vm7869_vm14 = vnez %v7715_v43  ;;  %vm5975_vm8 = vmand %vm195_vm11, %vm203_vm2  ;;  %vm7883_vm2 = vnez %v7629_v29 }
  0xde   :  { %4592 = vmatmul.mubr.msk.f32.gmra.mxu1 %vm7867_vm3, %v5917_v60  ;;  %4599 = vmatprep.subr.msk.mxu0 %vm7868_vm4, %v7521_v32  ;;  %vm5960_vm3 = vmand %vm5931_vm15, %vm7870_vm5  ;;  %vm7873_vm4 = vcmp.ge.s32.totalorder %v188_v2, 8  ;;  %vm235_vm5 = vcmp.eq.s32.totalorder %v4793_v4, %v5937_v3  ;;  %v6030_v2 = vshra.s32 %v4915_v38, 5 }
  0xdf   :  { %4611 = vmatprep.subr.msk.mxu1 %vm7836_vm13, %v7521_v32  ;;  %4600 = vmatpush1.msk.msra.mxu0 %vm7869_vm14, %v7521_v32  ;;  %v7872_v10 = vsel %vm5960_vm3, 4294967295, %v7871_v10  ;;  %vm5965_vm10 = vmand %vm7873_vm4, %vm204_vm1  ;;  %vm236_vm13 = vcmp.eq.s32.totalorder %v4793_v4, %v5925_v62  ;;  %vm7876_vm14 = vnez %v7718_v44  ;;  %vm7879_vm1 = vcmask 261120  }
  0xe0   :  { %4612 = vmatpush1.msk.msra.mxu1 %vm7876_vm14, %v7521_v32  ;;  %3089 = vmatprep.mubr.f32.mxu0 %v7531_v1  ;;  %vm5984_vm4 = vmand %vm197_vm0, %vm205_vm9  ;;  %vm237_vm14 = vcmp.eq.s32.totalorder %v4793_v4, %v5942_v7  ;;  %vm242_vm9 = vcmp.eq.s32.totalorder %v4865_v30, %v5907_v6  ;;  %vm7886_vm0 = vnez %v7631_v33  ;;  %v4325_v31 = vadd.s32 4294967288, %v6030_v2 }
  0xe1   :  { %3178 = vmatprep.mubr.f32.mxu1 %v7531_v1  ;;  %4601 = vmatmul.mubr.msk.f32.vlgmr.msra.gmra.mxu0 %vm7879_vm1, %v5856_v20  ;;  %vm7882_vm11 = vmmov %vm7879_vm1  ;;  %vm7887_vm1 = vnez %v7627_v26 }
  0xe2   :  { %4613 = vmatmul.mubr.msk.f32.vlgmr.msra.gmra.mxu1 %vm7882_vm11, %v5856_v20  ;;  %4617 = vmatprep.subr.msk.mxu0 %vm7883_vm2, %v7521_v32  ;;  %vm5997_vm3 = vmand %vm5965_vm10, %vm236_vm13  ;;  %v7888_v20 = vmov 0  ;;  %vm244_vm13 = vcmp.eq.s32.totalorder %v4865_v30, %v5925_v62  ;;  %vm7890_vm2 = vnez %v7633_v35 }
  0xe3   :  { %4629 = vmatprep.subr.msk.mxu1 %vm7886_vm0, %v7521_v32  ;;  %4618 = vmatpush1.msk.msra.mxu0 %vm7887_vm1, %v7521_v32  ;;  %vm6011_vm11 = vmand %vm5975_vm8, %vm235_vm5  ;;  %vm243_vm5 = vcmp.eq.s32.totalorder %v4865_v30, %v5937_v3  ;;  %vm7893_vm1 = vcmask 261120  }
  0xe4   :  { %v7889_v20 = vsel %vm6011_vm11, 4294967295, %v7888_v20  ;;  %4630 = vmatpush1.msk.msra.mxu1 %vm7890_vm2, %v7521_v32  ;;  %3095 = vmatprep.mubr.f32.mxu0 %v7531_v1  ;;  %vm6023_vm0 = vmand %vm5984_vm4, %vm237_vm14  ;;  %vm245_vm14 = vcmp.eq.s32.totalorder %v4865_v30, %v5942_v7 }
  0xe5   :  { %v7892_v48 = vsel %vm6023_vm0, 4294967295, %v7891_v48  ;;  %3184 = vmatprep.mubr.f32.mxu1 %v7531_v1  ;;  %4602 = vmatmul.mubr.msk.f32.gmra.mxu0 %vm7893_vm1, %v5874_v51  ;;  %vm6037_vm2 = vmand %vm5931_vm15, %vm242_vm9  ;;  %vm250_vm9 = vcmp.eq.s32.totalorder %v4812_v14, %v5907_v6 }
  0xe6   :  { %vm7896_vm0 = vmmov %vm7893_vm1  ;;  %4619 = vmatprep.subr.msk.mxu0 %vm7844_vm7, %v7521_v32  ;;  %4631 = vmatprep.subr.msk.mxu1 %vm7845_vm6, %v7521_v32  ;;  %vm7902_vm7 = vnez %v7643_v45  ;;  %v4327_v45 = vadd.s32 4294967288, %v6057_v55 }
  0xe7   :  { %4614 = vmatmul.mubr.msk.f32.gmra.mxu1 %vm7896_vm0, %v5874_v51  ;;  %vm6050_vm11 = vmand %vm5965_vm10, %vm244_vm13  ;;  %vm7899_vm0 = vnez %v7640_v42  ;;  %vm252_vm13 = vcmp.eq.s32.totalorder %v4812_v14, %v5925_v62  ;;  %3101 = vmatprep.mubr.f32.mxu0 %v7531_v1 }
  0xe8   :  { %4620 = vmatpush1.msk.msra.mxu0 %vm7899_vm0, %v7521_v32  ;;  %vm6067_vm1 = vmand %vm5975_vm8, %vm243_vm5  ;;  %4632 = vmatpush1.msk.msra.mxu1 %vm7902_vm7, %v7521_v32  ;;  %vm7905_vm0 = vcmask 261120   ;;  %vm7909_vm5 = vnez %v7872_v10 }
  0xe9   :  { %vm6079_vm6 = vmand %vm5984_vm4, %vm245_vm14  ;;  %3190 = vmatprep.mubr.f32.mxu1 %v7531_v1  ;;  %4603 = vmatmul.mubr.msk.f32.gmra.mxu0 %vm7905_vm0, %v5895_v8  ;;  %v6105_v56 = vsel %vm7909_vm5, 1.0, %v7531_v1  ;;  %vm7916_vm5 = vnez %v7892_v48  ;;  %vm7919_vm14 = vcmp.eq.s32.totalorder %v4812_v14, %v5937_v3  ;;  %v6156_v48 = vsel %vm6050_vm11, 1.0, %v7531_v1 }
  0xea   :  { %v7904_v39 = vsel %vm6079_vm6, 4294967295, %v7903_v39  ;;  %vm6091_vm7 = vmand %vm5931_vm15, %vm250_vm9  ;;  %4621 = vmatprep.subr.msk.mxu0 %vm7819_vm12, %v7521_v32  ;;  %v6133_v46 = vsel %vm7916_vm5, 1.0, %v7531_v1  ;;  %3107 = vmatprep.mubr.f32.mxu0 %v7531_v1  ;;  %7923 = vst [vmem:[#allocation24_spill] sm:$0xff] %v6156_v48  ;;  %vm258_vm5 = vcmp.eq.s32.totalorder %v4808_v11, %v5907_v6  ;;  %vm7927_vm11 = vcmask 261120   ;;  %v532_v38 = vpop.f32.mrf.mxu1 }
  0xeb   :  { %vm7908_vm6 = vmmov %vm7905_vm0  ;;  %vm7913_vm0 = vnez %v7652_v50  ;;  %7917 = vst [vmem:[#allocation22_spill] sm:$0xff] %v6133_v46  ;;  %v6138_v50 = vsel %vm6037_vm2, 1.0, %v7531_v1  ;;  %vm7924_vm2 = vcmp.eq.s32.totalorder %v4812_v14, %v5942_v7  ;;  %4733 = vset.pattern.permute.xlu0 %v4765_v52 }
  0xec   :  { %4615 = vmatmul.mubr.msk.f32.gmra.mxu1 %vm7908_vm6, %v5895_v8  ;;  %vm6109_vm9 = vmand %vm5965_vm10, %vm252_vm13  ;;  %vm7912_vm6 = vnez %v7649_v49  ;;  %4622 = vmatpush1.msk.msra.mxu0 %vm7913_vm0, %v7521_v32  ;;  %v6123_v8 = vsel %vm5997_vm3, 1.0, %v7531_v1  ;;  %vm7914_vm13 = vnez %v7889_v20  ;;  %7918 = vst [vmem:[#allocation23_spill] sm:$0xff] %v6138_v50  ;;  %v443_v20 = vpop.f32.mrf.mxu0  ;;  %v6180_v49 = vsel %vm6067_vm1, 1.0, %v7531_v1  ;;  %v534_v58 = vpop.f32.mrf.mxu1 }
  0xed   :  { %4633 = vmatprep.subr.msk.mxu1 %vm7912_vm6, %v7521_v32  ;;  %v6128_v10 = vsel %vm7914_vm13, 1.0, %v7531_v1  ;;  %vm6145_vm3 = vmand %vm5975_vm8, %vm7919_vm14  ;;  %vm7922_vm13 = vnez %v7655_v53  ;;  %v6172_v53 = vshra.s32 %v4831_v23, 5  ;;  %3196 = vmatprep.mubr.f32.mxu1 %v7531_v1  ;;  %7928 = vst [vmem:[#allocation25_spill] sm:$0xff] %v6180_v49  ;;  %v6190_v23 = vsel %vm6091_vm7, 1.0, %v7531_v1 }
  0xee   :  { %7915 = vst [vmem:[#allocation21_spill] sm:$0xff] %v6128_v10  ;;  %4634 = vmatpush1.msk.msra.mxu1 %vm7922_vm13, %v7521_v32  ;;  %vm6163_vm14 = vmand %vm5984_vm4, %vm7924_vm2  ;;  %v6169_v32 = vmul.u32 2, %v4325_v31  ;;  %4604 = vmatmul.mubr.msk.f32.gmra.mxu0 %vm7927_vm11, %v5917_v60  ;;  %vm7929_vm2 = vnez %v7904_v39  ;;  %v6193_v31 = vshra.s32 %v4852_v28, 5  ;;  %vm7932_vm1 = vnez %v7658_v54  ;;  %v445_v51 = vpop.f32.mrf.mxu0 }
  0xef   :  { %v6185_v42 = vsel %vm7929_vm2, 1.0, %v7531_v1  ;;  %7930 = vst [vmem:[#allocation26_spill] sm:$0xff] %v6190_v23  ;;  %4623 = vmatprep.subr.msk.mxu0 %vm7932_vm1, %v7931_v40  ;;  %v6203_v39 = vsel %vm6109_vm9, 1.0, %v7531_v1  ;;  %v6208_v5 = vsel %vm6145_vm3, 1.0, %v7531_v1  ;;  %v6212_v28 = vmul.u32 2, %v4327_v45  ;;  %vm6232_vm9 = vmand %vm5931_vm15, %vm258_vm5  ;;  %3399 = vmatprep.mubr.f32.mxu0 %v7531_v1  ;;  %v6293_v45 = vld [vmem:[#allocation2 + $0xc8] sm:$0xff] }
  0xf0   :  { %4616 = vmatmul.mubr.msk.f32.gmra.mxu1 %vm7927_vm11, %v5917_v60  ;;  %7933 = vst [vmem:[#allocation27_spill] sm:$0xff] %v6203_v39  ;;  %7934 = vst [vmem:[#allocation28_spill] sm:$0xff] %v6208_v5  ;;  %vm7935_vm2 = vnez %v7661_v57  ;;  %vm7936_vm11 = vnez %v7664_v59  ;;  %v6220_v60 = vld [vmem:[#allocation2 + $0xc0] sm:$0xff]  ;;  %v6225_v47 = vsel %vm6163_vm14, 1.0, %v7531_v1  ;;  %vm259_vm3 = vcmp.eq.s32.totalorder %v4808_v11, %v5937_v3  ;;  %v449_v6 = vpop.f32.mrf.mxu0  ;;  %v538_v57 = vpop.f32.mrf.mxu1 }
  0xf1   :  { %4635 = vmatprep.subr.msk.mxu1 %vm7935_vm2, %v7931_v40  ;;  %4624 = vmatpush1.msk.msra.mxu0 %vm7936_vm11, %v7931_v40  ;;  %7937 = vst [vmem:[#allocation29_spill] sm:$0xff] %v6225_v47  ;;  %vm7940_vm14 = vnez %v7667_v61  ;;  %v4326_v63 = vadd.s32 4294967288, %v6172_v53  ;;  %v733_v59 = vmul.f32 %v443_v20, %v6105_v56  ;;  %v741_v61 = vmul.f32 %v449_v6, %v6138_v50 }
  0xf2   :  { %4636 = vmatpush1.msk.msra.mxu1 %vm7940_vm14, %v7931_v40  ;;  %3488 = vmatprep.mubr.f32.mxu1 %v7531_v1  ;;  %vm7941_vm7 = vcmp.eq.s32.totalorder %v4808_v11, %v5925_v62  ;;  %v4328_v1 = vadd.s32 4294967288, %v6193_v31  ;;  %v735_v52 = vmul.f32 %v532_v38, %v6123_v8  ;;  %vm7944_vm2 = vcmask 261120   ;;  %v451_v20 = vpop.f32.mrf.mxu0 }
  0xf3   :  { %vm6258_vm11 = vmand %vm5965_vm10, %vm7941_vm7  ;;  %4625 = vmatmul.mubr.msk.f32.vlgmr.msra.gmra.mxu0 %vm7944_vm2, %v6220_v60  ;;  %v743_v62 = vmul.f32 %v538_v57, %v6156_v48  ;;  %v6273_v6 = vsel %vm6232_vm9, 1.0, %v7946_v13  ;;  %vm7951_vm9 = vnez %v7676_v9  ;;  %v734_v57 = vmul.f32 %v445_v51, %v6128_v10  ;;  %v540_v48 = vpop.f32.mrf.mxu1  ;;  %v4734_v51 = vld [vmem:[%s7428_s1] sm:$0xff] }
  0xf4   :  { %vm7945_vm15 = vmmov %vm7944_vm2  ;;  %7947 = vst [vmem:[#allocation30_spill] sm:$0xff] %v6273_v6  ;;  %vm7950_vm2 = vnez %v7672_v0  ;;  %4653 = vmatprep.subr.msk.mxu1 %vm7951_vm9, %v7931_v40  ;;  %v765_v3 = vadd.f32 %v741_v61, %v733_v59  ;;  %v742_v15 = vmul.f32 %v451_v20, %v6180_v49  ;;  %2320 = vperm.xlu0 %4733, %v4734_v51   ;;  %v455_v20 = vpop.f32.mrf.mxu0  ;;  %v6321_v10 = vmul.u32 2, %v4326_v63 }
  0xf5   :  { %4637 = vmatmul.mubr.msk.f32.vlgmr.msra.gmra.mxu1 %vm7945_vm15, %v6220_v60  ;;  %vm6280_vm10 = vmand %vm5975_vm8, %vm259_vm3  ;;  %4641 = vmatprep.subr.msk.mxu0 %vm7950_vm2, %v7931_v40  ;;  %vm7952_vm8 = vcmp.lt.s32.totalorder %v6030_v2, 24  ;;  %vm7953_vm3 = vcmp.ge.s32.totalorder %v6030_v2, 8  ;;  %vm7956_vm5 = vnez %v7681_v12  ;;  %v736_v59 = vmul.f32 %v534_v58, %v6133_v46 }
  0xf6   :  { %vm6300_vm15 = vmand %vm7953_vm3, %vm7952_vm8  ;;  %4642 = vmatpush1.msk.msra.mxu0 %vm7956_vm5, %v7931_v40  ;;  %v783_v61 = vadd.f32 %v743_v62, %v735_v52  ;;  %v744_v2 = vmul.f32 %v540_v48, %v6185_v42  ;;  %vm7957_vm8 = vcmp.lt.s32.totalorder %v6057_v55, 24  ;;  %vm7958_vm3 = vcmp.ge.s32.totalorder %v6057_v55, 8  ;;  %3405 = vmatprep.mubr.f32.mxu0 %v7946_v13  ;;  %v544_v52 = vpop.f32.mrf.mxu1 }
  0xf7   :  { %vm6317_vm7 = vmand %vm7958_vm3, %vm7957_vm8  ;;  %vm7961_vm9 = vnez %v7686_v16  ;;  %v774_v58 = vadd.f32 %v742_v15, %v734_v57  ;;  %v749_v48 = vmul.f32 %v455_v20, %v6190_v23  ;;  %vm7962_vm5 = vcmp.eq.s32.totalorder %v4808_v11, %v5942_v7  ;;  %3494 = vmatprep.mubr.f32.mxu1 %v7946_v13  ;;  %v457_v15 = vpop.f32.mrf.mxu0 }
  0xf8   :  { %4654 = vmatpush1.msk.msra.mxu1 %vm7961_vm9, %v7931_v40  ;;  %vm6333_vm8 = vmand %vm5984_vm4, %vm7962_vm5  ;;  %v6338_v63 = vmul.u32 2, %v4328_v1  ;;  %vm7965_vm9 = vcmask 261120   ;;  %v792_v62 = vadd.f32 %v744_v2, %v736_v59  ;;  %v751_v57 = vmul.f32 %v544_v52, %v6203_v39  ;;  %v546_v59 = vpop.f32.mrf.mxu1 }
  0xf9   :  { %4626 = vmatmul.mubr.msk.f32.gmra.mxu0 %vm7965_vm9, %v6293_v45  ;;  %vm7966_vm2 = vcmp.eq.s32.totalorder %v4793_v4, %v6169_v32  ;;  %vm7969_vm14 = vmmov %vm7965_vm9  ;;  %vm7970_vm9 = vnez %v7688_v18  ;;  %v766_v1 = vadd.f32 %v765_v3, %v749_v48  ;;  %v750_v51 = vmul.f32 %v457_v15, %v6208_v5  ;;  %v461_v48 = vpop.f32.mrf.mxu0 }
  0xfa   :  { %vm6349_vm4 = vmand %vm6300_vm15, %vm7966_vm2  ;;  %4638 = vmatmul.mubr.msk.f32.gmra.mxu1 %vm7969_vm14, %v6293_v45  ;;  %4643 = vmatprep.subr.msk.mxu0 %vm7970_vm9, %v7931_v40  ;;  %v6366_v2 = vsel %vm6258_vm11, 1.0, %v7946_v13  ;;  %vm7972_vm2 = vcmp.eq.s32.totalorder %v4793_v4, %v6212_v28  ;;  %vm7975_vm5 = vnez %v7691_v19  ;;  %vm7976_vm3 = vnez %v7694_v21 }
  0xfb   :  { %7971 = vst [vmem:[#allocation31_spill] sm:$0xff] %v6366_v2  ;;  %vm6373_vm14 = vmand %vm6317_vm7, %vm7972_vm2  ;;  %4655 = vmatprep.subr.msk.mxu1 %vm7975_vm5, %v7931_v40  ;;  %4644 = vmatpush1.msk.msra.mxu0 %vm7976_vm3, %v7931_v40  ;;  %v784_v54 = vadd.f32 %v783_v61, %v751_v57  ;;  %v752_v3 = vmul.f32 %v546_v59, %v6225_v47  ;;  %v6387_v52 = vsel %vm6280_vm10, 1.0, %v7946_v13  ;;  %vm7978_vm11 = vcmp.lt.s32.totalorder %v6172_v53, 24  ;;  %v550_v57 = vpop.f32.mrf.mxu1 }
  0xfc   :  { %7977 = vst [vmem:[#allocation32_spill] sm:$0xff] %v6387_v52  ;;  %vm7979_vm2 = vcmp.ge.s32.totalorder %v6172_v53, 8  ;;  %vm7982_vm5 = vnez %v7696_v22  ;;  %3411 = vmatprep.mubr.f32.mxu0 %v7946_v13  ;;  %v775_v38 = vadd.f32 %v774_v58, %v750_v51  ;;  %v757_v61 = vmul.f32 %v461_v48, %v6273_v6  ;;  %3500 = vmatprep.mubr.f32.mxu1 %v7946_v13  ;;  %v463_v51 = vpop.f32.mrf.mxu0  ;;  %v6430_v48 = vld [vmem:[#allocation2 + $0xd8] sm:$0xff] }
  0xfd   :  { %vm6393_vm9 = vmand %vm7979_vm2, %vm7978_vm11  ;;  %4656 = vmatpush1.msk.msra.mxu1 %vm7982_vm5, %v7931_v40  ;;  %v6407_v53 = vsel %vm6333_vm8, 1.0, %v7946_v13  ;;  %vm7984_vm10 = vcmp.lt.s32.totalorder %v6193_v31, 24  ;;  %vm7985_vm11 = vcmp.ge.s32.totalorder %v6193_v31, 8  ;;  %vm7988_vm5 = vcmask 261120   ;;  %v552_v47 = vpop.f32.mrf.mxu1 }
  0xfe   :  { %7983 = vst [vmem:[#allocation33_spill] sm:$0xff] %v6407_v53  ;;  %vm6413_vm2 = vmand %vm7985_vm11, %vm7984_vm10  ;;  %4627 = vmatmul.mubr.msk.f32.gmra.mxu0 %vm7988_vm5, %v6360_v17  ;;  %v793_v58 = vadd.f32 %v792_v62, %v752_v3  ;;  %v759_v55 = vmul.f32 %v550_v57, %v6366_v2  ;;  %vm7990_vm11 = vnez %v7698_v24  ;;  %v767_v31 = vadd.f32 %v766_v1, %v757_v61 }
  0xff   :  { %vm7989_vm10 = vmmov %vm7988_vm5  ;;  %4645 = vmatprep.subr.msk.mxu0 %vm7990_vm11, %v7931_v40  ;;  %v758_v6 = vmul.f32 %v463_v51, %v6387_v52  ;;  %v6436_v62 = vsel %vm6349_vm4, 1.0, %v7946_v13  ;;  %vm7992_vm5 = vcmp.eq.s32.totalorder %v4793_v4, %v6321_v10  ;;  %vm7995_vm3 = vnez %v7701_v25  ;;  %3417 = vmatprep.mubr.f32.mxu0 %v7946_v13 }
 0x100   :  { %4639 = vmatmul.mubr.msk.f32.gmra.mxu1 %vm7989_vm10, %v6360_v17  ;;  %7991 = vst [vmem:[#allocation34_spill] sm:$0xff] %v6436_v62  ;;  %vm6443_vm10 = vmand %vm6393_vm9, %vm7992_vm5  ;;  %4657 = vmatprep.subr.msk.mxu1 %vm7995_vm3, %v7931_v40  ;;  %vm7996_vm4 = vnez %v7704_v27  ;;  %v785_v7 = vadd.f32 %v784_v54, %v759_v55  ;;  %v760_v1 = vmul.f32 %v552_v47, %v6407_v53  ;;  %v6459_v61 = vsel %vm6373_vm14, 1.0, %v7946_v13 }
 0x101   :  { %4646 = vmatpush1.msk.msra.mxu0 %vm7996_vm4, %v7931_v40  ;;  %7997 = vst [vmem:[#allocation35_spill] sm:$0xff] %v6459_v61  ;;  %vm7998_vm5 = vcmp.eq.s32.totalorder %v4793_v4, %v6338_v63  ;;  %vm8001_vm3 = vnez %v7706_v34  ;;  %v768_v47 = vrot.slane %v767_v31, 4  ;;  %v776_v20 = vadd.f32 %v775_v38, %v758_v6  ;;  %3506 = vmatprep.mubr.f32.mxu1 %v7946_v13  ;;  %v710_v4 = vpop.f32.mrf.mxu1 }
 0x102   :  { %vm6466_vm8 = vmand %vm6413_vm2, %vm7998_vm5  ;;  %4658 = vmatpush1.msk.msra.mxu1 %vm8001_vm3, %v7931_v40  ;;  %vm8002_vm14 = vcmp.eq.s32.totalorder %v4865_v30, %v6169_v32  ;;  %v786_v54 = vrot.slane %v785_v7, 4  ;;  %vm8005_vm3 = vcmask 261120   ;;  %v794_v6 = vadd.f32 %v793_v58, %v760_v1 }
 0x103   :  { %vm6481_vm5 = vmand %vm6300_vm15, %vm8002_vm14  ;;  %4628 = vmatmul.mubr.msk.f32.gmra.mxu0 %vm8005_vm3, %v6430_v48  ;;  %v6495_v38 = vsel %vm6443_vm10, 1.0, %v7946_v13  ;;  %vm8007_vm14 = vcmp.eq.s32.totalorder %v4865_v30, %v6212_v28  ;;  %v769_v51 = vadd.f32 %v768_v47, %v767_v31  ;;  %vm8010_vm10 = vnez %v7709_v37  ;;  %v621_v47 = vpop.f32.mrf.mxu0  ;;  %v712_v55 = vpop.f32.mrf.mxu1 }
 0x104   :  { %8006 = vst [vmem:[#allocation36_spill] sm:$0xff] %v6495_v38  ;;  %vm6502_vm4 = vmand %vm6317_vm7, %vm8007_vm14  ;;  %4640 = vmatmul.mubr.msk.f32.gmra.mxu1 %vm8005_vm3, %v6430_v48  ;;  %4647 = vmatprep.subr.msk.mxu0 %vm8010_vm10, %v7931_v40  ;;  %v777_v58 = vrot.slane %v776_v20, 4  ;;  %vm8011_vm1 = vcmp.eq.s32.totalorder %v4865_v30, %v6321_v10  ;;  %v787_v31 = vadd.f32 %v786_v54, %v785_v7  ;;  %vm8014_vm10 = vnez %v7712_v41 }
 0x105   :  { %vm6518_vm14 = vmand %vm6393_vm9, %vm8011_vm1  ;;  %4659 = vmatprep.subr.msk.mxu1 %vm8014_vm10, %v7931_v40  ;;  %vm8015_vm13 = vnez %v7715_v43  ;;  %v795_v1 = vrot.slane %v794_v6, 4  ;;  %v6535_v53 = vsel %vm6466_vm8, 1.0, %v7946_v13  ;;  %v6540_v37 = vsel %vm6481_vm5, 1.0, %v7946_v13  ;;  %3577 = vmatprep.mubr.f32.mxu0 %v7946_v13 }
 0x106   :  { %4648 = vmatpush1.msk.msra.mxu0 %vm8015_vm13, %v7931_v40  ;;  %8016 = vst [vmem:[#allocation37_spill] sm:$0xff] %v6535_v53  ;;  %vm8017_vm1 = vcmp.eq.s32.totalorder %v4865_v30, %v6338_v63  ;;  %v770_v54 = vrot.slane %v769_v51, 2  ;;  %vm8020_vm11 = vnez %v7718_v44  ;;  %v778_v57 = vadd.f32 %v777_v58, %v776_v20  ;;  %3666 = vmatprep.mubr.f32.mxu1 %v7946_v13  ;;  %v623_v58 = vpop.f32.mrf.mxu0 }
 0x107   :  { %vm6547_vm3 = vmand %vm6413_vm2, %vm8017_vm1  ;;  %4660 = vmatpush1.msk.msra.mxu1 %vm8020_vm11, %v7931_v40  ;;  %vm8021_vm8 = vcmp.eq.s32.totalorder %v4812_v14, %v6169_v32  ;;  %v788_v44 = vrot.slane %v787_v31, 2  ;;  %v796_v20 = vadd.f32 %v795_v1, %v794_v6  ;;  %vm8024_vm11 = vcmask 261120  }
 0x108   :  { %vm6560_vm5 = vmand %vm6300_vm15, %vm8021_vm8  ;;  %4649 = vmatmul.mubr.msk.f32.vlgmr.msra.gmra.mxu0 %vm8024_vm11, %v6220_v60  ;;  %v6574_v43 = vsel %vm6502_vm4, 1.0, %v7946_v13  ;;  %v6579_v41 = vsel %vm6518_vm14, 1.0, %v7946_v13  ;;  %vm8027_vm8 = vcmp.eq.s32.totalorder %v4812_v14, %v6212_v28  ;;  %v6590_v1 = vadd.f32 %v770_v54, %v769_v51  ;;  %4661 = vmatmul.mubr.msk.f32.vlgmr.msra.gmra.mxu1 %vm8024_vm11, %v6220_v60 }
 0x109   :  { %8025 = vst [vmem:[#allocation38_spill] sm:$0xff] %v6574_v43  ;;  %8026 = vst [vmem:[#allocation39_spill] sm:$0xff] %v6579_v41  ;;  %v779_v52 = vrot.slane %v778_v57, 2  ;;  %vm8030_vm4 = vnez %v7629_v29  ;;  %vm8031_vm14 = vcmp.eq.s32.totalorder %v4812_v14, %v6321_v10  ;;  %vm263_vm1 = vcmp.eq.s32.totalorder %v4808_v11, %v6321_v10  ;;  %v627_v29 = vpop.f32.mrf.mxu0  ;;  %3583 = vmatprep.mubr.f32.mxu0 %v7946_v13 }
 0x10a   :  { %vm6586_vm13 = vmand %vm6317_vm7, %vm8027_vm8  ;;  %4665 = vmatprep.subr.msk.mxu0 %vm8030_vm4, %v7931_v40  ;;  %vm265_vm11 = vcmp.eq.s32.totalorder %v4808_v11, %v6338_v63  ;;  %v789_v60 = vadd.f32 %v788_v44, %v787_v31  ;;  %v797_v51 = vrot.slane %v796_v20, 2  ;;  %vm8034_vm4 = vnez %v7631_v33  ;;  %v716_v33 = vpop.f32.mrf.mxu1  ;;  %3672 = vmatprep.mubr.f32.mxu1 %v7946_v13 }
 0x10b   :  { %vm6602_vm8 = vmand %vm6393_vm9, %vm8031_vm14  ;;  %4677 = vmatprep.subr.msk.mxu1 %vm8034_vm4, %v7931_v40  ;;  %vm8035_vm10 = vnez %v7627_v26  ;;  %v6619_v54 = vsel %vm6547_vm3, 1.0, %v7946_v13  ;;  %v6624_v2 = vsel %vm6560_vm5, 1.0, %v7946_v13  ;;  %v780_v44 = vadd.f32 %v779_v52, %v778_v57  ;;  %v6713_v57 = vpop.permute.xlu0 %839 }
 0x10c   :  { %4666 = vmatpush1.msk.msra.mxu0 %vm8035_vm10, %v7931_v40  ;;  %8036 = vst [vmem:[#allocation40_spill] sm:$0xff] %v6619_v54  ;;  %8037 = vst [vmem:[#allocation41_spill] sm:$0xff] %v6624_v2  ;;  %v737_v31 = vmul.f32 %v621_v47, %v6436_v62  ;;  %vm8038_vm14 = vnez %v7633_v35  ;;  %v745_v26 = vmul.f32 %v627_v29, %v6540_v37  ;;  %v6635_v7 = vsel %vm6586_vm13, 1.0, %v7946_v13  ;;  %v629_v35 = vpop.f32.mrf.mxu0  ;;  %v718_v3 = vpop.f32.mrf.mxu1 }
 0x10d   :  { %4678 = vmatpush1.msk.msra.mxu1 %vm8038_vm14, %v7931_v40  ;;  %8039 = vst [vmem:[#allocation42_spill] sm:$0xff] %v6635_v7  ;;  %v798_v30 = vadd.f32 %v797_v51, %v796_v20  ;;  %v739_v34 = vmul.f32 %v710_v4, %v6459_v61  ;;  %v747_v52 = vmul.f32 %v716_v33, %v6574_v43  ;;  %vm8040_vm10 = vcmask 261120  }
 0x10e   :  { %4650 = vmatmul.mubr.msk.f32.gmra.mxu0 %vm8040_vm10, %v6293_v45  ;;  %v6645_v47 = vsel %vm6602_vm8, 1.0, %v7946_v13  ;;  %vm8042_vm13 = vcmp.eq.s32.totalorder %v4812_v14, %v6338_v63  ;;  %v772_v4 = vrot.slane %v6590_v1, 1  ;;  %v738_v20 = vmul.f32 %v623_v58, %v6495_v38  ;;  %vm8045_vm5 = vmmov %vm8040_vm10 }
 0x10f   :  { %8041 = vst [vmem:[#allocation43_spill] sm:$0xff] %v6645_v47  ;;  %vm6652_vm3 = vmand %vm6413_vm2, %vm8042_vm13  ;;  %v801_v6 = vadd.f32 %v745_v26, %v737_v31  ;;  %4662 = vmatmul.mubr.msk.f32.gmra.mxu1 %vm8045_vm5, %v6293_v45  ;;  %vm8046_vm8 = vnez %v7635_v36  ;;  %v746_v14 = vmul.f32 %v629_v35, %v6579_v41  ;;  %vm8047_vm4 = vcmp.eq.s32.totalorder %v4808_v11, %v6169_v32  ;;  %v8050_v31 = vld [vmem:[#allocation5_spill] sm:$0xff]  ;;  %v8052_v36 = vld [vmem:[#allocation6_spill] sm:$0xff]  ;;  %v633_v26 = vpop.f32.mrf.mxu0  ;;  %v722_v35 = vpop.f32.mrf.mxu1 }
 0x110   :  { %4667 = vmatprep.subr.msk.mxu0 %vm8046_vm8, %v7931_v40  ;;  %vm6669_vm14 = vmand %vm6300_vm15, %vm8047_vm4  ;;  %v790_v58 = vrot.slane %v789_v60, 1  ;;  %v740_v29 = vmul.f32 %v712_v55, %v6535_v53  ;;  %v819_v45 = vadd.f32 %v747_v52, %v739_v34  ;;  %vm8051_vm10 = vnez %v8050_v31  ;;  %v8057_v55 = vld [vmem:[#allocation7_spill] sm:$0xff]  ;;  %3589 = vmatprep.mubr.f32.mxu0 %v7946_v13  ;;  %8063 = vst [vmem:[#allocation6_spill] sm:$0xff] %v6713_v57 }
 0x111   :  { %4679 = vmatprep.subr.msk.mxu1 %vm8051_vm10, %v7931_v40  ;;  %vm8053_vm13 = vnez %v8052_v36  ;;  %v748_v32 = vmul.f32 %v718_v3, %v6619_v54  ;;  %vm8054_vm15 = vcmp.eq.s32.totalorder %v4808_v11, %v6212_v28  ;;  %v781_v34 = vrot.slane %v780_v44, 1  ;;  %3678 = vmatprep.mubr.f32.mxu1 %v7946_v13  ;;  %v635_v31 = vpop.f32.mrf.mxu0 }
 0x112   :  { %4668 = vmatpush1.msk.msra.mxu0 %vm8053_vm13, %v7931_v40  ;;  %vm6686_vm5 = vmand %vm6317_vm7, %vm8054_vm15  ;;  %vm8058_vm8 = vnez %v8057_v55  ;;  %v810_v33 = vadd.f32 %v746_v14, %v738_v20  ;;  %v753_v52 = vmul.f32 %v633_v26, %v6624_v2  ;;  %v6698_v28 = vsel %vm6652_vm3, 1.0, %v7946_v13  ;;  %v724_v26 = vpop.f32.mrf.mxu1 }
 0x113   :  { %4680 = vmatpush1.msk.msra.mxu1 %vm8058_vm8, %v7931_v40  ;;  %8059 = vst [vmem:[#allocation5_spill] sm:$0xff] %v6698_v28  ;;  %vm6705_vm7 = vmand %vm6393_vm9, %vm263_vm1  ;;  %v799_v20 = vrot.slane %v798_v30, 1  ;;  %v828_v14 = vadd.f32 %v748_v32, %v740_v29  ;;  %v755_v3 = vmul.f32 %v722_v35, %v6635_v7  ;;  %vm8062_vm4 = vcmask 261120   ;;  %4669 = vmatprep.subr.msk.mxu0 %vm7819_vm12, %v7931_v40 }
 0x114   :  { %4651 = vmatmul.mubr.msk.f32.gmra.mxu0 %vm8062_vm4, %v6360_v17  ;;  %v6718_v10 = vsel %vm6669_vm14, 1.0, %v7946_v13  ;;  %vm6725_vm9 = vmand %vm6413_vm2, %vm265_vm11  ;;  %v773_v29 = vadd.f32 %v772_v4, %v6590_v1  ;;  %v802_v36 = vadd.f32 %v801_v6, %v753_v52  ;;  %v754_v51 = vmul.f32 %v635_v31, %v6645_v47  ;;  %4681 = vmatprep.subr.msk.mxu1 %vm7912_vm6, %v7931_v40  ;;  %v639_v6 = vpop.f32.mrf.mxu0  ;;  %v728_v52 = vpop.f32.mrf.mxu1  ;;  %v8078_v31 = vld [vmem:[#allocation12_spill] sm:$0xff] }
 0x115   :  { %8064 = vst [vmem:[#allocation7_spill] sm:$0xff] %v6718_v10  ;;  %vm8067_vm1 = vmmov %vm8062_vm4  ;;  %v6739_v11 = vsel %vm6686_vm5, 1.0, %v7946_v13  ;;  %v791_v63 = vadd.f32 %v790_v58, %v789_v60  ;;  %v820_v59 = vadd.f32 %v819_v45, %v755_v3  ;;  %4670 = vmatpush1.msk.msra.mxu0 %vm7913_vm0, %v7931_v40  ;;  %v756_v4 = vmul.f32 %v724_v26, %v6698_v28  ;;  %v8073_v60 = vld [vmem:[#allocation11_spill] sm:$0xff] }
 0x116   :  { %4663 = vmatmul.mubr.msk.f32.gmra.mxu1 %vm8067_vm1, %v6360_v17  ;;  %8069 = vst [vmem:[#allocation8_spill] sm:$0xff] %v6739_v11  ;;  %v6751_v55 = vsel %vm6705_vm7, 1.0, %v7946_v13  ;;  %v782_v50 = vadd.f32 %v781_v34, %v780_v44  ;;  %vm8074_vm12 = vnez %v8073_v60  ;;  %v811_v58 = vadd.f32 %v810_v33, %v754_v51  ;;  %3595 = vmatprep.mubr.f32.mxu0 %v7946_v13  ;;  %vm8076_vm6 = vmmov %vm8067_vm1  ;;  %v641_v34 = vpop.f32.mrf.mxu0  ;;  %v8080_v51 = vld [vmem:[#allocation13_spill] sm:$0xff] }
 0x117   :  { %8072 = vst [vmem:[#allocation9_spill] sm:$0xff] %v6751_v55  ;;  %4682 = vmatpush1.msk.msra.mxu1 %vm8074_vm12, %v7931_v40  ;;  %v761_v45 = vmul.f32 %v639_v6, %v6718_v10  ;;  %v6761_v35 = vsel %vm6725_vm9, 1.0, %v7946_v13  ;;  %v800_v3 = vadd.f32 %v799_v20, %v798_v30  ;;  %v829_v49 = vadd.f32 %v828_v14, %v756_v4  ;;  %vm8077_vm0 = vmmov %vm8067_vm1  ;;  %v730_v30 = vpop.f32.mrf.mxu1  ;;  %v6773_v20 = vld [vmem:[#allocation2 + $0xe0] sm:$0xff]  ;;  %v8085_v4 = vld [vmem:[#allocation15_spill] sm:$0xff] }
 0x118   :  { %8075 = vst [vmem:[#allocation10_spill] sm:$0xff] %v6761_v35  ;;  %3684 = vmatprep.mubr.f32.mxu1 %v7946_v13  ;;  %v763_v44 = vmul.f32 %v728_v52, %v6739_v11  ;;  %4652 = vmatmul.mubr.msk.f32.gmra.mxu0 %vm8076_vm6, %v6430_v48  ;;  %vm8079_vm2 = vnez %v8078_v31  ;;  %v762_v15 = vmul.f32 %v641_v34, %v6751_v55  ;;  %v941_v1 = vpop.f32.mrf.mxu0  ;;  %vm8087_vm10 = vmmov %vm8077_vm0 }
 0x119   :  { %v803_v33 = vadd.f32 %v802_v36, %v761_v45  ;;  %4671 = vmatprep.subr.msk.mxu0 %vm8079_vm2, %v7931_v40  ;;  %v842_v14 = vmul.f32 %v6713_v57, %v773_v29  ;;  %vm8081_vm11 = vnez %v8080_v51  ;;  %v8082_v36 = vld [vmem:[#allocation14_spill] sm:$0xff]  ;;  %v764_v26 = vmul.f32 %v730_v30, %v6761_v35  ;;  %3887 = vmatprep.mubr.f32.mxu0 %v7946_v13  ;;  %vm8088_vm13 = vmmov %vm8077_vm0 }
 0x11a   :  { %4664 = vmatmul.mubr.msk.f32.gmra.mxu1 %vm8077_vm0, %v6430_v48  ;;  %v821_v32 = vadd.f32 %v820_v59, %v763_v44  ;;  %4683 = vmatprep.subr.msk.mxu1 %vm8081_vm11, %v7931_v40  ;;  %vm8083_vm3 = vnez %v8082_v36  ;;  %v6782_v48 = vpop.permute.xlu0 %852  ;;  %vm8086_vm14 = vnez %v8085_v4  ;;  %v812_v29 = vadd.f32 %v811_v58, %v762_v15  ;;  %v1030_v59 = vpop.f32.mrf.mxu1  ;;  %vm8096_vm4 = vmmov %vm8077_vm0 }
 0x11b   :  { %4672 = vmatpush1.msk.msra.mxu0 %vm8083_vm3, %v7931_v40  ;;  %8084 = vst [vmem:[#allocation11_spill] sm:$0xff] %v6782_v48  ;;  %v804_v17 = vrot.slane %v803_v33, 4  ;;  %4684 = vmatpush1.msk.msra.mxu1 %vm8086_vm14, %v7931_v40  ;;  %v830_v60 = vadd.f32 %v829_v49, %v764_v26  ;;  %v943_v45 = vpop.f32.mrf.mxu0  ;;  %v6793_v52 = vmul.f32 %v6713_v57, %v782_v50  ;;  %vm8089_vm15 = vnez %v7672_v0  ;;  %v6803_v49 = vld [vmem:[#allocation2 + $0xe8] sm:$0xff]  ;;  %v8094_v26 = vld [vmem:[#allocation23_spill] sm:$0xff]  ;;  %vm8097_vm9 = vmmov %vm8077_vm0 }
 0x11c   :  { %v822_v6 = vrot.slane %v821_v32, 4  ;;  %3976 = vmatprep.mubr.f32.mxu1 %v7946_v13  ;;  %4673 = vmatmul.mubr.msk.f32.vlgmr.msra.gmra.mxu0 %vm8087_vm10, %v6773_v20  ;;  %v6796_v44 = vmul.f32 %v6713_v57, %v791_v63  ;;  %v813_v31 = vrot.slane %v812_v29, 4  ;;  %v1032_v58 = vpop.f32.mrf.mxu1  ;;  %v6806_v15 = vmul.f32 %v6713_v57, %v800_v3  ;;  %vm8103_vm2 = vmmov %vm8096_vm4 }
 0x11d   :  { %v805_v34 = vadd.f32 %v804_v17, %v803_v33  ;;  %4689 = vmatprep.subr.msk.mxu0 %vm8089_vm15, %v7931_v40  ;;  %v6809_v50 = vadd.f32 %v6782_v48, %v842_v14  ;;  %v831_v30 = vrot.slane %v830_v60, 4  ;;  %v1231_v33 = vmul.f32 %v941_v1, %v6105_v56  ;;  %v947_v0 = vpop.f32.mrf.mxu0  ;;  %v8093_v14 = vld [vmem:[#allocation21_spill] sm:$0xff]  ;;  %3893 = vmatprep.mubr.f32.mxu0 %v7946_v13  ;;  %vm8104_vm11 = vmmov %vm8103_vm2 }
 0x11e   :  { %4685 = vmatmul.mubr.msk.f32.vlgmr.msra.gmra.mxu1 %vm8088_vm13, %v6773_v20  ;;  %v823_v63 = vadd.f32 %v822_v6, %v821_v32  ;;  %v1233_v51 = vmul.f32 %v1030_v59, %v6123_v8  ;;  %vm8090_vm5 = vnez %v7676_v9  ;;  %vm8091_vm8 = vnez %v7681_v12  ;;  %v1036_v17 = vpop.f32.mrf.mxu1  ;;  %v8095_v12 = vld [vmem:[#allocation24_spill] sm:$0xff]  ;;  %vm8113_vm15 = vmmov %vm8103_vm2 }
 0x11f   :  { %4701 = vmatprep.subr.msk.mxu1 %vm8090_vm5, %v7931_v40  ;;  %4690 = vmatpush1.msk.msra.mxu0 %vm8091_vm8, %v7931_v40  ;;  %v806_v3 = vrot.slane %v805_v34, 2  ;;  %v814_v36 = vadd.f32 %v813_v31, %v812_v29  ;;  %vm8092_vm7 = vnez %v7686_v16  ;;  %v1232_v32 = vmul.f32 %v943_v45, %v8093_v14  ;;  %v949_v16 = vpop.f32.mrf.mxu0  ;;  %vm8114_vm5 = vmmov %vm8103_vm2 }
 0x120   :  { %4702 = vmatpush1.msk.msra.mxu1 %vm8092_vm7, %v7931_v40  ;;  %v1239_v1 = vmul.f32 %v947_v0, %v8094_v26  ;;  %v824_v9 = vrot.slane %v823_v63, 2  ;;  %v832_v4 = vadd.f32 %v831_v30, %v830_v60  ;;  %v1234_v59 = vmul.f32 %v1032_v58, %v6133_v46  ;;  %3982 = vmatprep.mubr.f32.mxu1 %v7946_v13  ;;  %v8099_v60 = vld [vmem:[#allocation25_spill] sm:$0xff]  ;;  %v1038_v30 = vpop.f32.mrf.mxu1  ;;  %v6836_v0 = vld [vmem:[#allocation2 + $0xf0] sm:$0xff] }
 0x121   :  { %v1241_v6 = vmul.f32 %v1036_v17, %v8095_v12  ;;  %4674 = vmatmul.mubr.msk.f32.gmra.mxu0 %vm8096_vm4, %v6803_v49  ;;  %v807_v29 = vadd.f32 %v806_v3, %v805_v34  ;;  %v815_v31 = vrot.slane %v814_v36, 2  ;;  %vm8098_vm1 = vnez %v7688_v18  ;;  %v953_v18 = vpop.f32.mrf.mxu0 }
 0x122   :  { %v1263_v45 = vadd.f32 %v1239_v1, %v1231_v33  ;;  %4686 = vmatmul.mubr.msk.f32.gmra.mxu1 %vm8097_vm9, %v6803_v49  ;;  %4691 = vmatprep.subr.msk.mxu0 %vm8098_vm1, %v7931_v40  ;;  %v1240_v58 = vmul.f32 %v949_v16, %v8099_v60  ;;  %v825_v17 = vadd.f32 %v824_v9, %v823_v63  ;;  %v833_v12 = vrot.slane %v832_v4, 2  ;;  %vm8126_vm1 = vmmov %vm8103_vm2 }
 0x123   :  { %v1281_v46 = vadd.f32 %v1241_v6, %v1233_v51  ;;  %vm8100_vm12 = vnez %v7691_v19  ;;  %vm8101_vm6 = vnez %v7694_v21  ;;  %v1242_v34 = vmul.f32 %v1038_v30, %v6185_v42  ;;  %3899 = vmatprep.mubr.f32.mxu0 %v7946_v13  ;;  %v1042_v19 = vpop.f32.mrf.mxu1  ;;  %3988 = vmatprep.mubr.f32.mxu1 %v7946_v13  ;;  %v6871_v30 = vld [vmem:[#allocation2 + $0xf8] sm:$0xff] }
 0x124   :  { %4703 = vmatprep.subr.msk.mxu1 %vm8100_vm12, %v7931_v40  ;;  %4692 = vmatpush1.msk.msra.mxu0 %vm8101_vm6, %v7931_v40  ;;  %v808_v33 = vrot.slane %v807_v29, 1  ;;  %v816_v3 = vadd.f32 %v815_v31, %v814_v36  ;;  %vm8102_vm0 = vnez %v7696_v22  ;;  %v1272_v63 = vadd.f32 %v1240_v58, %v1232_v32  ;;  %v955_v36 = vpop.f32.mrf.mxu0  ;;  %vm8127_vm12 = vmmov %vm8126_vm1 }
 0x125   :  { %4704 = vmatpush1.msk.msra.mxu1 %vm8102_vm0, %v7931_v40  ;;  %v1247_v51 = vmul.f32 %v953_v18, %v6190_v23  ;;  %v826_v1 = vrot.slane %v825_v17, 1  ;;  %v834_v9 = vadd.f32 %v833_v12, %v832_v4  ;;  %v1290_v6 = vadd.f32 %v1242_v34, %v1234_v59  ;;  %4675 = vmatmul.mubr.msk.f32.gmra.mxu0 %vm8103_vm2, %v6836_v0  ;;  %v1044_v4 = vpop.f32.mrf.mxu1  ;;  %vm8128_vm6 = vmmov %vm8126_vm1 }
 0x126   :  { %v1249_v21 = vmul.f32 %v1042_v19, %v6203_v39  ;;  %v817_v16 = vrot.slane %v816_v3, 1  ;;  %4687 = vmatmul.mubr.msk.f32.gmra.mxu1 %vm8104_vm11, %v6836_v0  ;;  %vm8105_vm3 = vnez %v7698_v24  ;;  %v1248_v32 = vmul.f32 %v955_v36, %v6208_v5  ;;  %v959_v58 = vpop.f32.mrf.mxu0  ;;  %3905 = vmatprep.mubr.f32.mxu0 %v7946_v13  ;;  %v8111_v36 = vld [vmem:[#allocation30_spill] sm:$0xff]  ;;  %vm8129_vm0 = vmmov %vm8126_vm1 }
 0x127   :  { %v1264_v22 = vadd.f32 %v1263_v45, %v1247_v51  ;;  %4693 = vmatprep.subr.msk.mxu0 %vm8105_vm3, %v7931_v40  ;;  %v6862_v59 = vadd.f32 %v6782_v48, %v6793_v52  ;;  %v835_v12 = vrot.slane %v834_v9, 1  ;;  %vm8106_vm14 = vnez %v7701_v25  ;;  %v8108_v45 = vld [vmem:[#allocation29_spill] sm:$0xff]  ;;  %v8109_v51 = vld [vmem:[#allocation16_spill] sm:$0xff]  ;;  %v1048_v25 = vpop.f32.mrf.mxu1  ;;  %3994 = vmatprep.mubr.f32.mxu1 %v7946_v13  ;;  %vm8130_vm2 = vmmov %vm8129_vm0 }
 0x128   :  { %v1282_v31 = vadd.f32 %v1281_v46, %v1249_v21  ;;  %4705 = vmatprep.subr.msk.mxu1 %vm8106_vm14, %v7931_v40  ;;  %vm8107_vm10 = vnez %v7704_v27  ;;  %v1250_v24 = vmul.f32 %v1044_v4, %v8108_v45  ;;  %v6875_v34 = vadd.f32 %v6782_v48, %v6796_v44  ;;  %v961_v45 = vpop.f32.mrf.mxu0  ;;  %vm8131_vm11 = vmmov %vm8129_vm0 }
 0x129   :  { %4694 = vmatpush1.msk.msra.mxu0 %vm8107_vm10, %v7931_v40  ;;  %v809_v52 = vadd.f32 %v808_v33, %v807_v29  ;;  %v827_v18 = vadd.f32 %v826_v1, %v825_v17  ;;  %v818_v46 = vadd.f32 %v817_v16, %v816_v3  ;;  %vm8110_vm13 = vnez %v8109_v51  ;;  %v8112_v29 = vld [vmem:[#allocation31_spill] sm:$0xff]  ;;  %v8115_v33 = vld [vmem:[#allocation32_spill] sm:$0xff]  ;;  %v1050_v1 = vpop.f32.mrf.mxu1  ;;  %v8118_v16 = vld [vmem:[#allocation18_spill] sm:$0xff] }
 0x12a   :  { %4706 = vmatpush1.msk.msra.mxu1 %vm8110_vm13, %v7931_v40  ;;  %v836_v27 = vadd.f32 %v835_v12, %v834_v9  ;;  %v1273_v19 = vadd.f32 %v1272_v63, %v1248_v32  ;;  %v1291_v21 = vadd.f32 %v1290_v6, %v1250_v24  ;;  %v1255_v4 = vmul.f32 %v959_v58, %v8111_v36  ;;  %v8116_v6 = vld [vmem:[#allocation17_spill] sm:$0xff]  ;;  %v1119_v24 = vpop.f32.mrf.mxu0  ;;  %vm8133_vm3 = vmmov %vm8129_vm0 }
 0x12b   :  { %v847_v44 = vmul.f32 %v6713_v57, %v818_v46  ;;  %v1257_v17 = vmul.f32 %v1048_v25, %v8112_v29  ;;  %4676 = vmatmul.mubr.msk.f32.gmra.mxu0 %vm8113_vm15, %v6871_v30  ;;  %4688 = vmatmul.mubr.msk.f32.gmra.mxu1 %vm8114_vm5, %v6871_v30  ;;  %v1256_v3 = vmul.f32 %v961_v45, %v8115_v33  ;;  %v8120_v32 = vld [vmem:[#allocation33_spill] sm:$0xff]  ;;  %v8121_v46 = vld [vmem:[#allocation19_spill] sm:$0xff]  ;;  %v8123_v45 = vld [vmem:[#allocation20_spill] sm:$0xff]  ;;  %v1208_v51 = vpop.f32.mrf.mxu1 }
 0x12c   :  { %v849_v63 = vmul.f32 %v6713_v57, %v836_v27  ;;  %v1265_v9 = vadd.f32 %v1264_v22, %v1255_v4  ;;  %vm8117_vm8 = vnez %v8116_v6  ;;  %vm8119_vm7 = vnez %v8118_v16  ;;  %4065 = vmatprep.mubr.f32.mxu0 %v7946_v13  ;;  %4154 = vmatprep.mubr.f32.mxu1 %v7946_v13  ;;  %vm8134_vm14 = vmmov %vm8129_vm0 }
 0x12d   :  { %4695 = vmatprep.subr.msk.mxu0 %vm8117_vm8, %v7931_v40  ;;  %4707 = vmatprep.subr.msk.mxu1 %vm8119_vm7, %v7931_v40  ;;  %v1258_v12 = vmul.f32 %v1050_v1, %v8120_v32  ;;  %v1283_v58 = vadd.f32 %v1282_v31, %v1257_v17  ;;  %vm8122_vm4 = vnez %v8121_v46  ;;  %vm8124_vm9 = vnez %v8123_v45  ;;  %v1121_v1 = vpop.f32.mrf.mxu0 }
 0x12e   :  { %4696 = vmatpush1.msk.msra.mxu0 %vm8122_vm4, %v7931_v40  ;;  %4708 = vmatpush1.msk.msra.mxu1 %vm8124_vm9, %v7931_v40  ;;  %v1274_v22 = vadd.f32 %v1273_v19, %v1256_v3  ;;  %v6906_v25 = vadd.f32 %v6782_v48, %v6806_v15  ;;  %v6909_v27 = vmul.f32 %v6713_v57, %v809_v52  ;;  %v1266_v31 = vrot.slane %v1265_v9, 4  ;;  %v1210_v52 = vpop.f32.mrf.mxu1 }
 0x12f   :  { %v6912_v4 = vmul.f32 %v6713_v57, %v827_v18  ;;  %v1292_v17 = vadd.f32 %v1291_v21, %v1258_v12  ;;  %v6917_v40 = vadd.f32 %v6782_v48, %v847_v44  ;;  %v6920_v19 = vadd.f32 %v6782_v48, %v849_v63  ;;  %4697 = vmatmul.mubr.msk.f32.vlgmr.msra.gmra.mxu0 %vm8126_vm1, %v6773_v20  ;;  %v1125_v44 = vpop.f32.mrf.mxu0 }
 0x130   :  { %v1284_v15 = vrot.slane %v1283_v58, 4  ;;  %v1275_v3 = vrot.slane %v1274_v22, 4  ;;  %4709 = vmatmul.mubr.msk.f32.vlgmr.msra.gmra.mxu1 %vm8127_vm12, %v6773_v20  ;;  %v1267_v18 = vadd.f32 %v1266_v31, %v1265_v9  ;;  %v1235_v6 = vmul.f32 %v1119_v24, %v6436_v62  ;;  %4071 = vmatprep.mubr.f32.mxu0 %v7946_v13  ;;  %v1214_v57 = vpop.f32.mrf.mxu1 }
 0x131   :  { %8125 = vst [vmem:[#allocation12_spill] sm:$0xff] %v6920_v19  ;;  %v1293_v21 = vrot.slane %v1292_v17, 4  ;;  %v1237_v16 = vmul.f32 %v1208_v51, %v6459_v61  ;;  %4160 = vmatprep.mubr.f32.mxu1 %v7946_v13  ;;  %v1236_v46 = vmul.f32 %v1121_v1, %v6495_v38  ;;  %v1243_v45 = vmul.f32 %v1125_v44, %v6540_v37  ;;  %v1127_v31 = vpop.f32.mrf.mxu0 }
 0x132   :  { %v1285_v63 = vadd.f32 %v1284_v15, %v1283_v58  ;;  %v1276_v12 = vadd.f32 %v1275_v3, %v1274_v22  ;;  %v1268_v20 = vrot.slane %v1267_v18, 2  ;;  %v1238_v9 = vmul.f32 %v1210_v52, %v6535_v53  ;;  %v1216_v22 = vpop.f32.mrf.mxu1 }
 0x133   :  { %v1294_v19 = vadd.f32 %v1293_v21, %v1292_v17  ;;  %v1245_v24 = vmul.f32 %v1214_v57, %v6574_v43  ;;  %v1299_v62 = vadd.f32 %v1243_v45, %v1235_v6  ;;  %4698 = vmatmul.mubr.msk.f32.gmra.mxu0 %vm8128_vm6, %v6803_v49  ;;  %v1244_v58 = vmul.f32 %v1127_v31, %v6579_v41  ;;  %v1131_v57 = vpop.f32.mrf.mxu0 }
 0x134   :  { %v1286_v51 = vrot.slane %v1285_v63, 2  ;;  %v1277_v61 = vrot.slane %v1276_v12, 2  ;;  %4710 = vmatmul.mubr.msk.f32.gmra.mxu1 %vm8129_vm0, %v6803_v49  ;;  %v1269_v1 = vadd.f32 %v1268_v20, %v1267_v18  ;;  %v1246_v3 = vmul.f32 %v1216_v22, %v6619_v54  ;;  %4077 = vmatprep.mubr.f32.mxu0 %v7946_v13  ;;  %v1220_v45 = vpop.f32.mrf.mxu1 }
 0x135   :  { %v1295_v15 = vrot.slane %v1294_v19, 2  ;;  %v1317_v17 = vadd.f32 %v1245_v24, %v1237_v16  ;;  %4166 = vmatprep.mubr.f32.mxu1 %v7946_v13  ;;  %v1308_v6 = vadd.f32 %v1244_v58, %v1236_v46  ;;  %v1251_v44 = vmul.f32 %v1131_v57, %v6624_v2  ;;  %v1133_v20 = vpop.f32.mrf.mxu0 }
 0x136   :  { %v1287_v52 = vadd.f32 %v1286_v51, %v1285_v63  ;;  %v1278_v21 = vadd.f32 %v1277_v61, %v1276_v12  ;;  %v1270_v49 = vrot.slane %v1269_v1, 1  ;;  %v1326_v31 = vadd.f32 %v1246_v3, %v1238_v9  ;;  %v1222_v63 = vpop.f32.mrf.mxu1  ;;  %v6949_v12 = vpop.permute.xlu1 %1336 }
 0x137   :  { %v1296_v53 = vadd.f32 %v1295_v15, %v1294_v19  ;;  %v1253_v18 = vmul.f32 %v1220_v45, %v6635_v7  ;;  %v1300_v22 = vadd.f32 %v1299_v62, %v1251_v44  ;;  %4699 = vmatmul.mubr.msk.f32.gmra.mxu0 %vm8130_vm2, %v6836_v0  ;;  %v1252_v61 = vmul.f32 %v1133_v20, %v6645_v47  ;;  %v1137_v62 = vpop.f32.mrf.mxu0 }
 0x138   :  { %v1288_v16 = vrot.slane %v1287_v52, 1  ;;  %v1279_v24 = vrot.slane %v1278_v21, 1  ;;  %4711 = vmatmul.mubr.msk.f32.gmra.mxu1 %vm8131_vm11, %v6836_v0  ;;  %8132 = vst [vmem:[#allocation13_spill] sm:$0xff] %v6949_v12  ;;  %v1271_v46 = vadd.f32 %v1270_v49, %v1269_v1  ;;  %v1254_v51 = vmul.f32 %v1222_v63, %v6698_v28  ;;  %4083 = vmatprep.mubr.f32.mxu0 %v7946_v13  ;;  %v1226_v57 = vpop.f32.mrf.mxu1 }
 0x139   :  { %v1297_v19 = vrot.slane %v1296_v53, 1  ;;  %v1318_v9 = vadd.f32 %v1317_v17, %v1253_v18  ;;  %4172 = vmatprep.mubr.f32.mxu1 %v7946_v13  ;;  %v1309_v3 = vadd.f32 %v1308_v6, %v1252_v61  ;;  %v1259_v0 = vmul.f32 %v1137_v62, %v6718_v10  ;;  %v1139_v1 = vpop.f32.mrf.mxu0 }
 0x13a   :  { %v1289_v58 = vadd.f32 %v1288_v16, %v1287_v52  ;;  %v1280_v15 = vadd.f32 %v1279_v24, %v1278_v21  ;;  %v1327_v45 = vadd.f32 %v1326_v31, %v1254_v51  ;;  %v1261_v20 = vmul.f32 %v1226_v57, %v6739_v11  ;;  %v1228_v52 = vpop.f32.mrf.mxu1 }
 0x13b   :  { %v1298_v44 = vadd.f32 %v1297_v19, %v1296_v53  ;;  %v1339_v17 = vmul.f32 %v6949_v12, %v1271_v46  ;;  %v1301_v49 = vadd.f32 %v1300_v22, %v1259_v0  ;;  %4700 = vmatmul.mubr.msk.f32.gmra.mxu0 %vm8133_vm3, %v6871_v30  ;;  %v1260_v13 = vmul.f32 %v1139_v1, %v6751_v55  ;;  %v1433_v31 = vpop.f32.mrf.mxu0 }
 0x13c   :  { %4712 = vmatmul.mubr.msk.f32.gmra.mxu1 %vm8134_vm14, %v6871_v30  ;;  %v1340_v21 = vmul.f32 %v6949_v12, %v1280_v15  ;;  %v1319_v6 = vadd.f32 %v1318_v9, %v1261_v20  ;;  %v1262_v53 = vmul.f32 %v1228_v52, %v6761_v35  ;;  %v1341_v18 = vmul.f32 %v6949_v12, %v1289_v58  ;;  %v1522_v30 = vpop.f32.mrf.mxu1 }
 0x13d   :  { %v1342_v16 = vmul.f32 %v6949_v12, %v1298_v44  ;;  %v6968_v24 = vadd.f32 %v6782_v48, %v6909_v27  ;;  %v1302_v22 = vrot.slane %v1301_v49, 4  ;;  %v1310_v61 = vadd.f32 %v1309_v3, %v1260_v13  ;;  %v1435_v51 = vpop.f32.mrf.mxu0 }
 0x13e   :  { %v6971_v63 = vadd.f32 %v1339_v17, %v6809_v50  ;;  %v6975_v46 = vadd.f32 %v6782_v48, %v6912_v4  ;;  %v1320_v19 = vrot.slane %v1319_v6, 4  ;;  %v1328_v9 = vadd.f32 %v1327_v45, %v1262_v53  ;;  %v1524_v0 = vpop.f32.mrf.mxu1  ;;  %v8139_v53 = vld [vmem:[#allocation24_spill] sm:$0xff] }
 0x13f   :  { %v6978_v62 = vadd.f32 %v1340_v21, %v6862_v59  ;;  %v1303_v58 = vadd.f32 %v1302_v22, %v1301_v49  ;;  %v1311_v15 = vrot.slane %v1310_v61, 4  ;;  %v1723_v27 = vmul.f32 %v1433_v31, %v6105_v56  ;;  %v1439_v4 = vpop.f32.mrf.mxu0  ;;  %v8138_v21 = vld [vmem:[#allocation22_spill] sm:$0xff] }
 0x140   :  { %v6982_v3 = vadd.f32 %v1341_v18, %v6875_v34  ;;  %v1321_v50 = vadd.f32 %v1320_v19, %v1319_v6  ;;  %v1329_v57 = vrot.slane %v1328_v9, 4  ;;  %v1725_v44 = vmul.f32 %v1522_v30, %v6123_v8  ;;  %v1528_v49 = vpop.f32.mrf.mxu1 }
 0x141   :  { %8135 = vst [vmem:[#allocation14_spill] sm:$0xff] %v6978_v62  ;;  %v6986_v20 = vadd.f32 %v1342_v16, %v6906_v25  ;;  %v1304_v45 = vrot.slane %v1303_v58, 2  ;;  %v1312_v1 = vadd.f32 %v1311_v15, %v1310_v61  ;;  %v1724_v59 = vmul.f32 %v1435_v51, %v8093_v14  ;;  %v1441_v31 = vpop.f32.mrf.mxu0 }
 0x142   :  { %8136 = vst [vmem:[#allocation15_spill] sm:$0xff] %v6982_v3  ;;  %v1731_v17 = vmul.f32 %v1439_v4, %v8094_v26  ;;  %v1322_v13 = vrot.slane %v1321_v50, 2  ;;  %v1330_v52 = vadd.f32 %v1329_v57, %v1328_v9  ;;  %v1726_v34 = vmul.f32 %v1524_v0, %v8138_v21  ;;  %v1530_v16 = vpop.f32.mrf.mxu1 }
 0x143   :  { %8137 = vst [vmem:[#allocation21_spill] sm:$0xff] %v6986_v20  ;;  %v1733_v6 = vmul.f32 %v1528_v49, %v8139_v53  ;;  %v1305_v18 = vadd.f32 %v1304_v45, %v1303_v58  ;;  %v1313_v22 = vrot.slane %v1312_v1, 2  ;;  %v1732_v25 = vmul.f32 %v1441_v31, %v8099_v60  ;;  %v1445_v4 = vpop.f32.mrf.mxu0 }
 0x144   :  { %v1755_v30 = vadd.f32 %v1731_v17, %v1723_v27  ;;  %v1323_v19 = vadd.f32 %v1322_v13, %v1321_v50  ;;  %v1331_v61 = vrot.slane %v1330_v52, 2  ;;  %v1734_v51 = vmul.f32 %v1530_v16, %v6185_v42  ;;  %v1534_v57 = vpop.f32.mrf.mxu1 }
 0x145   :  { %v1773_v15 = vadd.f32 %v1733_v6, %v1725_v44  ;;  %v1306_v48 = vrot.slane %v1305_v18, 1  ;;  %v1314_v20 = vadd.f32 %v1313_v22, %v1312_v1  ;;  %v1764_v9 = vadd.f32 %v1732_v25, %v1724_v59  ;;  %v1447_v45 = vpop.f32.mrf.mxu0  ;;  %v8140_v1 = vld [vmem:[#allocation29_spill] sm:$0xff] }
 0x146   :  { %v1739_v0 = vmul.f32 %v1445_v4, %v6190_v23  ;;  %v1324_v49 = vrot.slane %v1323_v19, 1  ;;  %v1332_v3 = vadd.f32 %v1331_v61, %v1330_v52  ;;  %v1782_v58 = vadd.f32 %v1734_v51, %v1726_v34  ;;  %v1536_v13 = vpop.f32.mrf.mxu1 }
 0x147   :  { %v1741_v27 = vmul.f32 %v1534_v57, %v6203_v39  ;;  %v1307_v17 = vadd.f32 %v1306_v48, %v1305_v18  ;;  %v1315_v31 = vrot.slane %v1314_v20, 1  ;;  %v1740_v44 = vmul.f32 %v1447_v45, %v6208_v5  ;;  %v1451_v22 = vpop.f32.mrf.mxu0 }
 0x148   :  { %v1756_v50 = vadd.f32 %v1755_v30, %v1739_v0  ;;  %v1325_v6 = vadd.f32 %v1324_v49, %v1323_v19  ;;  %v1333_v16 = vrot.slane %v1332_v3, 1  ;;  %v1742_v59 = vmul.f32 %v1536_v13, %v8140_v1  ;;  %v1540_v61 = vpop.f32.mrf.mxu1  ;;  %v8142_v13 = vld [vmem:[#allocation12_spill] sm:$0xff] }
 0x149   :  { %v1774_v62 = vadd.f32 %v1773_v15, %v1741_v27  ;;  %v1343_v25 = vmul.f32 %v6949_v12, %v1307_v17  ;;  %v1316_v4 = vadd.f32 %v1315_v31, %v1314_v20  ;;  %v1765_v52 = vadd.f32 %v1764_v9, %v1740_v44  ;;  %v1453_v0 = vpop.f32.mrf.mxu0 }
 0x14a   :  { %v1747_v34 = vmul.f32 %v1451_v22, %v8111_v36  ;;  %v1345_v48 = vmul.f32 %v6949_v12, %v1325_v6  ;;  %v1334_v18 = vadd.f32 %v1333_v16, %v1332_v3  ;;  %v1783_v30 = vadd.f32 %v1782_v58, %v1742_v59  ;;  %v1542_v20 = vpop.f32.mrf.mxu1 }
 0x14b   :  { %v1749_v51 = vmul.f32 %v1540_v61, %v8112_v29  ;;  %v7003_v19 = vadd.f32 %v1343_v25, %v6968_v24  ;;  %v1344_v15 = vmul.f32 %v6949_v12, %v1316_v4  ;;  %v1748_v49 = vmul.f32 %v1453_v0, %v8115_v33  ;;  %v1611_v58 = vpop.f32.mrf.mxu0 }
 0x14c   :  { %v1757_v57 = vadd.f32 %v1756_v50, %v1747_v34  ;;  %v7008_v9 = vadd.f32 %v1345_v48, %v6975_v46  ;;  %v1346_v27 = vmul.f32 %v6949_v12, %v1334_v18  ;;  %v1750_v3 = vmul.f32 %v1542_v20, %v8120_v32  ;;  %v1700_v44 = vpop.f32.mrf.mxu1 }
 0x14d   :  { %v1775_v45 = vadd.f32 %v1774_v62, %v1749_v51  ;;  %v7013_v17 = vadd.f32 %v1344_v15, %v6917_v40  ;;  %v1766_v31 = vadd.f32 %v1765_v52, %v1748_v49  ;;  %v1613_v59 = vpop.f32.mrf.mxu0  ;;  %v8144_v15 = vld [vmem:[#allocation34_spill] sm:$0xff] }
 0x14e   :  { %v1758_v24 = vrot.slane %v1757_v57, 4  ;;  %v7016_v50 = vadd.f32 %v1346_v27, %v8142_v13  ;;  %v1784_v16 = vadd.f32 %v1783_v30, %v1750_v3  ;;  %v1702_v25 = vpop.f32.mrf.mxu1  ;;  %v1727_v49 = vmul.f32 %v1611_v58, %v8144_v15 }
 0x14f   :  { %8141 = vst [vmem:[#allocation16_spill] sm:$0xff] %v7013_v17  ;;  %v1776_v6 = vrot.slane %v1775_v45, 4  ;;  %v1767_v22 = vrot.slane %v1766_v31, 4  ;;  %v1617_v34 = vpop.f32.mrf.mxu0  ;;  %v1728_v58 = vmul.f32 %v1613_v59, %v6495_v38 }
 0x150   :  { %8143 = vst [vmem:[#allocation30_spill] sm:$0xff] %v7016_v50  ;;  %v1759_v46 = vadd.f32 %v1758_v24, %v1757_v57  ;;  %v1785_v62 = vrot.slane %v1784_v16, 4  ;;  %v1706_v18 = vpop.f32.mrf.mxu1  ;;  %v1735_v20 = vmul.f32 %v1617_v34, %v6540_v37  ;;  %v8146_v50 = vld [vmem:[#allocation37_spill] sm:$0xff] }
 0x151   :  { %v1777_v4 = vadd.f32 %v1776_v6, %v1775_v45  ;;  %v1768_v48 = vadd.f32 %v1767_v22, %v1766_v31  ;;  %v1619_v0 = vpop.f32.mrf.mxu0  ;;  %v1737_v57 = vmul.f32 %v1706_v18, %v6574_v43  ;;  %v8145_v31 = vld [vmem:[#allocation35_spill] sm:$0xff]  ;;  %v1730_v18 = vmul.f32 %v1702_v25, %v8146_v50 }
 0x152   :  { %v1760_v61 = vrot.slane %v1759_v46, 2  ;;  %v1786_v51 = vadd.f32 %v1785_v62, %v1784_v16  ;;  %v1708_v27 = vpop.f32.mrf.mxu1  ;;  %v1736_v45 = vmul.f32 %v1619_v0, %v6579_v41  ;;  %v1729_v22 = vmul.f32 %v1700_v44, %v8145_v31 }
 0x153   :  { %v1778_v40 = vrot.slane %v1777_v4, 2  ;;  %v1769_v52 = vrot.slane %v1768_v48, 2  ;;  %v1623_v24 = vpop.f32.mrf.mxu0  ;;  %v1738_v34 = vmul.f32 %v1708_v27, %v6619_v54  ;;  %v1791_v17 = vadd.f32 %v1735_v20, %v1727_v49 }
 0x154   :  { %v1761_v30 = vadd.f32 %v1760_v61, %v1759_v46  ;;  %v1787_v3 = vrot.slane %v1786_v51, 2  ;;  %v1743_v16 = vmul.f32 %v1623_v24, %v6624_v2  ;;  %v1712_v62 = vpop.f32.mrf.mxu1  ;;  %v1800_v44 = vadd.f32 %v1736_v45, %v1728_v58 }
 0x155   :  { %v1779_v13 = vadd.f32 %v1778_v40, %v1777_v4  ;;  %v1770_v6 = vadd.f32 %v1769_v52, %v1768_v48  ;;  %v1745_v46 = vmul.f32 %v1712_v62, %v6635_v7  ;;  %v1625_v61 = vpop.f32.mrf.mxu0  ;;  %v1809_v40 = vadd.f32 %v1737_v57, %v1729_v22 }
 0x156   :  { %v1788_v12 = vadd.f32 %v1787_v3, %v1786_v51  ;;  %v1744_v0 = vmul.f32 %v1625_v61, %v6645_v47  ;;  %v1714_v4 = vpop.f32.mrf.mxu1  ;;  %v1762_v48 = vrot.slane %v1761_v30, 1  ;;  %v1792_v59 = vadd.f32 %v1791_v17, %v1743_v16 }
 0x157   :  { %v1746_v52 = vmul.f32 %v1714_v4, %v6698_v28  ;;  %v1629_v24 = vpop.f32.mrf.mxu0  ;;  %v1780_v51 = vrot.slane %v1779_v13, 1  ;;  %v1771_v3 = vrot.slane %v1770_v6, 1  ;;  %v1818_v7 = vadd.f32 %v1738_v34, %v1730_v18 }
 0x158   :  { %v1751_v27 = vmul.f32 %v1629_v24, %v6718_v10  ;;  %v1718_v2 = vpop.f32.mrf.mxu1  ;;  %v1789_v62 = vrot.slane %v1788_v12, 1  ;;  %v1810_v54 = vadd.f32 %v1809_v40, %v1745_v46  ;;  %v1801_v20 = vadd.f32 %v1800_v44, %v1744_v0  ;;  %v7034_v46 = vpop.permute.xlu1 %1828 }
 0x159   :  { %v1753_v25 = vmul.f32 %v1718_v2, %v6739_v11  ;;  %v1631_v49 = vpop.f32.mrf.mxu0  ;;  %v1819_v57 = vadd.f32 %v1818_v7, %v1746_v52  ;;  %v1763_v17 = vadd.f32 %v1762_v48, %v1761_v30  ;;  %v1781_v16 = vadd.f32 %v1780_v51, %v1779_v13  ;;  %8147 = vst [vmem:[#allocation31_spill] sm:$0xff] %v7034_v46 }
 0x15a   :  { %v1793_v61 = vadd.f32 %v1792_v59, %v1751_v27  ;;  %v1720_v47 = vpop.f32.mrf.mxu1  ;;  %v1752_v22 = vmul.f32 %v1631_v49, %v6751_v55  ;;  %v1772_v24 = vadd.f32 %v1771_v3, %v1770_v6  ;;  %v1790_v34 = vadd.f32 %v1789_v62, %v1788_v12 }
 0x15b   :  { %v1811_v45 = vadd.f32 %v1810_v54, %v1753_v25  ;;  %v1754_v58 = vmul.f32 %v1720_v47, %v6761_v35  ;;  %v1925_v4 = vpop.f32.mrf.mxu0  ;;  %v1831_v47 = vmul.f32 %v7034_v46, %v1763_v17  ;;  %v7041_v13 = vmul.f32 %v7034_v46, %v1781_v16 }
 0x15c   :  { %v1794_v10 = vrot.slane %v1793_v61, 4  ;;  %v2014_v28 = vpop.f32.mrf.mxu1  ;;  %v1802_v18 = vadd.f32 %v1801_v20, %v1752_v22  ;;  %v7038_v30 = vmul.f32 %v7034_v46, %v1772_v24  ;;  %v1834_v48 = vmul.f32 %v7034_v46, %v1790_v34 }
 0x15d   :  { %v1812_v2 = vrot.slane %v1811_v45, 4  ;;  %v1820_v0 = vadd.f32 %v1819_v57, %v1754_v58  ;;  %v1927_v40 = vpop.f32.mrf.mxu0  ;;  %v2215_v49 = vmul.f32 %v1925_v4, %v6105_v56  ;;  %v2217_v20 = vmul.f32 %v2014_v28, %v6123_v8 }
 0x15e   :  { %v1795_v44 = vadd.f32 %v1794_v10, %v1793_v61  ;;  %v2016_v7 = vpop.f32.mrf.mxu1  ;;  %v1803_v52 = vrot.slane %v1802_v18, 4  ;;  %v2216_v34 = vmul.f32 %v1927_v40, %v8093_v14 }
 0x15f   :  { %v1813_v54 = vadd.f32 %v1812_v2, %v1811_v45  ;;  %v1821_v59 = vrot.slane %v1820_v0, 4  ;;  %v1931_v27 = vpop.f32.mrf.mxu0 }
 0x160   :  { %v1796_v12 = vrot.slane %v1795_v44, 2  ;;  %v2020_v6 = vpop.f32.mrf.mxu1  ;;  %v1804_v3 = vadd.f32 %v1803_v52, %v1802_v18  ;;  %v2223_v61 = vmul.f32 %v1931_v27, %v8094_v26  ;;  %v2218_v27 = vmul.f32 %v2016_v7, %v8138_v21 }
 0x161   :  { %v1814_v51 = vrot.slane %v1813_v54, 2  ;;  %v1822_v10 = vadd.f32 %v1821_v59, %v1820_v0  ;;  %v1933_v62 = vpop.f32.mrf.mxu0  ;;  %v2225_v17 = vmul.f32 %v2020_v6, %v8139_v53 }
 0x162   :  { %v1797_v25 = vadd.f32 %v1796_v12, %v1795_v44  ;;  %v2022_v57 = vpop.f32.mrf.mxu1  ;;  %v1805_v22 = vrot.slane %v1804_v3, 2  ;;  %v2224_v2 = vmul.f32 %v1933_v62, %v8099_v60  ;;  %v2247_v12 = vadd.f32 %v2223_v61, %v2215_v49 }
 0x163   :  { %v1815_v45 = vadd.f32 %v1814_v51, %v1813_v54  ;;  %v1823_v58 = vrot.slane %v1822_v10, 2  ;;  %v1937_v16 = vpop.f32.mrf.mxu0  ;;  %v2226_v28 = vmul.f32 %v2022_v57, %v6185_v42  ;;  %v2265_v60 = vadd.f32 %v2225_v17, %v2217_v20 }
 0x164   :  { %v1798_v24 = vrot.slane %v1797_v25, 1  ;;  %v2231_v18 = vmul.f32 %v1937_v16, %v6190_v23  ;;  %v2026_v0 = vpop.f32.mrf.mxu1  ;;  %v1806_v44 = vadd.f32 %v1805_v22, %v1804_v3  ;;  %v2256_v23 = vadd.f32 %v2224_v2, %v2216_v34 }
 0x165   :  { %v1816_v4 = vrot.slane %v1815_v45, 1  ;;  %v2233_v52 = vmul.f32 %v2026_v0, %v6203_v39  ;;  %v1939_v54 = vpop.f32.mrf.mxu0  ;;  %v1824_v59 = vadd.f32 %v1823_v58, %v1822_v10  ;;  %v7058_v10 = vadd.f32 %v1831_v47, %v6971_v63 }
 0x166   :  { %v2232_v6 = vmul.f32 %v1939_v54, %v6208_v5  ;;  %v2028_v51 = vpop.f32.mrf.mxu1  ;;  %v1799_v40 = vadd.f32 %v1798_v24, %v1797_v25  ;;  %v1807_v62 = vrot.slane %v1806_v44, 1  ;;  %v2248_v26 = vadd.f32 %v2247_v12, %v2231_v18  ;;  %v8148_v54 = vld [vmem:[#allocation14_spill] sm:$0xff]  ;;  %v8150_v12 = vld [vmem:[#allocation21_spill] sm:$0xff] }
 0x167   :  { %v1817_v53 = vadd.f32 %v1816_v4, %v1815_v45  ;;  %v1943_v16 = vpop.f32.mrf.mxu0  ;;  %v2234_v3 = vmul.f32 %v2028_v51, %v8140_v1  ;;  %v2274_v7 = vadd.f32 %v2226_v28, %v2218_v27  ;;  %v2266_v49 = vadd.f32 %v2265_v60, %v2233_v52 }
 0x168   :  { %v2239_v57 = vmul.f32 %v1943_v16, %v8111_v36  ;;  %v2032_v22 = vpop.f32.mrf.mxu1  ;;  %v1825_v25 = vrot.slane %v1824_v59, 1  ;;  %v2257_v45 = vadd.f32 %v2256_v23, %v2232_v6  ;;  %v1835_v34 = vmul.f32 %v7034_v46, %v1799_v40 }
 0x169   :  { %v2241_v61 = vmul.f32 %v2032_v22, %v8112_v29  ;;  %v1945_v58 = vpop.f32.mrf.mxu0  ;;  %v1837_v2 = vmul.f32 %v7034_v46, %v1817_v53  ;;  %v1808_v18 = vadd.f32 %v1807_v62, %v1806_v44  ;;  %v2275_v63 = vadd.f32 %v2274_v7, %v2234_v3 }
 0x16a   :  { %v2249_v24 = vadd.f32 %v2248_v26, %v2239_v57  ;;  %v2240_v20 = vmul.f32 %v1945_v58, %v8115_v33  ;;  %v2034_v17 = vpop.f32.mrf.mxu1  ;;  %v7067_v23 = vadd.f32 %v7038_v30, %v8148_v54  ;;  %v8149_v26 = vld [vmem:[#allocation15_spill] sm:$0xff]  ;;  %v7074_v6 = vadd.f32 %v1834_v48, %v8150_v12  ;;  %v8152_v12 = vld [vmem:[#allocation41_spill] sm:$0xff] }
 0x16b   :  { %v2267_v0 = vadd.f32 %v2266_v49, %v2241_v61  ;;  %v2103_v4 = vpop.f32.mrf.mxu0  ;;  %v2242_v60 = vmul.f32 %v2034_v17, %v8120_v32  ;;  %v7071_v27 = vadd.f32 %v7041_v13, %v8149_v26  ;;  %v1826_v51 = vadd.f32 %v1825_v25, %v1824_v59 }
 0x16c   :  { %v2250_v47 = vrot.slane %v2249_v24, 4  ;;  %v2258_v28 = vadd.f32 %v2257_v45, %v2240_v20  ;;  %v2192_v52 = vpop.f32.mrf.mxu1  ;;  %v7077_v57 = vadd.f32 %v1835_v34, %v7003_v19  ;;  %v7080_v30 = vadd.f32 %v1837_v2, %v7008_v9 }
 0x16d   :  { %v2268_v53 = vrot.slane %v2267_v0, 4  ;;  %v2105_v44 = vpop.f32.mrf.mxu0  ;;  %v2276_v16 = vadd.f32 %v2275_v63, %v2242_v60  ;;  %v7083_v22 = vmul.f32 %v7034_v46, %v1808_v18  ;;  %v2219_v59 = vmul.f32 %v2103_v4, %v8144_v15 }
 0x16e   :  { %v2251_v40 = vadd.f32 %v2250_v47, %v2249_v24  ;;  %v2259_v62 = vrot.slane %v2258_v28, 4  ;;  %v2194_v3 = vpop.f32.mrf.mxu1  ;;  %v2221_v45 = vmul.f32 %v2192_v52, %v8145_v31  ;;  %v2220_v2 = vmul.f32 %v2105_v44, %v6495_v38  ;;  %v8151_v47 = vld [vmem:[#allocation40_spill] sm:$0xff] }
 0x16f   :  { %v2269_v13 = vadd.f32 %v2268_v53, %v2267_v0  ;;  %v2109_v7 = vpop.f32.mrf.mxu0  ;;  %v2277_v61 = vrot.slane %v2276_v16, 4  ;;  %v2222_v63 = vmul.f32 %v2194_v3, %v8146_v50 }
 0x170   :  { %v2252_v48 = vrot.slane %v2251_v40, 2  ;;  %v2260_v49 = vadd.f32 %v2259_v62, %v2258_v28  ;;  %v2198_v58 = vpop.f32.mrf.mxu1  ;;  %v2227_v19 = vmul.f32 %v2109_v7, %v6540_v37 }
 0x171   :  { %v2270_v25 = vrot.slane %v2269_v13, 2  ;;  %v2229_v24 = vmul.f32 %v2198_v58, %v6574_v43  ;;  %v2111_v9 = vpop.f32.mrf.mxu0  ;;  %v2278_v34 = vadd.f32 %v2277_v61, %v2276_v16 }
 0x172   :  { %v2253_v20 = vadd.f32 %v2252_v48, %v2251_v40  ;;  %v2261_v17 = vrot.slane %v2260_v49, 2  ;;  %v2200_v18 = vpop.f32.mrf.mxu1  ;;  %v2228_v4 = vmul.f32 %v2111_v9, %v6579_v41  ;;  %v2283_v7 = vadd.f32 %v2227_v19, %v2219_v59  ;;  %v8153_v48 = vld [vmem:[#allocation42_spill] sm:$0xff]  ;;  %v8156_v59 = vld [vmem:[#allocation7_spill] sm:$0xff] }
 0x173   :  { %v2271_v0 = vadd.f32 %v2270_v25, %v2269_v13  ;;  %v2230_v28 = vmul.f32 %v2200_v18, %v8151_v47  ;;  %v2115_v60 = vpop.f32.mrf.mxu0  ;;  %v2279_v26 = vrot.slane %v2278_v34, 2  ;;  %v2301_v16 = vadd.f32 %v2229_v24, %v2221_v45  ;;  %v8154_v47 = vld [vmem:[#allocation43_spill] sm:$0xff] }
 0x174   :  { %v2254_v52 = vrot.slane %v2253_v20, 1  ;;  %v2262_v54 = vadd.f32 %v2261_v17, %v2260_v49  ;;  %v2235_v53 = vmul.f32 %v2115_v60, %v8152_v12  ;;  %v2204_v62 = vpop.f32.mrf.mxu1  ;;  %v2292_v3 = vadd.f32 %v2228_v4, %v2220_v2  ;;  %v8155_v49 = vld [vmem:[#allocation5_spill] sm:$0xff] }
 0x175   :  { %v2272_v40 = vrot.slane %v2271_v0, 1  ;;  %v2237_v44 = vmul.f32 %v2204_v62, %v8153_v48  ;;  %v2117_v61 = vpop.f32.mrf.mxu0  ;;  %v2280_v58 = vadd.f32 %v2279_v26, %v2278_v34  ;;  %v2310_v25 = vadd.f32 %v2230_v28, %v2222_v63  ;;  %v7102_v28 = vpop.permute.xlu0 %2320 }
 0x176   :  { %v2263_v13 = vrot.slane %v2262_v54, 1  ;;  %v2206_v9 = vpop.f32.mrf.mxu1  ;;  %v2255_v41 = vadd.f32 %v2254_v52, %v2253_v20  ;;  %v2236_v50 = vmul.f32 %v2117_v61, %v8154_v47  ;;  %v2284_v43 = vadd.f32 %v2283_v7, %v2235_v53  ;;  %8157 = vst [vmem:[#allocation32_spill] sm:$0xff] %v7102_v28 }
 0x177   :  { %v2273_v18 = vadd.f32 %v2272_v40, %v2271_v0  ;;  %v2238_v17 = vmul.f32 %v2206_v9, %v8155_v49  ;;  %v2121_v38 = vpop.f32.mrf.mxu0  ;;  %v2281_v12 = vrot.slane %v2280_v58, 1  ;;  %v7099_v24 = vmul.f32 %v7034_v46, %v1826_v51 }
 0x178   :  { %v2264_v60 = vadd.f32 %v2263_v13, %v2262_v54  ;;  %v2243_v45 = vmul.f32 %v2121_v38, %v8156_v59  ;;  %v2210_v19 = vpop.f32.mrf.mxu1  ;;  %v2302_v34 = vadd.f32 %v2301_v16, %v2237_v44  ;;  %v2293_v2 = vadd.f32 %v2292_v3, %v2236_v50 }
 0x179   :  { %v2245_v63 = vmul.f32 %v2210_v19, %v6739_v11  ;;  %v2123_v20 = vpop.f32.mrf.mxu0  ;;  %v2282_v0 = vadd.f32 %v2281_v12, %v2280_v58  ;;  %v2311_v4 = vadd.f32 %v2310_v25, %v2238_v17  ;;  %v2323_v53 = vmul.f32 %v7102_v28, %v2255_v41 }
 0x17a   :  { %v2285_v52 = vadd.f32 %v2284_v43, %v2243_v45  ;;  %v2244_v54 = vmul.f32 %v2123_v20, %v6751_v55  ;;  %v2212_v26 = vpop.f32.mrf.mxu1  ;;  %v2324_v38 = vmul.f32 %v7102_v28, %v2264_v60  ;;  %v2325_v51 = vmul.f32 %v7102_v28, %v2273_v18  ;;  %v8158_v60 = vld [vmem:[#allocation16_spill] sm:$0xff] }
 0x17b   :  { %v2303_v62 = vadd.f32 %v2302_v34, %v2245_v63  ;;  %v2425_v40 = vpop.f32.mrf.mxu0  ;;  %v2326_v50 = vmul.f32 %v7102_v28, %v2282_v0  ;;  %v2246_v12 = vmul.f32 %v2212_v26, %v6761_v35  ;;  %v2331_v43 = vadd.f32 %v2323_v53, %v7058_v10 }
 0x17c   :  { %v2286_v7 = vrot.slane %v2285_v52, 4  ;;  %v2294_v16 = vadd.f32 %v2293_v2, %v2244_v54  ;;  %v2514_v44 = vpop.f32.mrf.mxu1  ;;  %v2332_v61 = vadd.f32 %v2324_v38, %v7067_v23  ;;  %v2333_v13 = vadd.f32 %v2325_v51, %v7071_v27  ;;  %v8160_v54 = vld [vmem:[#allocation24_spill] sm:$0xff] }
 0x17d   :  { %v2304_v41 = vrot.slane %v2303_v62, 4  ;;  %v2427_v58 = vpop.f32.mrf.mxu0  ;;  %v2334_v3 = vadd.f32 %v2326_v50, %v7074_v6  ;;  %v2312_v18 = vadd.f32 %v2311_v4, %v2246_v12  ;;  %v7116_v45 = vadd.f32 %v7083_v22, %v8158_v60  ;;  %2339 = vst [vmem:[%s7430_s3] sm:$0xff] %v2331_v43  ;;  %v8159_v4 = vld [vmem:[#allocation23_spill] sm:$0xff] }
 0x17e   :  { %v2287_v25 = vadd.f32 %v2286_v7, %v2285_v52  ;;  %v2295_v9 = vrot.slane %v2294_v16, 4  ;;  %v2516_v17 = vpop.f32.mrf.mxu1  ;;  %2340 = vst [vmem:[%s7430_s3 + $0x8] sm:$0xff] %v2332_v61  ;;  %2341 = vst [vmem:[%s7430_s3 + $0x10] sm:$0xff] %v2333_v13  ;;  %v2715_v23 = vmul.f32 %v2425_v40, %v6105_v56  ;;  %v2717_v27 = vmul.f32 %v2514_v44, %v6123_v8  ;;  %v8161_v40 = vld [vmem:[#allocation25_spill] sm:$0xff] }
 0x17f   :  { %v2305_v10 = vadd.f32 %v2304_v41, %v2303_v62  ;;  %v2431_v6 = vpop.f32.mrf.mxu0  ;;  %2342 = vst [vmem:[%s7430_s3 + $0x18] sm:$0xff] %v2334_v3  ;;  %v2313_v34 = vrot.slane %v2312_v18, 4  ;;  %v2716_v2 = vmul.f32 %v2427_v58, %v8093_v14  ;;  %v2718_v0 = vmul.f32 %v2516_v17, %v8138_v21 }
 0x180   :  { %v2288_v22 = vrot.slane %v2287_v25, 2  ;;  %v2296_v19 = vadd.f32 %v2295_v9, %v2294_v16  ;;  %v2520_v63 = vpop.f32.mrf.mxu1  ;;  %v2723_v52 = vmul.f32 %v2431_v6, %v8159_v4  ;;  %v8162_v6 = vld [vmem:[#allocation26_spill] sm:$0xff] }
 0x181   :  { %v2306_v20 = vrot.slane %v2305_v10, 2  ;;  %v2725_v26 = vmul.f32 %v2520_v63, %v8160_v54  ;;  %v2433_v53 = vpop.f32.mrf.mxu0  ;;  %v2314_v62 = vadd.f32 %v2313_v34, %v2312_v18 }
 0x182   :  { %v2289_v38 = vadd.f32 %v2288_v22, %v2287_v25  ;;  %v2297_v51 = vrot.slane %v2296_v19, 2  ;;  %v2724_v50 = vmul.f32 %v2433_v53, %v8161_v40  ;;  %v2522_v7 = vpop.f32.mrf.mxu1  ;;  %v2747_v16 = vadd.f32 %v2723_v52, %v2715_v23 }
 0x183   :  { %v2307_v12 = vadd.f32 %v2306_v20, %v2305_v10  ;;  %v2765_v44 = vadd.f32 %v2725_v26, %v2717_v27  ;;  %v2726_v43 = vmul.f32 %v2522_v7, %v6185_v42  ;;  %v2437_v61 = vpop.f32.mrf.mxu0  ;;  %v2315_v58 = vrot.slane %v2314_v62, 2 }
 0x184   :  { %v2290_v13 = vrot.slane %v2289_v38, 1  ;;  %v2298_v41 = vadd.f32 %v2297_v51, %v2296_v19  ;;  %v2756_v3 = vadd.f32 %v2724_v50, %v2716_v2  ;;  %v2526_v9 = vpop.f32.mrf.mxu1  ;;  %v2731_v25 = vmul.f32 %v2437_v61, %v8162_v6 }
 0x185   :  { %v2308_v17 = vrot.slane %v2307_v12, 1  ;;  %v2774_v60 = vadd.f32 %v2726_v43, %v2718_v0  ;;  %v2733_v18 = vmul.f32 %v2526_v9, %v6203_v39  ;;  %v2439_v22 = vpop.f32.mrf.mxu0  ;;  %v2316_v10 = vadd.f32 %v2315_v58, %v2314_v62 }
 0x186   :  { %v2291_v34 = vadd.f32 %v2290_v13, %v2289_v38  ;;  %v2299_v63 = vrot.slane %v2298_v41, 1  ;;  %v2732_v23 = vmul.f32 %v2439_v22, %v6208_v5  ;;  %v2528_v27 = vpop.f32.mrf.mxu1  ;;  %v2748_v52 = vadd.f32 %v2747_v16, %v2731_v25 }
 0x187   :  { %v2309_v20 = vadd.f32 %v2308_v17, %v2307_v12  ;;  %v2766_v26 = vadd.f32 %v2765_v44, %v2733_v18  ;;  %v2734_v19 = vmul.f32 %v2528_v27, %v8140_v1  ;;  %v2443_v2 = vpop.f32.mrf.mxu0  ;;  %v2317_v51 = vrot.slane %v2316_v10, 1  ;;  %v8163_v18 = vld [vmem:[#allocation30_spill] sm:$0xff] }
 0x188   :  { %v2327_v53 = vmul.f32 %v7102_v28, %v2291_v34  ;;  %v2300_v0 = vadd.f32 %v2299_v63, %v2298_v41  ;;  %v2757_v50 = vadd.f32 %v2756_v3, %v2732_v23  ;;  %v2532_v7 = vpop.f32.mrf.mxu1  ;;  %v2739_v62 = vmul.f32 %v2443_v2, %v8111_v36 }
 0x189   :  { %v2329_v43 = vmul.f32 %v7102_v28, %v2309_v20  ;;  %v2775_v38 = vadd.f32 %v2774_v60, %v2734_v19  ;;  %v2741_v61 = vmul.f32 %v2532_v7, %v8112_v29  ;;  %v2445_v13 = vpop.f32.mrf.mxu0  ;;  %v2318_v44 = vadd.f32 %v2317_v51, %v2316_v10 }
 0x18a   :  { %v2335_v12 = vadd.f32 %v2327_v53, %v7077_v57  ;;  %v2328_v16 = vmul.f32 %v7102_v28, %v2300_v0  ;;  %v2740_v58 = vmul.f32 %v2445_v13, %v8115_v33  ;;  %v2534_v9 = vpop.f32.mrf.mxu1  ;;  %v2749_v3 = vadd.f32 %v2748_v52, %v2739_v62 }
 0x18b   :  { %v2337_v41 = vadd.f32 %v2329_v43, %v7080_v30  ;;  %v2767_v17 = vadd.f32 %v2766_v26, %v2741_v61  ;;  %v2742_v25 = vmul.f32 %v2534_v9, %v8120_v32  ;;  %v2603_v60 = vpop.f32.mrf.mxu0  ;;  %v1846_v22 = vadd.f32 %v7099_v24, %v8163_v18  ;;  %v8164_v61 = vld [vmem:[#allocation38_spill] sm:$0xff] }
 0x18c   :  { %2343 = vst [vmem:[%s7430_s3 + $0x20] sm:$0xff] %v2335_v12  ;;  %v2336_v57 = vadd.f32 %v2328_v16, %v7116_v45  ;;  %v2330_v34 = vmul.f32 %v7102_v28, %v2318_v44  ;;  %v2758_v63 = vadd.f32 %v2757_v50, %v2740_v58  ;;  %v2692_v10 = vpop.f32.mrf.mxu1  ;;  %v2750_v30 = vrot.slane %v2749_v3, 4  ;;  %v8165_v16 = vld [vmem:[#allocation36_spill] sm:$0xff]  ;;  %v8166_v58 = vld [vmem:[#allocation37_spill] sm:$0xff] }
 0x18d   :  { %2345 = vst [vmem:[%s7430_s3 + $0x30] sm:$0xff] %v2337_v41  ;;  %v2768_v23 = vrot.slane %v2767_v17, 4  ;;  %v2776_v27 = vadd.f32 %v2775_v38, %v2742_v25  ;;  %v2605_v20 = vpop.f32.mrf.mxu0  ;;  %v2719_v51 = vmul.f32 %v2603_v60, %v8144_v15  ;;  %v2721_v62 = vmul.f32 %v2692_v10, %v8145_v31 }
 0x18e   :  { %2344 = vst [vmem:[%s7430_s3 + $0x28] sm:$0xff] %v2336_v57  ;;  %v2338_v24 = vadd.f32 %v2330_v34, %v1846_v22  ;;  %v2759_v52 = vrot.slane %v2758_v63, 4  ;;  %v2694_v26 = vpop.f32.mrf.mxu1  ;;  %v2751_v45 = vadd.f32 %v2750_v30, %v2749_v3  ;;  %v2720_v44 = vmul.f32 %v2605_v20, %v8165_v16  ;;  %v8167_v3 = vld [vmem:[#allocation39_spill] sm:$0xff] }
 0x18f   :  { %v2769_v19 = vadd.f32 %v2768_v23, %v2767_v17  ;;  %v2777_v2 = vrot.slane %v2776_v27, 4  ;;  %v2609_v53 = vpop.f32.mrf.mxu0  ;;  %v2722_v9 = vmul.f32 %v2694_v26, %v8166_v58  ;;  %v8168_v23 = vld [vmem:[#allocation40_spill] sm:$0xff] }
 0x190   :  { %2346 = vst [vmem:[%s7430_s3 + $0x38] sm:$0xff] %v2338_v24  ;;  %v2760_v0 = vadd.f32 %v2759_v52, %v2758_v63  ;;  %v2727_v50 = vmul.f32 %v2609_v53, %v6540_v37  ;;  %v2698_v7 = vpop.f32.mrf.mxu1  ;;  %v2752_v43 = vrot.slane %v2751_v45, 2 }
 0x191   :  { %v2778_v38 = vadd.f32 %v2777_v2, %v2776_v27  ;;  %v2729_v13 = vmul.f32 %v2698_v7, %v8164_v61  ;;  %v2611_v12 = vpop.f32.mrf.mxu0  ;;  %v2770_v60 = vrot.slane %v2769_v19, 2  ;;  %v8169_v27 = vld [vmem:[#allocation41_spill] sm:$0xff] }
 0x192   :  { %v2783_v41 = vadd.f32 %v2727_v50, %v2719_v51  ;;  %v2728_v17 = vmul.f32 %v2611_v12, %v8167_v3  ;;  %v2700_v25 = vpop.f32.mrf.mxu1  ;;  %v2753_v18 = vadd.f32 %v2752_v43, %v2751_v45  ;;  %v2761_v22 = vrot.slane %v2760_v0, 2 }
 0x193   :  { %v2801_v57 = vadd.f32 %v2729_v13, %v2721_v62  ;;  %v2615_v34 = vpop.f32.mrf.mxu0  ;;  %v2779_v63 = vrot.slane %v2778_v38, 2  ;;  %v2730_v10 = vmul.f32 %v2700_v25, %v8168_v23  ;;  %v2771_v7 = vadd.f32 %v2770_v60, %v2769_v19 }
 0x194   :  { %v2792_v30 = vadd.f32 %v2728_v17, %v2720_v44  ;;  %v2735_v24 = vmul.f32 %v2615_v34, %v8169_v27  ;;  %v2704_v52 = vpop.f32.mrf.mxu1  ;;  %v2754_v45 = vrot.slane %v2753_v18, 1  ;;  %v2762_v43 = vadd.f32 %v2761_v22, %v2760_v0 }
 0x195   :  { %v2737_v20 = vmul.f32 %v2704_v52, %v8153_v48  ;;  %v2617_v2 = vpop.f32.mrf.mxu0  ;;  %v2810_v26 = vadd.f32 %v2730_v10, %v2722_v9  ;;  %v2780_v12 = vadd.f32 %v2779_v63, %v2778_v38  ;;  %v2772_v19 = vrot.slane %v2771_v7, 1 }
 0x196   :  { %v2784_v53 = vadd.f32 %v2783_v41, %v2735_v24  ;;  %v2736_v51 = vmul.f32 %v2617_v2, %v8154_v47  ;;  %v2706_v50 = vpop.f32.mrf.mxu1  ;;  %v2755_v2 = vadd.f32 %v2754_v45, %v2753_v18  ;;  %v2763_v0 = vrot.slane %v2762_v43, 1 }
 0x197   :  { %v2802_v62 = vadd.f32 %v2801_v57, %v2737_v20  ;;  %v2621_v13 = vpop.f32.mrf.mxu0  ;;  %v2738_v17 = vmul.f32 %v2706_v50, %v8155_v49  ;;  %v2781_v22 = vrot.slane %v2780_v12, 1 }
 0x198   :  { %v2793_v44 = vadd.f32 %v2792_v30, %v2736_v51  ;;  %v2743_v25 = vmul.f32 %v2621_v13, %v8156_v59  ;;  %v2710_v34 = vpop.f32.mrf.mxu1  ;;  %v2764_v18 = vadd.f32 %v2763_v0, %v2762_v43 }
 0x199   :  { %v2745_v52 = vmul.f32 %v2710_v34, %v6739_v11  ;;  %v2623_v28 = vpop.f32.mrf.mxu0  ;;  %v2811_v9 = vadd.f32 %v2810_v26, %v2738_v17  ;;  %v8170_v17 = vld [vmem:[#allocation6_spill] sm:$0xff]  ;;  %v2782_v46 = vadd.f32 %v2781_v22, %v2780_v12 }
 0x19a   :  { %v2785_v41 = vadd.f32 %v2784_v53, %v2743_v25  ;;  %v2744_v10 = vmul.f32 %v2623_v28, %v6751_v55  ;;  %v2712_v24 = vpop.f32.mrf.mxu1  ;;  %v2819_v28 = vmul.f32 %v2755_v2, %v8170_v17  ;;  %v2773_v25 = vadd.f32 %v2772_v19, %v2771_v7 }
 0x19b   :  { %v2803_v60 = vadd.f32 %v2802_v62, %v2745_v52  ;;  %v2746_v63 = vmul.f32 %v2712_v24, %v6761_v35  ;;  %v2913_v30 = vpop.f32.mrf.mxu0 }
 0x19c   :  { %v2786_v38 = vrot.slane %v2785_v41, 4  ;;  %v2794_v57 = vadd.f32 %v2793_v44, %v2744_v10  ;;  %v3002_v20 = vpop.f32.mrf.mxu1  ;;  %v3203_v24 = vmul.f32 %v2913_v30, %v6105_v56 }
 0x19d   :  { %v2804_v51 = vrot.slane %v2803_v60, 4  ;;  %v2812_v34 = vadd.f32 %v2811_v9, %v2746_v63  ;;  %v2915_v26 = vpop.f32.mrf.mxu0  ;;  %v3205_v35 = vmul.f32 %v3002_v20, %v6123_v8 }
 0x19e   :  { %v2787_v50 = vadd.f32 %v2786_v38, %v2785_v41  ;;  %v2795_v13 = vrot.slane %v2794_v57, 4  ;;  %v3004_v53 = vpop.f32.mrf.mxu1  ;;  %v3204_v12 = vmul.f32 %v2915_v26, %v8093_v14 }
 0x19f   :  { %v2805_v45 = vadd.f32 %v2804_v51, %v2803_v60  ;;  %v2813_v55 = vrot.slane %v2812_v34, 4  ;;  %v2919_v44 = vpop.f32.mrf.mxu0  ;;  %v3206_v30 = vmul.f32 %v3004_v53, %v8138_v21  ;;  %v8171_v53 = vld [vmem:[#allocation11_spill] sm:$0xff] }
 0x1a0   :  { %v2788_v62 = vrot.slane %v2787_v50, 2  ;;  %v2796_v52 = vadd.f32 %v2795_v13, %v2794_v57  ;;  %v3211_v41 = vmul.f32 %v2919_v44, %v8159_v4  ;;  %v3008_v9 = vpop.f32.mrf.mxu1 }
 0x1a1   :  { %v2806_v10 = vrot.slane %v2805_v45, 2  ;;  %v2814_v11 = vadd.f32 %v2813_v55, %v2812_v34  ;;  %v3213_v7 = vmul.f32 %v3008_v9, %v8160_v54  ;;  %v2921_v43 = vpop.f32.mrf.mxu0 }
 0x1a2   :  { %v2789_v38 = vadd.f32 %v2788_v62, %v2787_v50  ;;  %v2797_v63 = vrot.slane %v2796_v52, 2  ;;  %v3235_v19 = vadd.f32 %v3211_v41, %v3203_v24  ;;  %v3212_v0 = vmul.f32 %v2921_v43, %v8161_v40  ;;  %v3010_v60 = vpop.f32.mrf.mxu1 }
 0x1a3   :  { %v2807_v2 = vadd.f32 %v2806_v10, %v2805_v45  ;;  %v2815_v57 = vrot.slane %v2814_v11, 2  ;;  %v3253_v20 = vadd.f32 %v3213_v7, %v3205_v35  ;;  %v2925_v51 = vpop.f32.mrf.mxu0  ;;  %v3214_v55 = vmul.f32 %v3010_v60, %v6185_v42 }
 0x1a4   :  { %v2798_v22 = vadd.f32 %v2797_v63, %v2796_v52  ;;  %v2790_v13 = vrot.slane %v2789_v38, 1  ;;  %v3244_v50 = vadd.f32 %v3212_v0, %v3204_v12  ;;  %v3219_v34 = vmul.f32 %v2925_v51, %v8162_v6  ;;  %v3014_v62 = vpop.f32.mrf.mxu1 }
 0x1a5   :  { %v2808_v45 = vrot.slane %v2807_v2, 1  ;;  %v3221_v26 = vmul.f32 %v3014_v62, %v6203_v39  ;;  %v2927_v10 = vpop.f32.mrf.mxu0  ;;  %v2816_v24 = vadd.f32 %v2815_v57, %v2814_v11  ;;  %v3262_v41 = vadd.f32 %v3214_v55, %v3206_v30 }
 0x1a6   :  { %v2799_v44 = vrot.slane %v2798_v22, 1  ;;  %v3220_v52 = vmul.f32 %v2927_v10, %v6208_v5  ;;  %v3016_v9 = vpop.f32.mrf.mxu1  ;;  %v7196_v35 = vadd.f32 %v2819_v28, %v8171_v53  ;;  %v2821_v63 = vmul.f32 %v2773_v25, %v8170_v17 }
 0x1a7   :  { %v2820_v7 = vmul.f32 %v2764_v18, %v8170_v17  ;;  %v2822_v43 = vmul.f32 %v2782_v46, %v8170_v17  ;;  %v2931_v12 = vpop.f32.mrf.mxu0  ;;  %v2791_v0 = vadd.f32 %v2790_v13, %v2789_v38  ;;  %v3236_v60 = vadd.f32 %v3235_v19, %v3219_v34 }
 0x1a8   :  { %v3222_v51 = vmul.f32 %v3016_v9, %v8140_v1  ;;  %v3227_v11 = vmul.f32 %v2931_v12, %v8111_v36  ;;  %v3020_v57 = vpop.f32.mrf.mxu1  ;;  %v2809_v30 = vadd.f32 %v2808_v45, %v2807_v2  ;;  %v2800_v55 = vadd.f32 %v2799_v44, %v2798_v22 }
 0x1a9   :  { %v3254_v62 = vadd.f32 %v3253_v20, %v3221_v26  ;;  %v3229_v28 = vmul.f32 %v3020_v57, %v8112_v29  ;;  %v2933_v10 = vpop.f32.mrf.mxu0  ;;  %v2817_v5 = vrot.slane %v2816_v24, 1  ;;  %v3245_v25 = vadd.f32 %v3244_v50, %v3220_v52 }
 0x1aa   :  { %v3237_v39 = vadd.f32 %v3236_v60, %v3227_v11  ;;  %v3228_v18 = vmul.f32 %v2933_v10, %v8115_v33  ;;  %v3022_v46 = vpop.f32.mrf.mxu1  ;;  %v7206_v38 = vadd.f32 %v2821_v63, %v8171_v53  ;;  %v3263_v19 = vadd.f32 %v3262_v41, %v3222_v51 }
 0x1ab   :  { %v3255_v13 = vadd.f32 %v3254_v62, %v3229_v28  ;;  %v3230_v34 = vmul.f32 %v3022_v46, %v8120_v32  ;;  %v3091_v9 = vpop.f32.mrf.mxu0  ;;  %v7210_v2 = vadd.f32 %v2820_v7, %v8171_v53  ;;  %v7213_v22 = vadd.f32 %v2822_v43, %v8171_v53 }
 0x1ac   :  { %v3238_v20 = vrot.slane %v3237_v39, 4  ;;  %v3246_v50 = vadd.f32 %v3245_v25, %v3228_v18  ;;  %v3180_v45 = vpop.f32.mrf.mxu1  ;;  %v7216_v44 = vmul.f32 %v2791_v0, %v8170_v17  ;;  %v7219_v26 = vmul.f32 %v2809_v30, %v8170_v17 }
 0x1ad   :  { %v3256_v41 = vrot.slane %v3255_v13, 4  ;;  %v3264_v52 = vadd.f32 %v3263_v19, %v3230_v34  ;;  %v3093_v63 = vpop.f32.mrf.mxu0  ;;  %v7222_v12 = vmul.f32 %v2800_v55, %v8170_v17  ;;  %v7224_v7 = vadd.f32 %v2817_v5, %v2816_v24 }
 0x1ae   :  { %v3239_v60 = vadd.f32 %v3238_v20, %v3237_v39  ;;  %v3247_v43 = vrot.slane %v3246_v50, 4  ;;  %v3182_v51 = vpop.f32.mrf.mxu1  ;;  %v3207_v62 = vmul.f32 %v3091_v9, %v8144_v15  ;;  %v3209_v0 = vmul.f32 %v3180_v45, %v8145_v31 }
 0x1af   :  { %v3257_v11 = vadd.f32 %v3256_v41, %v3255_v13  ;;  %v3265_v57 = vrot.slane %v3264_v52, 4  ;;  %v3097_v28 = vpop.f32.mrf.mxu0  ;;  %v3208_v25 = vmul.f32 %v3093_v63, %v8165_v16  ;;  %v3210_v39 = vmul.f32 %v3182_v51, %v8166_v58 }
 0x1b0   :  { %v3240_v30 = vrot.slane %v3239_v60, 2  ;;  %v3248_v10 = vadd.f32 %v3247_v43, %v3246_v50  ;;  %v3215_v18 = vmul.f32 %v3097_v28, %v6540_v37  ;;  %v3186_v55 = vpop.f32.mrf.mxu1 }
 0x1b1   :  { %v3258_v46 = vrot.slane %v3257_v11, 2  ;;  %v3266_v5 = vadd.f32 %v3265_v57, %v3264_v52  ;;  %v3217_v24 = vmul.f32 %v3186_v55, %v8164_v61  ;;  %v3099_v19 = vpop.f32.mrf.mxu0 }
 0x1b2   :  { %v3241_v13 = vadd.f32 %v3240_v30, %v3239_v60  ;;  %v3249_v34 = vrot.slane %v3248_v10, 2  ;;  %v3271_v9 = vadd.f32 %v3215_v18, %v3207_v62  ;;  %v3216_v20 = vmul.f32 %v3099_v19, %v8167_v3  ;;  %v3188_v45 = vpop.f32.mrf.mxu1 }
 0x1b3   :  { %v3259_v41 = vadd.f32 %v3258_v46, %v3257_v11  ;;  %v3267_v50 = vrot.slane %v3266_v5, 2  ;;  %v3289_v43 = vadd.f32 %v3217_v24, %v3209_v0  ;;  %v3218_v63 = vmul.f32 %v3188_v45, %v8168_v23  ;;  %v3103_v28 = vpop.f32.mrf.mxu0 }
 0x1b4   :  { %v3242_v16 = vrot.slane %v3241_v13, 1  ;;  %v3250_v31 = vadd.f32 %v3249_v34, %v3248_v10  ;;  %v3280_v52 = vadd.f32 %v3216_v20, %v3208_v25  ;;  %v3223_v51 = vmul.f32 %v3103_v28, %v8169_v27  ;;  %v3192_v57 = vpop.f32.mrf.mxu1  ;;  %v8172_v34 = vld [vmem:[#allocation13_spill] sm:$0xff] }
 0x1b5   :  { %v3260_v55 = vrot.slane %v3259_v41, 1  ;;  %v3268_v58 = vadd.f32 %v3267_v50, %v3266_v5  ;;  %v3298_v60 = vadd.f32 %v3218_v63, %v3210_v39  ;;  %v3225_v62 = vmul.f32 %v3192_v57, %v8153_v48  ;;  %v3105_v30 = vpop.f32.mrf.mxu0  ;;  %v8173_v63 = vld [vmem:[#allocation8_spill] sm:$0xff] }
 0x1b6   :  { %v3243_v18 = vadd.f32 %v3242_v16, %v3241_v13  ;;  %v3251_v19 = vrot.slane %v3250_v31, 1  ;;  %v3272_v11 = vadd.f32 %v3271_v9, %v3223_v51  ;;  %v3224_v0 = vmul.f32 %v3105_v30, %v8154_v47  ;;  %v3194_v46 = vpop.f32.mrf.mxu1 }
 0x1b7   :  { %v3261_v24 = vadd.f32 %v3260_v55, %v3259_v41  ;;  %v3269_v45 = vrot.slane %v3268_v58, 1  ;;  %v3290_v23 = vadd.f32 %v3289_v43, %v3225_v62  ;;  %v3226_v10 = vmul.f32 %v3194_v46, %v8155_v49  ;;  %v3109_v25 = vpop.f32.mrf.mxu0  ;;  %v8174_v62 = vld [vmem:[#allocation9_spill] sm:$0xff] }
 0x1b8   :  { %v3307_v20 = vmul.f32 %v3243_v18, %v8172_v34  ;;  %v3252_v28 = vadd.f32 %v3251_v19, %v3250_v31  ;;  %v3281_v5 = vadd.f32 %v3280_v52, %v3224_v0  ;;  %v3231_v39 = vmul.f32 %v3109_v25, %v8156_v59  ;;  %v3198_v50 = vpop.f32.mrf.mxu1 }
 0x1b9   :  { %v3309_v16 = vmul.f32 %v3261_v24, %v8172_v34  ;;  %v3270_v13 = vadd.f32 %v3269_v45, %v3268_v58  ;;  %v3299_v9 = vadd.f32 %v3298_v60, %v3226_v10  ;;  %v3233_v51 = vmul.f32 %v3198_v50, %v8173_v63  ;;  %v3111_v57 = vpop.f32.mrf.mxu0  ;;  %v8176_v58 = vld [vmem:[#allocation10_spill] sm:$0xff] }
 0x1ba   :  { %v7243_v41 = vadd.f32 %v3307_v20, %v7196_v35  ;;  %v3308_v43 = vmul.f32 %v3252_v28, %v8172_v34  ;;  %v3273_v55 = vadd.f32 %v3272_v11, %v3231_v39  ;;  %v3232_v30 = vmul.f32 %v3111_v57, %v8174_v62  ;;  %v3200_v31 = vpop.f32.mrf.mxu1 }
 0x1bb   :  { %v7248_v52 = vadd.f32 %v3309_v16, %v7206_v38  ;;  %v3310_v18 = vmul.f32 %v3270_v13, %v8172_v34  ;;  %v3291_v19 = vadd.f32 %v3290_v23, %v3233_v51  ;;  %v3234_v60 = vmul.f32 %v3200_v31, %v8176_v58  ;;  %v3401_v11 = vpop.f32.mrf.mxu0 }
 0x1bc   :  { %v2826_v0 = vmul.f32 %v7224_v7, %v8170_v17  ;;  %v7255_v35 = vadd.f32 %v3308_v43, %v7210_v2  ;;  %v3274_v46 = vrot.slane %v3273_v55, 4  ;;  %v3282_v24 = vadd.f32 %v3281_v5, %v3232_v30  ;;  %v3490_v45 = vpop.f32.mrf.mxu1 }
 0x1bd   :  { %8175 = vst [vmem:[#allocation17_spill] sm:$0xff] %v7248_v52  ;;  %v7258_v10 = vadd.f32 %v3310_v18, %v7213_v22  ;;  %v3292_v38 = vrot.slane %v3291_v19, 4  ;;  %v3300_v25 = vadd.f32 %v3299_v9, %v3234_v60  ;;  %v2831_v23 = vadd.f32 %v7216_v44, %v8171_v53  ;;  %v3403_v39 = vpop.f32.mrf.mxu0 }
 0x1be   :  { %8177 = vst [vmem:[#allocation18_spill] sm:$0xff] %v7255_v35  ;;  %v3275_v20 = vadd.f32 %v3274_v46, %v3273_v55  ;;  %v3283_v28 = vrot.slane %v3282_v24, 4  ;;  %v3492_v50 = vpop.f32.mrf.mxu1  ;;  %v2833_v17 = vadd.f32 %v7219_v26, %v8171_v53  ;;  %v7266_v2 = vadd.f32 %v7222_v12, %v8171_v53 }
 0x1bf   :  { %8178 = vst [vmem:[#allocation33_spill] sm:$0xff] %v7258_v10  ;;  %v3293_v7 = vadd.f32 %v3292_v38, %v3291_v19  ;;  %v3301_v5 = vrot.slane %v3300_v25, 4  ;;  %v7269_v22 = vadd.f32 %v2826_v0, %v8171_v53  ;;  %v3691_v44 = vmul.f32 %v3401_v11, %v6105_v56  ;;  %v3407_v9 = vpop.f32.mrf.mxu0  ;;  %v8179_v10 = vld [vmem:[#allocation27_spill] sm:$0xff] }
 0x1c0   :  { %v3276_v16 = vrot.slane %v3275_v20, 2  ;;  %v3284_v13 = vadd.f32 %v3283_v28, %v3282_v24  ;;  %v3693_v43 = vmul.f32 %v3490_v45, %v6123_v8  ;;  %v3699_v26 = vmul.f32 %v3407_v9, %v8159_v4  ;;  %v3496_v55 = vpop.f32.mrf.mxu1 }
 0x1c1   :  { %v3294_v51 = vrot.slane %v3293_v7, 2  ;;  %v3302_v57 = vadd.f32 %v3301_v5, %v3300_v25  ;;  %v3692_v31 = vmul.f32 %v3403_v39, %v8093_v14  ;;  %v3701_v18 = vmul.f32 %v3496_v55, %v8160_v54  ;;  %v3409_v53 = vpop.f32.mrf.mxu0 }
 0x1c2   :  { %v3277_v30 = vadd.f32 %v3276_v16, %v3275_v20  ;;  %v3285_v12 = vrot.slane %v3284_v13, 2  ;;  %v3694_v0 = vmul.f32 %v3492_v50, %v8138_v21  ;;  %v3700_v46 = vmul.f32 %v3409_v53, %v8161_v40  ;;  %v3498_v24 = vpop.f32.mrf.mxu1 }
 0x1c3   :  { %v3295_v19 = vadd.f32 %v3294_v51, %v3293_v7  ;;  %v3303_v60 = vrot.slane %v3302_v57, 2  ;;  %v3723_v45 = vadd.f32 %v3699_v26, %v3691_v44  ;;  %v3702_v25 = vmul.f32 %v3498_v24, %v6185_v42  ;;  %v3413_v28 = vpop.f32.mrf.mxu0 }
 0x1c4   :  { %v3278_v11 = vrot.slane %v3277_v30, 1  ;;  %v3286_v38 = vadd.f32 %v3285_v12, %v3284_v13  ;;  %v3741_v16 = vadd.f32 %v3701_v18, %v3693_v43  ;;  %v3707_v39 = vmul.f32 %v3413_v28, %v8162_v6  ;;  %v3502_v9 = vpop.f32.mrf.mxu1  ;;  %v8180_v13 = vld [vmem:[#allocation28_spill] sm:$0xff] }
 0x1c5   :  { %v3296_v20 = vrot.slane %v3295_v19, 1  ;;  %v3304_v5 = vadd.f32 %v3303_v60, %v3302_v57  ;;  %v3732_v51 = vadd.f32 %v3700_v46, %v3692_v31  ;;  %v3709_v50 = vmul.f32 %v3502_v9, %v8179_v10  ;;  %v3415_v35 = vpop.f32.mrf.mxu0 }
 0x1c6   :  { %v3279_v55 = vadd.f32 %v3278_v11, %v3277_v30  ;;  %v3287_v7 = vrot.slane %v3286_v38, 1  ;;  %v3750_v21 = vadd.f32 %v3702_v25, %v3694_v0  ;;  %v3708_v44 = vmul.f32 %v3415_v35, %v8180_v13  ;;  %v3504_v26 = vpop.f32.mrf.mxu1 }
 0x1c7   :  { %v3297_v53 = vadd.f32 %v3296_v20, %v3295_v19  ;;  %v3305_v52 = vrot.slane %v3304_v5, 1  ;;  %v3724_v57 = vadd.f32 %v3723_v45, %v3707_v39  ;;  %v3710_v43 = vmul.f32 %v3504_v26, %v8140_v1  ;;  %v3419_v18 = vpop.f32.mrf.mxu0 }
 0x1c8   :  { %v3311_v12 = vmul.f32 %v3279_v55, %v8172_v34  ;;  %v3288_v24 = vadd.f32 %v3287_v7, %v3286_v38  ;;  %v3742_v31 = vadd.f32 %v3741_v16, %v3709_v50  ;;  %v3715_v46 = vmul.f32 %v3419_v18, %v8111_v36  ;;  %v3508_v11 = vpop.f32.mrf.mxu1 }
 0x1c9   :  { %v3313_v30 = vmul.f32 %v3297_v53, %v8172_v34  ;;  %v3306_v60 = vadd.f32 %v3305_v52, %v3304_v5  ;;  %v3733_v35 = vadd.f32 %v3732_v51, %v3708_v44  ;;  %v3717_v25 = vmul.f32 %v3508_v11, %v8112_v29  ;;  %v3421_v28 = vpop.f32.mrf.mxu0 }
 0x1ca   :  { %v7286_v19 = vadd.f32 %v3311_v12, %v2831_v23  ;;  %v3312_v0 = vmul.f32 %v3288_v24, %v8172_v34  ;;  %v3725_v20 = vadd.f32 %v3724_v57, %v3715_v46  ;;  %v3716_v39 = vmul.f32 %v3421_v28, %v8115_v33  ;;  %v3510_v52 = vpop.f32.mrf.mxu1 }
 0x1cb   :  { %v7290_v38 = vadd.f32 %v3313_v30, %v2833_v17  ;;  %v3314_v45 = vmul.f32 %v3306_v60, %v8172_v34  ;;  %v3751_v16 = vadd.f32 %v3750_v21, %v3710_v43  ;;  %v3743_v23 = vadd.f32 %v3742_v31, %v3717_v25  ;;  %v3579_v55 = vpop.f32.mrf.mxu0 }
 0x1cc   :  { %8181 = vst [vmem:[#allocation19_spill] sm:$0xff] %v7286_v19  ;;  %v7295_v5 = vadd.f32 %v3312_v0, %v7266_v2  ;;  %v3718_v9 = vmul.f32 %v3510_v52, %v8120_v32  ;;  %v3726_v51 = vrot.slane %v3725_v20, 4  ;;  %v3734_v17 = vadd.f32 %v3733_v35, %v3716_v39  ;;  %v3668_v50 = vpop.f32.mrf.mxu1 }
 0x1cd   :  { %8182 = vst [vmem:[#allocation20_spill] sm:$0xff] %v7290_v38  ;;  %v7299_v7 = vadd.f32 %v3314_v45, %v7269_v22  ;;  %v3744_v53 = vrot.slane %v3743_v23, 4  ;;  %v3581_v44 = vpop.f32.mrf.mxu0 }
 0x1ce   :  { %8183 = vst [vmem:[#allocation29_spill] sm:$0xff] %v7295_v5  ;;  %v3752_v34 = vadd.f32 %v3751_v16, %v3718_v9  ;;  %v3727_v26 = vadd.f32 %v3726_v51, %v3725_v20  ;;  %v3735_v12 = vrot.slane %v3734_v17, 4  ;;  %v3670_v24 = vpop.f32.mrf.mxu1  ;;  %v3695_v20 = vmul.f32 %v3579_v55, %v8144_v15  ;;  %v8185_v16 = vld [vmem:[#allocation35_spill] sm:$0xff]  ;;  %v8186_v9 = vld [vmem:[#allocation36_spill] sm:$0xff] }
 0x1cf   :  { %8184 = vst [vmem:[#allocation12_spill] sm:$0xff] %v7299_v7  ;;  %v3745_v57 = vadd.f32 %v3744_v53, %v3743_v23  ;;  %v3585_v18 = vpop.f32.mrf.mxu0  ;;  %v3697_v23 = vmul.f32 %v3668_v50, %v8185_v16  ;;  %v3696_v51 = vmul.f32 %v3581_v44, %v8186_v9  ;;  %v8187_v7 = vld [vmem:[#allocation40_spill] sm:$0xff] }
 0x1d0   :  { %v3753_v2 = vrot.slane %v3752_v34, 4  ;;  %v3728_v21 = vrot.slane %v3727_v26, 2  ;;  %v3736_v43 = vadd.f32 %v3735_v12, %v3734_v17  ;;  %v3674_v30 = vpop.f32.mrf.mxu1  ;;  %v3703_v22 = vmul.f32 %v3585_v18, %v6540_v37 }
 0x1d1   :  { %v3587_v31 = vpop.f32.mrf.mxu0  ;;  %v3746_v46 = vrot.slane %v3745_v57, 2  ;;  %v3705_v25 = vmul.f32 %v3674_v30, %v8164_v61 }
 0x1d2   :  { %v3754_v60 = vadd.f32 %v3753_v2, %v3752_v34  ;;  %v3676_v11 = vpop.f32.mrf.mxu1  ;;  %v3729_v0 = vadd.f32 %v3728_v21, %v3727_v26  ;;  %v3737_v35 = vrot.slane %v3736_v43, 2  ;;  %v3759_v34 = vadd.f32 %v3703_v22, %v3695_v20 }
 0x1d3   :  { %v3747_v53 = vadd.f32 %v3746_v46, %v3745_v57  ;;  %v3704_v12 = vmul.f32 %v3587_v31, %v8167_v3  ;;  %v3777_v30 = vadd.f32 %v3705_v25, %v3697_v23  ;;  %v3706_v55 = vmul.f32 %v3676_v11, %v8187_v7  ;;  %v8188_v57 = vld [vmem:[#allocation37_spill] sm:$0xff] }
 0x1d4   :  { %v3591_v28 = vpop.f32.mrf.mxu0  ;;  %v3755_v45 = vrot.slane %v3754_v60, 2  ;;  %v3730_v18 = vrot.slane %v3729_v0, 1  ;;  %v3738_v21 = vadd.f32 %v3737_v35, %v3736_v43  ;;  %v3698_v46 = vmul.f32 %v3670_v24, %v8188_v57 }
 0x1d5   :  { %v3711_v39 = vmul.f32 %v3591_v28, %v8169_v27 }
 0x1d6   :  { %v3680_v52 = vpop.f32.mrf.mxu1  ;;  %v3593_v17 = vpop.f32.mrf.mxu0  ;;  %v3756_v28 = vadd.f32 %v3755_v45, %v3754_v60  ;;  %v3731_v60 = vadd.f32 %v3730_v18, %v3729_v0  ;;  %v3748_v45 = vrot.slane %v3747_v53, 1 }
 0x1d7   :  { %v3713_v26 = vmul.f32 %v3680_v52, %v8153_v48  ;;  %v3760_v38 = vadd.f32 %v3759_v34, %v3711_v39  ;;  %v3712_v50 = vmul.f32 %v3593_v17, %v8154_v47  ;;  %v3768_v52 = vadd.f32 %v3704_v12, %v3696_v51 }
 0x1d8   :  { %v3682_v2 = vpop.f32.mrf.mxu1  ;;  %v3597_v5 = vpop.f32.mrf.mxu0  ;;  %v3786_v39 = vadd.f32 %v3706_v55, %v3698_v46  ;;  %v3739_v17 = vrot.slane %v3738_v21, 1  ;;  %v3757_v34 = vrot.slane %v3756_v28, 1 }
 0x1d9   :  { %v3719_v44 = vmul.f32 %v3597_v5, %v8156_v59  ;;  %v3714_v31 = vmul.f32 %v3682_v2, %v8155_v49  ;;  %v3778_v43 = vadd.f32 %v3777_v30, %v3713_v26  ;;  %v3769_v24 = vadd.f32 %v3768_v52, %v3712_v50 }
 0x1da   :  { %v3686_v19 = vpop.f32.mrf.mxu1  ;;  %v3599_v20 = vpop.f32.mrf.mxu0  ;;  %v3749_v30 = vadd.f32 %v3748_v45, %v3747_v53  ;;  %v3740_v18 = vadd.f32 %v3739_v17, %v3738_v21  ;;  %v3758_v55 = vadd.f32 %v3757_v34, %v3756_v28 }
 0x1db   :  { %v3721_v22 = vmul.f32 %v3686_v19, %v8173_v63  ;;  %v3761_v35 = vadd.f32 %v3760_v38, %v3719_v44  ;;  %v3720_v11 = vmul.f32 %v3599_v20, %v8174_v62  ;;  %v3787_v49 = vadd.f32 %v3786_v39, %v3714_v31  ;;  %v8189_v38 = vld [vmem:[#allocation31_spill] sm:$0xff] }
 0x1dc   :  { %v3688_v25 = vpop.f32.mrf.mxu1  ;;  %v3889_v5 = vpop.f32.mrf.mxu0  ;;  %v3795_v26 = vmul.f32 %v3731_v60, %v8189_v38  ;;  %v3797_v31 = vmul.f32 %v3749_v30, %v8189_v38  ;;  %v3798_v53 = vmul.f32 %v3758_v55, %v8189_v38 }
 0x1dd   :  { %v3722_v23 = vmul.f32 %v3688_v25, %v8176_v58  ;;  %v3779_v59 = vadd.f32 %v3778_v43, %v3721_v22  ;;  %v3762_v19 = vrot.slane %v3761_v35, 4  ;;  %v3770_v51 = vadd.f32 %v3769_v24, %v3720_v11 }
 0x1de   :  { %v3978_v2 = vpop.f32.mrf.mxu1  ;;  %v3891_v63 = vpop.f32.mrf.mxu0  ;;  %v7319_v22 = vadd.f32 %v3795_v26, %v7243_v41  ;;  %v4179_v45 = vmul.f32 %v3889_v5, %v6105_v56  ;;  %v8190_v5 = vld [vmem:[#allocation22_spill] sm:$0xff] }
 0x1df   :  { %v3788_v44 = vadd.f32 %v3787_v49, %v3722_v23  ;;  %v3780_v46 = vrot.slane %v3779_v59, 4  ;;  %v3763_v25 = vadd.f32 %v3762_v19, %v3761_v35  ;;  %v3771_v62 = vrot.slane %v3770_v51, 4 }
 0x1e0   :  { %v3980_v12 = vpop.f32.mrf.mxu1  ;;  %v3796_v49 = vmul.f32 %v3740_v18, %v8189_v38 }
 0x1e1   :  { %v3895_v0 = vpop.f32.mrf.mxu0  ;;  %v3789_v52 = vrot.slane %v3788_v44, 4  ;;  %v3781_v21 = vadd.f32 %v3780_v46, %v3779_v59  ;;  %v3764_v60 = vrot.slane %v3763_v25, 2  ;;  %v3772_v17 = vadd.f32 %v3771_v62, %v3770_v51 }
 0x1e2   :  { %v3984_v20 = vpop.f32.mrf.mxu1  ;;  %v4187_v43 = vmul.f32 %v3895_v0, %v8159_v4  ;;  %v4181_v4 = vmul.f32 %v3978_v2, %v6123_v8 }
 0x1e3   :  { %v3897_v58 = vpop.f32.mrf.mxu0  ;;  %v4189_v28 = vmul.f32 %v3984_v20, %v8160_v54  ;;  %v3790_v59 = vadd.f32 %v3789_v52, %v3788_v44  ;;  %v4180_v54 = vmul.f32 %v3891_v63, %v8093_v14  ;;  %v3782_v56 = vrot.slane %v3781_v21, 2  ;;  %v8191_v20 = vld [vmem:[#allocation17_spill] sm:$0xff] }
 0x1e4   :  { %v3986_v50 = vpop.f32.mrf.mxu1  ;;  %v4188_v41 = vmul.f32 %v3897_v58, %v8161_v40  ;;  %v4211_v26 = vadd.f32 %v4187_v43, %v4179_v45  ;;  %v4182_v40 = vmul.f32 %v3980_v12, %v8190_v5  ;;  %v7336_v8 = vadd.f32 %v3764_v60, %v3763_v25 }
 0x1e5   :  { %v3901_v11 = vpop.f32.mrf.mxu0  ;;  %v4190_v34 = vmul.f32 %v3986_v50, %v6185_v42  ;;  %v4229_v58 = vadd.f32 %v4189_v28, %v4181_v4  ;;  %v3773_v44 = vrot.slane %v3772_v17, 2  ;;  %v3791_v55 = vrot.slane %v3790_v59, 2  ;;  %v8192_v28 = vld [vmem:[#allocation18_spill] sm:$0xff] }
 0x1e6   :  { %v3990_v35 = vpop.f32.mrf.mxu1  ;;  %v4195_v39 = vmul.f32 %v3901_v11, %v8162_v6  ;;  %v4220_v42 = vadd.f32 %v4188_v41, %v4180_v54  ;;  %v7342_v50 = vadd.f32 %v3797_v31, %v8191_v20 }
 0x1e7   :  { %v3903_v23 = vpop.f32.mrf.mxu0  ;;  %v4197_v24 = vmul.f32 %v3990_v35, %v8179_v10  ;;  %v4238_v0 = vadd.f32 %v4190_v34, %v4182_v40  ;;  %v7346_v35 = vadd.f32 %v3796_v49, %v8192_v28 }
 0x1e8   :  { %v3992_v19 = vpop.f32.mrf.mxu1  ;;  %v4196_v30 = vmul.f32 %v3903_v23, %v8180_v13  ;;  %v4212_v2 = vadd.f32 %v4211_v26, %v4195_v39  ;;  %v3766_v39 = vrot.slane %v7336_v8, 1 }
 0x1e9   :  { %v4198_v6 = vmul.f32 %v3992_v19, %v8140_v1  ;;  %v4230_v14 = vadd.f32 %v4229_v58, %v4197_v24  ;;  %v7354_v24 = vadd.f32 %v3773_v44, %v3772_v17 }
 0x1ea   :  { %v4221_v12 = vadd.f32 %v4220_v42, %v4196_v30 }
 0x1eb   :  { %v3907_v62 = vpop.f32.mrf.mxu0  ;;  %v3996_v51 = vpop.f32.mrf.mxu1  ;;  %v4239_v25 = vadd.f32 %v4238_v0, %v4198_v6 }
 0x1ec   :  { %v4203_v10 = vmul.f32 %v3907_v62, %v8111_v36  ;;  %v4205_v63 = vmul.f32 %v3996_v51, %v8112_v29  ;;  %v8193_v29 = vld [vmem:[#allocation33_spill] sm:$0xff] }
 0x1ed   :  { %v3909_v13 = vpop.f32.mrf.mxu0  ;;  %v3998_v18 = vpop.f32.mrf.mxu1  ;;  %v7349_v60 = vadd.f32 %v3798_v53, %v8193_v29 }
 0x1ee   :  { %v4213_v46 = vadd.f32 %v4212_v2, %v4203_v10  ;;  %v4204_v1 = vmul.f32 %v3909_v13, %v8115_v33  ;;  %v4231_v52 = vadd.f32 %v4230_v14, %v4205_v63  ;;  %v4206_v43 = vmul.f32 %v3998_v18, %v8120_v32 }
 0x1ef   :  { %v4067_v36 = vpop.f32.mrf.mxu0  ;;  %v7352_v33 = vadd.f32 %v3782_v56, %v3781_v21  ;;  %v7356_v32 = vadd.f32 %v3791_v55, %v3790_v59 }
 0x1f0   :  { %v4156_v11 = vpop.f32.mrf.mxu1  ;;  %v4214_v45 = vrot.slane %v4213_v46, 4  ;;  %v4222_v41 = vadd.f32 %v4221_v12, %v4204_v1  ;;  %v4232_v31 = vrot.slane %v4231_v52, 4  ;;  %v4240_v23 = vadd.f32 %v4239_v25, %v4206_v43 }
 0x1f1   :  { %v4069_v4 = vpop.f32.mrf.mxu0  ;;  %v4183_v53 = vmul.f32 %v4067_v36, %v8144_v15  ;;  %v4185_v30 = vmul.f32 %v4156_v11, %v8185_v16 }
 0x1f2   :  { %v4158_v34 = vpop.f32.mrf.mxu1  ;;  %v4215_v19 = vadd.f32 %v4214_v45, %v4213_v46  ;;  %v4223_v49 = vrot.slane %v4222_v41, 4  ;;  %v4233_v54 = vadd.f32 %v4232_v31, %v4231_v52  ;;  %v4241_v26 = vrot.slane %v4240_v23, 4  ;;  %v8194_v45 = vld [vmem:[#allocation5_spill] sm:$0xff] }
 0x1f3   :  { %v4073_v5 = vpop.f32.mrf.mxu0  ;;  %v4184_v59 = vmul.f32 %v4069_v4, %v8186_v9  ;;  %v4186_v51 = vmul.f32 %v4158_v34, %v8188_v57  ;;  %v8196_v34 = vld [vmem:[#allocation7_spill] sm:$0xff] }
 0x1f4   :  { %v4162_v40 = vpop.f32.mrf.mxu1  ;;  %v4216_v21 = vrot.slane %v4215_v19, 2  ;;  %v4224_v56 = vadd.f32 %v4223_v49, %v4222_v41  ;;  %v4191_v58 = vmul.f32 %v4073_v5, %v6540_v37  ;;  %v4234_v17 = vrot.slane %v4233_v54, 2  ;;  %v8197_v49 = vld [vmem:[#allocation8_spill] sm:$0xff] }
 0x1f5   :  { %v4193_v6 = vmul.f32 %v4162_v40, %v8164_v61  ;;  %v4242_v62 = vadd.f32 %v4241_v26, %v4240_v23  ;;  %v4075_v42 = vpop.f32.mrf.mxu0  ;;  %v8195_v23 = vld [vmem:[#allocation32_spill] sm:$0xff] }
 0x1f6   :  { %v4164_v2 = vpop.f32.mrf.mxu1  ;;  %v4217_v10 = vadd.f32 %v4216_v21, %v4215_v19  ;;  %v4225_v15 = vrot.slane %v4224_v56, 2  ;;  %v4247_v44 = vadd.f32 %v4191_v58, %v4183_v53  ;;  %v4235_v0 = vadd.f32 %v4234_v17, %v4233_v54 }
 0x1f7   :  { %v4265_v16 = vadd.f32 %v4193_v6, %v4185_v30  ;;  %v4243_v14 = vrot.slane %v4242_v62, 2  ;;  %v4192_v63 = vmul.f32 %v4075_v42, %v8167_v3  ;;  %v4194_v37 = vmul.f32 %v4164_v2, %v8187_v7  ;;  %v4079_v13 = vpop.f32.mrf.mxu0  ;;  %v8199_v42 = vld [vmem:[#allocation10_spill] sm:$0xff] }
 0x1f8   :  { %v4168_v61 = vpop.f32.mrf.mxu1  ;;  %v4218_v18 = vrot.slane %v4217_v10, 1  ;;  %v4226_v55 = vadd.f32 %v4225_v15, %v4224_v56  ;;  %v4199_v9 = vmul.f32 %v4079_v13, %v8169_v27  ;;  %v4236_v12 = vrot.slane %v4235_v0, 1 }
 0x1f9   :  { %v4201_v57 = vmul.f32 %v4168_v61, %v8153_v48  ;;  %v4244_v46 = vadd.f32 %v4243_v14, %v4242_v62  ;;  %v4256_v1 = vadd.f32 %v4192_v63, %v4184_v59  ;;  %v4274_v20 = vadd.f32 %v4194_v37, %v4186_v51  ;;  %v4081_v25 = vpop.f32.mrf.mxu0  ;;  %v8198_v59 = vld [vmem:[#allocation9_spill] sm:$0xff] }
 0x1fa   :  { %v4170_v52 = vpop.f32.mrf.mxu1  ;;  %v4219_v43 = vadd.f32 %v4218_v18, %v4217_v10  ;;  %v4227_v36 = vrot.slane %v4226_v55, 1  ;;  %v4248_v11 = vadd.f32 %v4247_v44, %v4199_v9  ;;  %v4237_v28 = vadd.f32 %v4236_v12, %v4235_v0 }
 0x1fb   :  { %v4266_v3 = vadd.f32 %v4265_v16, %v4201_v57  ;;  %v4245_v7 = vrot.slane %v4244_v46, 1  ;;  %v4200_v29 = vmul.f32 %v4081_v25, %v8154_v47  ;;  %v4202_v41 = vmul.f32 %v4170_v52, %v8194_v45  ;;  %v4085_v31 = vpop.f32.mrf.mxu0 }
 0x1fc   :  { %v4174_v27 = vpop.f32.mrf.mxu1  ;;  %v4283_v48 = vmul.f32 %v4219_v43, %v8195_v23  ;;  %v4228_v4 = vadd.f32 %v4227_v36, %v4226_v55  ;;  %v4207_v19 = vmul.f32 %v4085_v31, %v8196_v34  ;;  %v4285_v26 = vmul.f32 %v4237_v28, %v8195_v23  ;;  %v8200_v31 = vld [vmem:[#allocation19_spill] sm:$0xff] }
 0x1fd   :  { %v4209_v54 = vmul.f32 %v4174_v27, %v8197_v49  ;;  %v4246_v53 = vadd.f32 %v4245_v7, %v4244_v46  ;;  %v4257_v30 = vadd.f32 %v4256_v1, %v4200_v29  ;;  %v4275_v5 = vadd.f32 %v4274_v20, %v4202_v41  ;;  %v4087_v40 = vpop.f32.mrf.mxu0  ;;  %v8201_v27 = vld [vmem:[#allocation20_spill] sm:$0xff] }
 0x1fe   :  { %v4176_v21 = vpop.f32.mrf.mxu1  ;;  %v4291_v47 = vadd.f32 %v4283_v48, %v7319_v22  ;;  %v4284_v56 = vmul.f32 %v4228_v4, %v8195_v23  ;;  %v4249_v58 = vadd.f32 %v4248_v11, %v4207_v19  ;;  %v4293_v17 = vadd.f32 %v4285_v26, %v7342_v50 }
 0x1ff   :  { %v4267_v6 = vadd.f32 %v4266_v3, %v4209_v54  ;;  %v4286_v62 = vmul.f32 %v4246_v53, %v8195_v23  ;;  %v4208_v51 = vmul.f32 %v4087_v40, %v8198_v59  ;;  %v4210_v2 = vmul.f32 %v4176_v21, %v8199_v42  ;;  %v8202_v53 = vld [vmem:[#allocation29_spill] sm:$0xff] }
 0x200   :  { %v3784_v10 = vrot.slane %v7352_v33, 1  ;;  %4713 = vst [vmem:[%s7430_s3 + $0x40] sm:$0xff] %v4291_v47  ;;  %v4292_v22 = vadd.f32 %v4284_v56, %v7346_v35  ;;  %v4250_v15 = vrot.slane %v4249_v58, 4  ;;  %4715 = vst [vmem:[%s7430_s3 + $0x50] sm:$0xff] %v4293_v17  ;;  %v3775_v37 = vrot.slane %v7354_v24, 1 }
 0x201   :  { %v4268_v44 = vrot.slane %v4267_v6, 4  ;;  %v4294_v50 = vadd.f32 %v4286_v62, %v7349_v60  ;;  %v4258_v16 = vadd.f32 %v4257_v30, %v4208_v51  ;;  %v4276_v0 = vadd.f32 %v4275_v5, %v4210_v2  ;;  %v8203_v5 = vld [vmem:[#allocation12_spill] sm:$0xff] }
 0x202   :  { %4714 = vst [vmem:[%s7430_s3 + $0x48] sm:$0xff] %v4292_v22  ;;  %v4251_v14 = vadd.f32 %v4250_v15, %v4249_v58  ;;  %v3793_v35 = vrot.slane %v7356_v32, 1  ;;  %v3767_v60 = vadd.f32 %v3766_v39, %v7336_v8  ;;  %v3785_v18 = vadd.f32 %v3784_v10, %v7352_v33 }
 0x203   :  { %v4269_v63 = vadd.f32 %v4268_v44, %v4267_v6  ;;  %4716 = vst [vmem:[%s7430_s3 + $0x58] sm:$0xff] %v4294_v50  ;;  %v4259_v13 = vrot.slane %v4258_v16, 4  ;;  %v4277_v61 = vrot.slane %v4276_v0, 4  ;;  %v3776_v20 = vadd.f32 %v3775_v37, %v7354_v24 }
 0x204   :  { %v4252_v55 = vrot.slane %v4251_v14, 2  ;;  %v3794_v25 = vadd.f32 %v3793_v35, %v7356_v32  ;;  %v3799_v36 = vmul.f32 %v3767_v60, %v8189_v38  ;;  %v3801_v11 = vmul.f32 %v3785_v18, %v8189_v38 }
 0x205   :  { %v4270_v9 = vrot.slane %v4269_v63, 2  ;;  %v4260_v57 = vadd.f32 %v4259_v13, %v4258_v16  ;;  %v4278_v12 = vadd.f32 %v4277_v61, %v4276_v0  ;;  %v3800_v29 = vmul.f32 %v3776_v20, %v8189_v38 }
 0x206   :  { %v4253_v46 = vadd.f32 %v4252_v55, %v4251_v14  ;;  %v3802_v45 = vmul.f32 %v3794_v25, %v8189_v38  ;;  %v3807_v32 = vadd.f32 %v3799_v36, %v8200_v31  ;;  %v3809_v48 = vadd.f32 %v3801_v11, %v8201_v27 }
 0x207   :  { %v4271_v1 = vadd.f32 %v4270_v9, %v4269_v63  ;;  %v4261_v52 = vrot.slane %v4260_v57, 2  ;;  %v4279_v43 = vrot.slane %v4278_v12, 2  ;;  %v3808_v30 = vadd.f32 %v3800_v29, %v8202_v53 }
 0x208   :  { %v4254_v3 = vrot.slane %v4253_v46, 1  ;;  %v3810_v40 = vadd.f32 %v3802_v45, %v8203_v5 }
 0x209   :  { %v4272_v8 = vrot.slane %v4271_v1, 1  ;;  %v4262_v39 = vadd.f32 %v4261_v52, %v4260_v57  ;;  %v4280_v33 = vadd.f32 %v4279_v43, %v4278_v12 }
 0x20a   :  { %v4255_v28 = vadd.f32 %v4254_v3, %v4253_v46 }
 0x20b   :  { %v4273_v7 = vadd.f32 %v4272_v8, %v4271_v1  ;;  %v4263_v41 = vrot.slane %v4262_v39, 1  ;;  %v4281_v24 = vrot.slane %v4280_v33, 1 }
 0x20c   :  { %v4287_v4 = vmul.f32 %v4255_v28, %v8195_v23 }
 0x20d   :  { %v4289_v34 = vmul.f32 %v4273_v7, %v8195_v23  ;;  %v4264_v19 = vadd.f32 %v4263_v41, %v4262_v39  ;;  %v4282_v49 = vadd.f32 %v4281_v24, %v4280_v33 }
 0x20e   :  { %v4295_v54 = vadd.f32 %v4287_v4, %v3807_v32 }
 0x20f   :  { %v4297_v26 = vadd.f32 %v4289_v34, %v3809_v48  ;;  %v4288_v38 = vmul.f32 %v4264_v19, %v8195_v23  ;;  %v4290_v21 = vmul.f32 %v4282_v49, %v8195_v23 }
 0x210   :  { %4717 = vst [vmem:[%s7430_s3 + $0x60] sm:$0xff] %v4295_v54 }
 0x211   :  { %4719 = vst [vmem:[%s7430_s3 + $0x70] sm:$0xff] %v4297_v26  ;;  %v4296_v47 = vadd.f32 %v4288_v38, %v3808_v30  ;;  %v4298_v56 = vadd.f32 %v4290_v21, %v3810_v40 }
 0x213   :  { %4718 = vst [vmem:[%s7430_s3 + $0x68] sm:$0xff] %v4296_v47  ;;  %4720 = vst [vmem:[%s7430_s3 + $0x78] sm:$0xff] %v4298_v56 }
 0x214   :  { %4312 = vsyncpa [#allocation3], 1 }

</bundles_post_ra>
